<compile_context>
chip_gen: v5e
topology: v5e:2x2
jax: 0.10.0
libtpu: 0.0.40
codegen_flags: <defaults>
</compile_context>

<pallas_src>
import jax
import jax.numpy as jnp
from jax import lax
from jax.experimental import pallas as pl
from jax.experimental.pallas import tpu as pltpu


# Per-triangle attribute rows in tri_data (attribute-major (N_ATTR, T): the
# long axis is last, so SMEM padding stays proportional to the data).
_A0, _B0, _C0 = 0, 1, 2        # b0 = A0*px + B0*py + C0   (already / area)
_A1, _B1, _C1 = 3, 4, 5        # b1 = A1*px + B1*py + C1
_DZ0, _DZ1, _Z2 = 6, 7, 8      # zc  = Z2 + b0*DZ0 + b1*DZ1
_DW0, _DW1, _W2 = 9, 10, 11    # den = W2 + b0*DW0 + b1*DW1  (interp of 1/w)
_XMIN, _XMAX, _YMIN, _YMAX = 12, 13, 14, 15
N_ATTR = 16


# ---------------------------------------------------------------------------
# Raster kernel: software rasterize + perspective-correct interpolation over
# one (C, TILE_R, TILE_C) image tile (stands in for dr.rasterize +
# dr.interpolate).
# ---------------------------------------------------------------------------
def _raster_kernel(tri_ref, col_ref, out_ref, zbuf):
    C, TR, TC = out_ref.shape
    T = tri_ref.shape[1]
    out_dtype = out_ref.dtype

    y0 = (pl.program_id(0) * TR).astype(jnp.float32)
    x0 = (pl.program_id(1) * TC).astype(jnp.float32)

    px = x0 + lax.broadcasted_iota(jnp.int32, (TR, TC), 1).astype(jnp.float32) + 0.5
    py = y0 + lax.broadcasted_iota(jnp.int32, (TR, TC), 0).astype(jnp.float32) + 0.5

    # z-buffer init to the far NDC plane (1.0) -> the `zc <= 1` test is folded
    # into the depth compare.  out_ref is VMEM-resident and visited exactly
    # once per grid point, so it is used directly as the color accumulator.
    zbuf[...] = jnp.ones_like(zbuf)
    out_ref[...] = jnp.zeros_like(out_ref)

    tile_x1 = x0 + float(TC)
    tile_y1 = y0 + float(TR)

    @pl.loop(0, T, unroll=True)
    def _(t):
        # Scalar bbox-vs-tile test: skip all per-pixel work if the triangle
        # cannot touch this tile.
        overlaps = ((tri_ref[_XMIN, t] < tile_x1) & (tri_ref[_XMAX, t] > x0) &
                    (tri_ref[_YMIN, t] < tile_y1) & (tri_ref[_YMAX, t] > y0))

        @pl.when(overlaps)
        def _():
            # Screen-space barycentrics from precomputed plane coefficients.
            b0 = tri_ref[_A0, t] * px + tri_ref[_B0, t] * py + tri_ref[_C0, t]
            b1 = tri_ref[_A1, t] * px + tri_ref[_B1, t] * py + tri_ref[_C1, t]
            inside = (b0 >= 0.0) & (b1 >= 0.0) & ((b0 + b1) <= 1.0)

            # z-buffer value (affine in screen space over ndc z).
            zc = tri_ref[_Z2, t] + b0 * tri_ref[_DZ0, t] + b1 * tri_ref[_DZ1, t]
            # Perspective-correct denominator (interpolated 1/w).
            den = tri_ref[_W2, t] + b0 * tri_ref[_DW0, t] + b1 * tri_ref[_DW1, t]
            den_ok = den > 1e-12
            inv_den = pl.reciprocal(jnp.where(den_ok, den, 1.0), approx=True)

            z_cur = zbuf[...]   # single full-tile read, reused below
            valid = inside & den_ok & (zc >= -1.0) & (zc < z_cur)
            zbuf[...] = jnp.where(valid, zc, z_cur)

            # Color path: optionally bf16 on v6e/v7x (out_dtype), f32 on v5e.
            b0c = b0.astype(out_dtype)
            b1c = b1.astype(out_dtype)
            invd = inv_den.astype(out_dtype)
            for c in range(C):
                # colors pre-scaled by 1/w in the wrapper:
                #   interp = (b0*c0/w0 + b1*c1/w1 + b2*c2/w2) / den
                dc0 = col_ref[c, t].astype(out_dtype)
                dc1 = col_ref[C + c, t].astype(out_dtype)
                c2 = col_ref[2 * C + c, t].astype(out_dtype)
                interp = invd * (c2 + b0c * dc0 + b1c * dc1)
                cur = out_ref[c, :, :]
                out_ref[c, :, :] = jnp.where(valid, interp, cur)


def _round_up(x, m):
    return ((x + m - 1) // m) * m


def _tile_config(R):
    """Generation-aware tile sizes, color dtype and scoped-VMEM limit."""
    try:
        kind = jax.devices()[0].device_kind.lower()
    except Exception:  # pragma: no cover - defensive
        kind = ""
    if "v6" in kind:
        # 128 MiB physical VMEM: fewer, larger tiles; bf16 color path.
        max_tr, max_tc = 512, 1024
        vmem_limit = 64 << 20
        col_dtype = jnp.bfloat16
    elif "v7" in kind:
        # 64 MiB physical VMEM per TC: keep tiles bounded; bf16 color path.
        max_tr, max_tc = 256, 512
        vmem_limit = 32 << 20
        col_dtype = jnp.bfloat16
    else:
        # v5e (no bf16 VPU) and unknown chips: conservative f32 path.
        max_tr, max_tc = 256, 512
        vmem_limit = 32 << 20
        col_dtype = jnp.float32
    tile_c = min(max_tc, _round_up(R, 128))   # lane-dense output stores
    tile_r = min(max_tr, _round_up(R, 16))    # sublane multiple (bf16-safe)
    return tile_r, tile_c, col_dtype, vmem_limit


def rasterize_interpolate(pos_clip, tri_idx, vtx_col, resolution):
    """dr.rasterize + dr.interpolate replacement. Returns (1, R, R, C)."""
    R = int(resolution)
    C = int(vtx_col.shape[1])
    T = int(tri_idx.shape[0])

    # Per-vertex screen-space quantities.
    # TODO(synk): no near-plane / w>0 clipping (nvdiffrast clips in clip space).
    invw = 1.0 / pos_clip[:, 3]
    sx = (pos_clip[:, 0] * invw * 0.5 + 0.5) * R
    sy = (pos_clip[:, 1] * invw * 0.5 + 0.5) * R
    zn = pos_clip[:, 2] * invw

    i0, i1, i2 = tri_idx[:, 0], tri_idx[:, 1], tri_idx[:, 2]
    sx0, sx1, sx2 = sx[i0], sx[i1], sx[i2]
    sy0, sy1, sy2 = sy[i0], sy[i1], sy[i2]
    z0, z1, z2 = zn[i0], zn[i1], zn[i2]
    w0, w1, w2 = invw[i0], invw[i1], invw[i2]

    area = (sx1 - sx0) * (sy2 - sy0) - (sy1 - sy0) * (sx2 - sx0)
    area_ok = jnp.abs(area) > 1e-9
    inv_area = jnp.where(area_ok, 1.0 / jnp.where(area_ok, area, 1.0), 0.0)

    # b0 = e12 / area as a plane in (px, py); degenerate tris get C0 = -1 so
    # the inside test fails everywhere.
    a0 = -(sy2 - sy1) * inv_area
    b0 = (sx2 - sx1) * inv_area
    c0 = jnp.where(area_ok,
                   ((sy2 - sy1) * sx1 - (sx2 - sx1) * sy1) * inv_area, -1.0)
    # b1 = e20 / area
    a1 = -(sy0 - sy2) * inv_area
    b1 = (sx0 - sx2) * inv_area
    c1 = jnp.where(area_ok,
                   ((sy0 - sy2) * sx2 - (sx0 - sx2) * sy2) * inv_area, -1.0)

    xmin = jnp.minimum(jnp.minimum(sx0, sx1), sx2)
    xmax = jnp.maximum(jnp.maximum(sx0, sx1), sx2)
    ymin = jnp.minimum(jnp.minimum(sy0, sy1), sy2)
    ymax = jnp.maximum(jnp.maximum(sy0, sy1), sy2)

    tri_data = jnp.stack(
        [a0, b0, c0, a1, b1, c1,
         z0 - z2, z1 - z2, z2,
         w0 - w2, w1 - w2, w2,
         xmin, xmax, ymin, ymax], axis=0).astype(jnp.float32)        # (16, T)

    # Colors pre-scaled by 1/w, deltas against vertex 2 (attribute-major).
    # Kept f32 in SMEM (scalar reads); cast per-channel inside the kernel.
    cw0 = vtx_col[i0] * w0[:, None]
    cw1 = vtx_col[i1] * w1[:, None]
    cw2 = vtx_col[i2] * w2[:, None]
    tri_col = jnp.concatenate([cw0 - cw2, cw1 - cw2, cw2],
                              axis=1).T.astype(jnp.float32)          # (3C, T)

    # Tile the (padded) image: lane-dense last dim, bounded VMEM per tile.
    tile_r, tile_c, col_dtype, vmem_limit = _tile_config(R)
    rp_r = _round_up(R, tile_r)
    rp_c = _round_up(R, tile_c)
    grid = (pl.cdiv(rp_r, tile_r), pl.cdiv(rp_c, tile_c))

    itemsize = jnp.dtype(col_dtype).itemsize
    cost = pl.CostEstimate(
        flops=int(T * rp_r * rp_c * (22 + 5 * C)),
        transcendentals=int(T * rp_r * rp_c),
        bytes_accessed=int(C * rp_r * rp_c * itemsize
                           + tri_data.size * 4 + tri_col.size * 4))

    color_chw = pl.pallas_call(
        _raster_kernel,
        out_shape=jax.ShapeDtypeStruct((C, rp_r, rp_c), col_dtype),
        grid=grid,
        in_specs=[pl.BlockSpec(memory_space=pltpu.MemorySpace.SMEM),
                  pl.BlockSpec(memory_space=pltpu.MemorySpace.SMEM)],
        out_specs=pl.BlockSpec((C, tile_r, tile_c), lambda i, j: (0, i, j)),
        scratch_shapes=[pltpu.VMEM((tile_r, tile_c), jnp.float32)],
        compiler_params=pltpu.CompilerParams(
            dimension_semantics=("parallel", "parallel"),
            vmem_limit_bytes=vmem_limit),
        cost_estimate=cost,
    )(tri_data, tri_col)

    # Crop padding, go NHWC, return f32 (reference returns float colors).
    # TODO(synk): dr.antialias (analytic silhouette antialiasing) has no clean
    # Pallas equivalent; color is returned un-antialiased.
    color = color_chw[:, :R, :R].astype(jnp.float32)
    return jnp.transpose(color, (1, 2, 0))[None]                     # NHWC


# ---------------------------------------------------------------------------
# Glue (plain JAX): camera matrices, vertex transform, sigmoid of colors.
# ---------------------------------------------------------------------------
def krt2gl(K, Rt, width, height, near, far):
    # TODO(synk): exact KRt2GL source not provided; standard OpenCV->OpenGL
    # conversion used.
    fx = K[0, 0]; fy = K[1, 1]; cx = K[0, 2]; cy = K[1, 2]
    z = jnp.zeros(())
    one = jnp.ones(())
    row0 = jnp.stack([2.0 * fx / width, z, (width - 2.0 * cx) / width, z])
    row1 = jnp.stack([z, 2.0 * fy / height, (height - 2.0 * cy) / height, z])
    row2 = jnp.stack([z, z, -(far + near) / (far - near),
                      -2.0 * far * near / (far - near)])
    row3 = jnp.stack([z, z, -one, z])
    p = jnp.stack([row0, row1, row2, row3])
    flip = jnp.diag(jnp.array([1.0, -1.0, -1.0, 1.0], jnp.float32))
    mv = flip @ jnp.concatenate(
        [Rt, jnp.array([[0.0, 0.0, 0.0, 1.0]], jnp.float32)], axis=0)
    return p, mv


class TriMeshRendererPallas:
    """Pallas port of TriMesh_Renderer.forward(K, Rt)."""

    def __init__(self, radius, tex_channel, resolution, key):
        # Deterministic stand-in for TriMesh(radius, tex_channel, ...): an
        # octahedron.
        # TODO(synk): TriMesh class definition not provided; mesh generated
        # synthetically.
        self.vertex = radius * jnp.array(
            [[1, 0, 0], [-1, 0, 0], [0, 1, 0], [0, -1, 0], [0, 0, 1], [0, 0, -1]],
            jnp.float32)
        self.tri_idx = jnp.array(
            [[0, 2, 4], [2, 1, 4], [1, 3, 4], [3, 0, 4],
             [2, 0, 5], [1, 2, 5], [3, 1, 5], [0, 3, 5]], jnp.int32)
        self.vertex_color = jax.random.normal(
            key, (self.vertex.shape[0], tex_channel), jnp.float32)
        self.resolution = resolution
        self.tex_channel = tex_channel

    def __call__(self, K, Rt, resolution=None):
        if resolution is None:
            resolution = self.resolution
        R = resolution
        V = self.vertex.shape[0]

        norm = jnp.linalg.norm(Rt[:, 3])
        p, mv = krt2gl(K, Rt, float(R), float(R), norm - 1.2, norm + 1.2)

        # mvp = p @ mv ; pos_clip = [pos, 1] @ mvp^T ; sigmoid(vertex_color)
        # -- tiny (4x4 / Vx4) work, done in plain JAX (no Pallas kernel).
        mvp = p @ mv
        posw = jnp.concatenate([self.vertex, jnp.ones((V, 1), jnp.float32)],
                               axis=1)
        pos_clip = posw @ mvp.T
        vcol_sig = jax.nn.sigmoid(self.vertex_color)

        return rasterize_interpolate(pos_clip, self.tri_idx, vcol_sig, R)


if __name__ == "__main__":
    key = jax.random.PRNGKey(0)
    resolution = 16
    renderer = TriMeshRendererPallas(radius=0.5, tex_channel=3,
                                     resolution=resolution, key=key)
    # Camera looking at the mesh from 3 units away, focal length = resolution.
    K = jnp.array([[float(resolution), 0.0, resolution / 2.0],
                   [0.0, float(resolution), resolution / 2.0],
                   [0.0, 0.0, 1.0]], jnp.float32)
    Rt = jnp.array([[1.0, 0.0, 0.0, 0.0],
                    [0.0, 1.0, 0.0, 0.0],
                    [0.0, 0.0, 1.0, 3.0]], jnp.float32)

    color = renderer(K, Rt)
    color = jax.block_until_ready(color)
    assert color.shape == (1, resolution, resolution, 3)
    assert bool(jnp.isfinite(color).all())
    print("KERNEL_OK")
</pallas_src>

<mosaic_0001>
module attributes {stable_mosaic.version = 11 : i64} {
  func.func @_raster_kernel(%arg0: i32, %arg1: i32, %arg2: memref<16x8xf32, #tpu.memory_space<smem>>, %arg3: memref<9x8xf32, #tpu.memory_space<smem>>, %arg4: memref<3x16x128xf32, #tpu.memory_space<vmem>>, %arg5: memref<16x128xf32, #tpu.memory_space<vmem>>) attributes {dimension_semantics = [#tpu.dimension_semantics<parallel>, #tpu.dimension_semantics<parallel>], iteration_bounds = array<i64: 1, 1>, scalar_prefetch = 0 : i64, scratch_operands = 1 : i64, tpu.core_type = #tpu.core_type<tc>, window_params = [{transform_indices = @transform_0, window_bounds = array<i64: 16, 8>}, {transform_indices = @transform_1, window_bounds = array<i64: 9, 8>}, {transform_indices = @transform_2, window_bounds = array<i64: 3, 16, 128>}]} {
    %c16_i32 = arith.constant 16 : i32
    %0 = arith.muli %arg0, %c16_i32 : i32
    %1 = arith.sitofp %0 : i32 to f32
    %c128_i32 = arith.constant 128 : i32
    %2 = arith.muli %arg1, %c128_i32 : i32
    %3 = arith.sitofp %2 : i32 to f32
    %4 = tpu.iota {dimensions = array<i32: 1>} : vector<16x128xi32>
    %5 = arith.sitofp %4 : vector<16x128xi32> to vector<16x128xf32>
    %6 = vector.broadcast %3 : f32 to vector<16x128xf32>
    %7 = arith.addf %6, %5 : vector<16x128xf32>
    %cst = arith.constant 5.000000e-01 : f32
    %8 = vector.broadcast %cst : f32 to vector<16x128xf32>
    %9 = arith.addf %7, %8 : vector<16x128xf32>
    %10 = tpu.iota {dimensions = array<i32: 0>} : vector<16x128xi32>
    %11 = arith.sitofp %10 : vector<16x128xi32> to vector<16x128xf32>
    %12 = vector.broadcast %1 : f32 to vector<16x128xf32>
    %13 = arith.addf %12, %11 : vector<16x128xf32>
    %cst_0 = arith.constant 5.000000e-01 : f32
    %14 = vector.broadcast %cst_0 : f32 to vector<16x128xf32>
    %15 = arith.addf %13, %14 : vector<16x128xf32>
    %cst_1 = arith.constant 1.000000e+00 : f32
    %16 = vector.broadcast %cst_1 : f32 to vector<16x128xf32>
    %c0 = arith.constant 0 : index
    %c0_2 = arith.constant 0 : index
    %17 = vector.load %arg5[%c0, %c0_2] : memref<16x128xf32, #tpu.memory_space<vmem>>, vector<16x128xf32>
    tpu.vector_store %arg5[%c0, %c0_2], %16 {strides = array<i32>} : memref<16x128xf32, #tpu.memory_space<vmem>>, vector<16x128xf32>,
    %cst_3 = arith.constant 0.000000e+00 : f32
    %18 = vector.broadcast %cst_3 : f32 to vector<3x16x128xf32>
    %c0_4 = arith.constant 0 : index
    %c0_5 = arith.constant 0 : index
    %c0_6 = arith.constant 0 : index
    %19 = vector.load %arg4[%c0_4, %c0_5, %c0_6] : memref<3x16x128xf32, #tpu.memory_space<vmem>>, vector<3x16x128xf32>
    tpu.vector_store %arg4[%c0_4, %c0_5, %c0_6], %18 {strides = array<i32>} : memref<3x16x128xf32, #tpu.memory_space<vmem>>, vector<3x16x128xf32>,
    %cst_7 = arith.constant 1.280000e+02 : f32
    %20 = arith.addf %3, %cst_7 : f32
    %cst_8 = arith.constant 1.600000e+01 : f32
    %21 = arith.addf %1, %cst_8 : f32
    %c0_i32 = arith.constant 0 : i32
    %c1_i32 = arith.constant 1 : i32
    %22 = arith.muli %c0_i32, %c1_i32 : i32
    %c0_i32_9 = arith.constant 0 : i32
    %23 = arith.addi %c0_i32_9, %22 : i32
    %c12 = arith.constant 12 : index
    %24 = arith.index_cast %23 : i32 to index
    %25 = memref.load %arg2[%c12, %24] : memref<16x8xf32, #tpu.memory_space<smem>>
    %26 = arith.cmpf olt, %25, %20 : f32
    %c13 = arith.constant 13 : index
    %27 = arith.index_cast %23 : i32 to index
    %28 = memref.load %arg2[%c13, %27] : memref<16x8xf32, #tpu.memory_space<smem>>
    %29 = arith.cmpf ogt, %28, %3 : f32
    %30 = arith.andi %26, %29 : i1
    %c14 = arith.constant 14 : index
    %31 = arith.index_cast %23 : i32 to index
    %32 = memref.load %arg2[%c14, %31] : memref<16x8xf32, #tpu.memory_space<smem>>
    %33 = arith.cmpf olt, %32, %21 : f32
    %34 = arith.andi %30, %33 : i1
    %c15 = arith.constant 15 : index
    %35 = arith.index_cast %23 : i32 to index
    %36 = memref.load %arg2[%c15, %35] : memref<16x8xf32, #tpu.memory_space<smem>>
    %37 = arith.cmpf ogt, %36, %1 : f32
    %38 = arith.andi %34, %37 : i1
    %39 = arith.extui %38 : i1 to i32
    %c0_i32_10 = arith.constant 0 : i32
    %40 = arith.cmpi ne, %39, %c0_i32_10 : i32
    scf.if %40 {
      %c0_61 = arith.constant 0 : index
      %174 = arith.index_cast %23 : i32 to index
      %175 = memref.load %arg2[%c0_61, %174] : memref<16x8xf32, #tpu.memory_space<smem>>
      %176 = vector.broadcast %175 : f32 to vector<16x128xf32>
      %177 = arith.mulf %176, %9 : vector<16x128xf32>
      %c1 = arith.constant 1 : index
      %178 = arith.index_cast %23 : i32 to index
      %179 = memref.load %arg2[%c1, %178] : memref<16x8xf32, #tpu.memory_space<smem>>
      %180 = vector.broadcast %179 : f32 to vector<16x128xf32>
      %181 = arith.mulf %180, %15 : vector<16x128xf32>
      %182 = arith.addf %177, %181 : vector<16x128xf32>
      %c2 = arith.constant 2 : index
      %183 = arith.index_cast %23 : i32 to index
      %184 = memref.load %arg2[%c2, %183] : memref<16x8xf32, #tpu.memory_space<smem>>
      %185 = vector.broadcast %184 : f32 to vector<16x128xf32>
      %186 = arith.addf %182, %185 : vector<16x128xf32>
      %c3 = arith.constant 3 : index
      %187 = arith.index_cast %23 : i32 to index
      %188 = memref.load %arg2[%c3, %187] : memref<16x8xf32, #tpu.memory_space<smem>>
      %189 = vector.broadcast %188 : f32 to vector<16x128xf32>
      %190 = arith.mulf %189, %9 : vector<16x128xf32>
      %c4 = arith.constant 4 : index
      %191 = arith.index_cast %23 : i32 to index
      %192 = memref.load %arg2[%c4, %191] : memref<16x8xf32, #tpu.memory_space<smem>>
      %193 = vector.broadcast %192 : f32 to vector<16x128xf32>
      %194 = arith.mulf %193, %15 : vector<16x128xf32>
      %195 = arith.addf %190, %194 : vector<16x128xf32>
      %c5 = arith.constant 5 : index
      %196 = arith.index_cast %23 : i32 to index
      %197 = memref.load %arg2[%c5, %196] : memref<16x8xf32, #tpu.memory_space<smem>>
      %198 = vector.broadcast %197 : f32 to vector<16x128xf32>
      %199 = arith.addf %195, %198 : vector<16x128xf32>
      %cst_62 = arith.constant 0.000000e+00 : f32
      %200 = vector.broadcast %cst_62 : f32 to vector<16x128xf32>
      %201 = arith.cmpf oge, %186, %200 : vector<16x128xf32>
      %cst_63 = arith.constant 0.000000e+00 : f32
      %202 = vector.broadcast %cst_63 : f32 to vector<16x128xf32>
      %203 = arith.cmpf oge, %199, %202 : vector<16x128xf32>
      %204 = arith.andi %201, %203 : vector<16x128xi1>
      %205 = arith.addf %186, %199 : vector<16x128xf32>
      %cst_64 = arith.constant 1.000000e+00 : f32
      %206 = vector.broadcast %cst_64 : f32 to vector<16x128xf32>
      %207 = arith.cmpf ole, %205, %206 : vector<16x128xf32>
      %208 = arith.andi %204, %207 : vector<16x128xi1>
      %c8 = arith.constant 8 : index
      %209 = arith.index_cast %23 : i32 to index
      %210 = memref.load %arg2[%c8, %209] : memref<16x8xf32, #tpu.memory_space<smem>>
      %c6 = arith.constant 6 : index
      %211 = arith.index_cast %23 : i32 to index
      %212 = memref.load %arg2[%c6, %211] : memref<16x8xf32, #tpu.memory_space<smem>>
      %213 = vector.broadcast %212 : f32 to vector<16x128xf32>
      %214 = arith.mulf %186, %213 : vector<16x128xf32>
      %215 = vector.broadcast %210 : f32 to vector<16x128xf32>
      %216 = arith.addf %215, %214 : vector<16x128xf32>
      %c7 = arith.constant 7 : index
      %217 = arith.index_cast %23 : i32 to index
      %218 = memref.load %arg2[%c7, %217] : memref<16x8xf32, #tpu.memory_space<smem>>
      %219 = vector.broadcast %218 : f32 to vector<16x128xf32>
      %220 = arith.mulf %199, %219 : vector<16x128xf32>
      %221 = arith.addf %216, %220 : vector<16x128xf32>
      %c11 = arith.constant 11 : index
      %222 = arith.index_cast %23 : i32 to index
      %223 = memref.load %arg2[%c11, %222] : memref<16x8xf32, #tpu.memory_space<smem>>
      %c9 = arith.constant 9 : index
      %224 = arith.index_cast %23 : i32 to index
      %225 = memref.load %arg2[%c9, %224] : memref<16x8xf32, #tpu.memory_space<smem>>
      %226 = vector.broadcast %225 : f32 to vector<16x128xf32>
      %227 = arith.mulf %186, %226 : vector<16x128xf32>
      %228 = vector.broadcast %223 : f32 to vector<16x128xf32>
      %229 = arith.addf %228, %227 : vector<16x128xf32>
      %c10 = arith.constant 10 : index
      %230 = arith.index_cast %23 : i32 to index
      %231 = memref.load %arg2[%c10, %230] : memref<16x8xf32, #tpu.memory_space<smem>>
      %232 = vector.broadcast %231 : f32 to vector<16x128xf32>
      %233 = arith.mulf %199, %232 : vector<16x128xf32>
      %234 = arith.addf %229, %233 : vector<16x128xf32>
      %cst_65 = arith.constant 9.99999996E-13 : f32
      %235 = vector.broadcast %cst_65 : f32 to vector<16x128xf32>
      %236 = arith.cmpf ogt, %234, %235 : vector<16x128xf32>
      %cst_66 = arith.constant 1.000000e+00 : f32
      %237 = vector.broadcast %cst_66 : f32 to vector<16x128xf32>
      %238 = arith.select %236, %234, %237 : vector<16x128xi1>, vector<16x128xf32>
      %239 = tpu.reciprocal %238 {approx = true} : vector<16x128xf32> -> vector<16x128xf32>
      %c0_67 = arith.constant 0 : index
      %c0_68 = arith.constant 0 : index
      %240 = vector.load %arg5[%c0_67, %c0_68] : memref<16x128xf32, #tpu.memory_space<vmem>>, vector<16x128xf32>
      %241 = arith.andi %208, %236 : vector<16x128xi1>
      %cst_69 = arith.constant -1.000000e+00 : f32
      %242 = vector.broadcast %cst_69 : f32 to vector<16x128xf32>
      %243 = arith.cmpf oge, %221, %242 : vector<16x128xf32>
      %244 = arith.andi %241, %243 : vector<16x128xi1>
      %245 = arith.cmpf olt, %221, %240 : vector<16x128xf32>
      %246 = arith.andi %244, %245 : vector<16x128xi1>
      %247 = arith.select %246, %221, %240 : vector<16x128xi1>, vector<16x128xf32>
      %c0_70 = arith.constant 0 : index
      %c0_71 = arith.constant 0 : index
      %248 = vector.load %arg5[%c0_70, %c0_71] : memref<16x128xf32, #tpu.memory_space<vmem>>, vector<16x128xf32>
      tpu.vector_store %arg5[%c0_70, %c0_71], %247 {strides = array<i32>} : memref<16x128xf32, #tpu.memory_space<vmem>>, vector<16x128xf32>,
      %c0_72 = arith.constant 0 : index
      %249 = arith.index_cast %23 : i32 to index
      %250 = memref.load %arg3[%c0_72, %249] : memref<9x8xf32, #tpu.memory_space<smem>>
      %c3_73 = arith.constant 3 : index
      %251 = arith.index_cast %23 : i32 to index
      %252 = memref.load %arg3[%c3_73, %251] : memref<9x8xf32, #tpu.memory_space<smem>>
      %c6_74 = arith.constant 6 : index
      %253 = arith.index_cast %23 : i32 to index
      %254 = memref.load %arg3[%c6_74, %253] : memref<9x8xf32, #tpu.memory_space<smem>>
      %255 = vector.broadcast %250 : f32 to vector<16x128xf32>
      %256 = arith.mulf %186, %255 : vector<16x128xf32>
      %257 = vector.broadcast %254 : f32 to vector<16x128xf32>
      %258 = arith.addf %257, %256 : vector<16x128xf32>
      %259 = vector.broadcast %252 : f32 to vector<16x128xf32>
      %260 = arith.mulf %199, %259 : vector<16x128xf32>
      %261 = arith.addf %258, %260 : vector<16x128xf32>
      %262 = arith.mulf %239, %261 : vector<16x128xf32>
      %c0_75 = arith.constant 0 : index
      %c0_76 = arith.constant 0 : index
      %c0_77 = arith.constant 0 : index
      %263 = vector.load %arg4[%c0_75, %c0_76, %c0_77] : memref<3x16x128xf32, #tpu.memory_space<vmem>>, vector<1x16x128xf32>
      %264 = vector.shape_cast %263 : vector<1x16x128xf32> to vector<16x128xf32>
      %265 = arith.select %246, %262, %264 : vector<16x128xi1>, vector<16x128xf32>
      %c0_78 = arith.constant 0 : index
      %c0_79 = arith.constant 0 : index
      %c0_80 = arith.constant 0 : index
      %266 = vector.load %arg4[%c0_78, %c0_79, %c0_80] : memref<3x16x128xf32, #tpu.memory_space<vmem>>, vector<1x16x128xf32>
      %267 = vector.shape_cast %266 : vector<1x16x128xf32> to vector<16x128xf32>
      %268 = vector.shape_cast %265 : vector<16x128xf32> to vector<1x16x128xf32>
      tpu.vector_store %arg4[%c0_78, %c0_79, %c0_80], %268 {strides = array<i32>} : memref<3x16x128xf32, #tpu.memory_space<vmem>>, vector<1x16x128xf32>,
      %c1_81 = arith.constant 1 : index
      %269 = arith.index_cast %23 : i32 to index
      %270 = memref.load %arg3[%c1_81, %269] : memref<9x8xf32, #tpu.memory_space<smem>>
      %c4_82 = arith.constant 4 : index
      %271 = arith.index_cast %23 : i32 to index
      %272 = memref.load %arg3[%c4_82, %271] : memref<9x8xf32, #tpu.memory_space<smem>>
      %c7_83 = arith.constant 7 : index
      %273 = arith.index_cast %23 : i32 to index
      %274 = memref.load %arg3[%c7_83, %273] : memref<9x8xf32, #tpu.memory_space<smem>>
      %275 = vector.broadcast %270 : f32 to vector<16x128xf32>
      %276 = arith.mulf %186, %275 : vector<16x128xf32>
      %277 = vector.broadcast %274 : f32 to vector<16x128xf32>
      %278 = arith.addf %277, %276 : vector<16x128xf32>
      %279 = vector.broadcast %272 : f32 to vector<16x128xf32>
      %280 = arith.mulf %199, %279 : vector<16x128xf32>
      %281 = arith.addf %278, %280 : vector<16x128xf32>
      %282 = arith.mulf %239, %281 : vector<16x128xf32>
      %c1_84 = arith.constant 1 : index
      %c0_85 = arith.constant 0 : index
      %c0_86 = arith.constant 0 : index
      %283 = vector.load %arg4[%c1_84, %c0_85, %c0_86] : memref<3x16x128xf32, #tpu.memory_space<vmem>>, vector<1x16x128xf32>
      %284 = vector.shape_cast %283 : vector<1x16x128xf32> to vector<16x128xf32>
      %285 = arith.select %246, %282, %284 : vector<16x128xi1>, vector<16x128xf32>
      %c1_87 = arith.constant 1 : index
      %c0_88 = arith.constant 0 : index
      %c0_89 = arith.constant 0 : index
      %286 = vector.load %arg4[%c1_87, %c0_88, %c0_89] : memref<3x16x128xf32, #tpu.memory_space<vmem>>, vector<1x16x128xf32>
      %287 = vector.shape_cast %286 : vector<1x16x128xf32> to vector<16x128xf32>
      %288 = vector.shape_cast %285 : vector<16x128xf32> to vector<1x16x128xf32>
      tpu.vector_store %arg4[%c1_87, %c0_88, %c0_89], %288 {strides = array<i32>} : memref<3x16x128xf32, #tpu.memory_space<vmem>>, vector<1x16x128xf32>,
      %c2_90 = arith.constant 2 : index
      %289 = arith.index_cast %23 : i32 to index
      %290 = memref.load %arg3[%c2_90, %289] : memref<9x8xf32, #tpu.memory_space<smem>>
      %c5_91 = arith.constant 5 : index
      %291 = arith.index_cast %23 : i32 to index
      %292 = memref.load %arg3[%c5_91, %291] : memref<9x8xf32, #tpu.memory_space<smem>>
      %c8_92 = arith.constant 8 : index
      %293 = arith.index_cast %23 : i32 to index
      %294 = memref.load %arg3[%c8_92, %293] : memref<9x8xf32, #tpu.memory_space<smem>>
      %295 = vector.broadcast %290 : f32 to vector<16x128xf32>
      %296 = arith.mulf %186, %295 : vector<16x128xf32>
      %297 = vector.broadcast %294 : f32 to vector<16x128xf32>
      %298 = arith.addf %297, %296 : vector<16x128xf32>
      %299 = vector.broadcast %292 : f32 to vector<16x128xf32>
      %300 = arith.mulf %199, %299 : vector<16x128xf32>
      %301 = arith.addf %298, %300 : vector<16x128xf32>
      %302 = arith.mulf %239, %301 : vector<16x128xf32>
      %c2_93 = arith.constant 2 : index
      %c0_94 = arith.constant 0 : index
      %c0_95 = arith.constant 0 : index
      %303 = vector.load %arg4[%c2_93, %c0_94, %c0_95] : memref<3x16x128xf32, #tpu.memory_space<vmem>>, vector<1x16x128xf32>
      %304 = vector.shape_cast %303 : vector<1x16x128xf32> to vector<16x128xf32>
      %305 = arith.select %246, %302, %304 : vector<16x128xi1>, vector<16x128xf32>
      %c2_96 = arith.constant 2 : index
      %c0_97 = arith.constant 0 : index
      %c0_98 = arith.constant 0 : index
      %306 = vector.load %arg4[%c2_96, %c0_97, %c0_98] : memref<3x16x128xf32, #tpu.memory_space<vmem>>, vector<1x16x128xf32>
      %307 = vector.shape_cast %306 : vector<1x16x128xf32> to vector<16x128xf32>
      %308 = vector.shape_cast %305 : vector<16x128xf32> to vector<1x16x128xf32>
      tpu.vector_store %arg4[%c2_96, %c0_97, %c0_98], %308 {strides = array<i32>} : memref<3x16x128xf32, #tpu.memory_space<vmem>>, vector<1x16x128xf32>,
    } else {
    }
    %c1_i32_11 = arith.constant 1 : i32
    %c1_i32_12 = arith.constant 1 : i32
    %41 = arith.muli %c1_i32_11, %c1_i32_12 : i32
    %c0_i32_13 = arith.constant 0 : i32
    %42 = arith.addi %c0_i32_13, %41 : i32
    %c12_14 = arith.constant 12 : index
    %43 = arith.index_cast %42 : i32 to index
    %44 = memref.load %arg2[%c12_14, %43] : memref<16x8xf32, #tpu.memory_space<smem>>
    %45 = arith.cmpf olt, %44, %20 : f32
    %c13_15 = arith.constant 13 : index
    %46 = arith.index_cast %42 : i32 to index
    %47 = memref.load %arg2[%c13_15, %46] : memref<16x8xf32, #tpu.memory_space<smem>>
    %48 = arith.cmpf ogt, %47, %3 : f32
    %49 = arith.andi %45, %48 : i1
    %c14_16 = arith.constant 14 : index
    %50 = arith.index_cast %42 : i32 to index
    %51 = memref.load %arg2[%c14_16, %50] : memref<16x8xf32, #tpu.memory_space<smem>>
    %52 = arith.cmpf olt, %51, %21 : f32
    %53 = arith.andi %49, %52 : i1
    %c15_17 = arith.constant 15 : index
    %54 = arith.index_cast %42 : i32 to index
    %55 = memref.load %arg2[%c15_17, %54] : memref<16x8xf32, #tpu.memory_space<smem>>
    %56 = arith.cmpf ogt, %55, %1 : f32
    %57 = arith.andi %53, %56 : i1
    %58 = arith.extui %57 : i1 to i32
    %c0_i32_18 = arith.constant 0 : i32
    %59 = arith.cmpi ne, %58, %c0_i32_18 : i32
    scf.if %59 {
      %c0_61 = arith.constant 0 : index
      %174 = arith.index_cast %42 : i32 to index
      %175 = memref.load %arg2[%c0_61, %174] : memref<16x8xf32, #tpu.memory_space<smem>>
      %176 = vector.broadcast %175 : f32 to vector<16x128xf32>
      %177 = arith.mulf %176, %9 : vector<16x128xf32>
      %c1 = arith.constant 1 : index
      %178 = arith.index_cast %42 : i32 to index
      %179 = memref.load %arg2[%c1, %178] : memref<16x8xf32, #tpu.memory_space<smem>>
      %180 = vector.broadcast %179 : f32 to vector<16x128xf32>
      %181 = arith.mulf %180, %15 : vector<16x128xf32>
      %182 = arith.addf %177, %181 : vector<16x128xf32>
      %c2 = arith.constant 2 : index
      %183 = arith.index_cast %42 : i32 to index
      %184 = memref.load %arg2[%c2, %183] : memref<16x8xf32, #tpu.memory_space<smem>>
      %185 = vector.broadcast %184 : f32 to vector<16x128xf32>
      %186 = arith.addf %182, %185 : vector<16x128xf32>
      %c3 = arith.constant 3 : index
      %187 = arith.index_cast %42 : i32 to index
      %188 = memref.load %arg2[%c3, %187] : memref<16x8xf32, #tpu.memory_space<smem>>
      %189 = vector.broadcast %188 : f32 to vector<16x128xf32>
      %190 = arith.mulf %189, %9 : vector<16x128xf32>
      %c4 = arith.constant 4 : index
      %191 = arith.index_cast %42 : i32 to index
      %192 = memref.load %arg2[%c4, %191] : memref<16x8xf32, #tpu.memory_space<smem>>
      %193 = vector.broadcast %192 : f32 to vector<16x128xf32>
      %194 = arith.mulf %193, %15 : vector<16x128xf32>
      %195 = arith.addf %190, %194 : vector<16x128xf32>
      %c5 = arith.constant 5 : index
      %196 = arith.index_cast %42 : i32 to index
      %197 = memref.load %arg2[%c5, %196] : memref<16x8xf32, #tpu.memory_space<smem>>
      %198 = vector.broadcast %197 : f32 to vector<16x128xf32>
      %199 = arith.addf %195, %198 : vector<16x128xf32>
      %cst_62 = arith.constant 0.000000e+00 : f32
      %200 = vector.broadcast %cst_62 : f32 to vector<16x128xf32>
      %201 = arith.cmpf oge, %186, %200 : vector<16x128xf32>
      %cst_63 = arith.constant 0.000000e+00 : f32
      %202 = vector.broadcast %cst_63 : f32 to vector<16x128xf32>
      %203 = arith.cmpf oge, %199, %202 : vector<16x128xf32>
      %204 = arith.andi %201, %203 : vector<16x128xi1>
      %205 = arith.addf %186, %199 : vector<16x128xf32>
      %cst_64 = arith.constant 1.000000e+00 : f32
      %206 = vector.broadcast %cst_64 : f32 to vector<16x128xf32>
      %207 = arith.cmpf ole, %205, %206 : vector<16x128xf32>
      %208 = arith.andi %204, %207 : vector<16x128xi1>
      %c8 = arith.constant 8 : index
      %209 = arith.index_cast %42 : i32 to index
      %210 = memref.load %arg2[%c8, %209] : memref<16x8xf32, #tpu.memory_space<smem>>
      %c6 = arith.constant 6 : index
      %211 = arith.index_cast %42 : i32 to index
      %212 = memref.load %arg2[%c6, %211] : memref<16x8xf32, #tpu.memory_space<smem>>
      %213 = vector.broadcast %212 : f32 to vector<16x128xf32>
      %214 = arith.mulf %186, %213 : vector<16x128xf32>
      %215 = vector.broadcast %210 : f32 to vector<16x128xf32>
      %216 = arith.addf %215, %214 : vector<16x128xf32>
      %c7 = arith.constant 7 : index
      %217 = arith.index_cast %42 : i32 to index
      %218 = memref.load %arg2[%c7, %217] : memref<16x8xf32, #tpu.memory_space<smem>>
      %219 = vector.broadcast %218 : f32 to vector<16x128xf32>
      %220 = arith.mulf %199, %219 : vector<16x128xf32>
      %221 = arith.addf %216, %220 : vector<16x128xf32>
      %c11 = arith.constant 11 : index
      %222 = arith.index_cast %42 : i32 to index
      %223 = memref.load %arg2[%c11, %222] : memref<16x8xf32, #tpu.memory_space<smem>>
      %c9 = arith.constant 9 : index
      %224 = arith.index_cast %42 : i32 to index
      %225 = memref.load %arg2[%c9, %224] : memref<16x8xf32, #tpu.memory_space<smem>>
      %226 = vector.broadcast %225 : f32 to vector<16x128xf32>
      %227 = arith.mulf %186, %226 : vector<16x128xf32>
      %228 = vector.broadcast %223 : f32 to vector<16x128xf32>
      %229 = arith.addf %228, %227 : vector<16x128xf32>
      %c10 = arith.constant 10 : index
      %230 = arith.index_cast %42 : i32 to index
      %231 = memref.load %arg2[%c10, %230] : memref<16x8xf32, #tpu.memory_space<smem>>
      %232 = vector.broadcast %231 : f32 to vector<16x128xf32>
      %233 = arith.mulf %199, %232 : vector<16x128xf32>
      %234 = arith.addf %229, %233 : vector<16x128xf32>
      %cst_65 = arith.constant 9.99999996E-13 : f32
      %235 = vector.broadcast %cst_65 : f32 to vector<16x128xf32>
      %236 = arith.cmpf ogt, %234, %235 : vector<16x128xf32>
      %cst_66 = arith.constant 1.000000e+00 : f32
      %237 = vector.broadcast %cst_66 : f32 to vector<16x128xf32>
      %238 = arith.select %236, %234, %237 : vector<16x128xi1>, vector<16x128xf32>
      %239 = tpu.reciprocal %238 {approx = true} : vector<16x128xf32> -> vector<16x128xf32>
      %c0_67 = arith.constant 0 : index
      %c0_68 = arith.constant 0 : index
      %240 = vector.load %arg5[%c0_67, %c0_68] : memref<16x128xf32, #tpu.memory_space<vmem>>, vector<16x128xf32>
      %241 = arith.andi %208, %236 : vector<16x128xi1>
      %cst_69 = arith.constant -1.000000e+00 : f32
      %242 = vector.broadcast %cst_69 : f32 to vector<16x128xf32>
      %243 = arith.cmpf oge, %221, %242 : vector<16x128xf32>
      %244 = arith.andi %241, %243 : vector<16x128xi1>
      %245 = arith.cmpf olt, %221, %240 : vector<16x128xf32>
      %246 = arith.andi %244, %245 : vector<16x128xi1>
      %247 = arith.select %246, %221, %240 : vector<16x128xi1>, vector<16x128xf32>
      %c0_70 = arith.constant 0 : index
      %c0_71 = arith.constant 0 : index
      %248 = vector.load %arg5[%c0_70, %c0_71] : memref<16x128xf32, #tpu.memory_space<vmem>>, vector<16x128xf32>
      tpu.vector_store %arg5[%c0_70, %c0_71], %247 {strides = array<i32>} : memref<16x128xf32, #tpu.memory_space<vmem>>, vector<16x128xf32>,
      %c0_72 = arith.constant 0 : index
      %249 = arith.index_cast %42 : i32 to index
      %250 = memref.load %arg3[%c0_72, %249] : memref<9x8xf32, #tpu.memory_space<smem>>
      %c3_73 = arith.constant 3 : index
      %251 = arith.index_cast %42 : i32 to index
      %252 = memref.load %arg3[%c3_73, %251] : memref<9x8xf32, #tpu.memory_space<smem>>
      %c6_74 = arith.constant 6 : index
      %253 = arith.index_cast %42 : i32 to index
      %254 = memref.load %arg3[%c6_74, %253] : memref<9x8xf32, #tpu.memory_space<smem>>
      %255 = vector.broadcast %250 : f32 to vector<16x128xf32>
      %256 = arith.mulf %186, %255 : vector<16x128xf32>
      %257 = vector.broadcast %254 : f32 to vector<16x128xf32>
      %258 = arith.addf %257, %256 : vector<16x128xf32>
      %259 = vector.broadcast %252 : f32 to vector<16x128xf32>
      %260 = arith.mulf %199, %259 : vector<16x128xf32>
      %261 = arith.addf %258, %260 : vector<16x128xf32>
      %262 = arith.mulf %239, %261 : vector<16x128xf32>
      %c0_75 = arith.constant 0 : index
      %c0_76 = arith.constant 0 : index
      %c0_77 = arith.constant 0 : index
      %263 = vector.load %arg4[%c0_75, %c0_76, %c0_77] : memref<3x16x128xf32, #tpu.memory_space<vmem>>, vector<1x16x128xf32>
      %264 = vector.shape_cast %263 : vector<1x16x128xf32> to vector<16x128xf32>
      %265 = arith.select %246, %262, %264 : vector<16x128xi1>, vector<16x128xf32>
      %c0_78 = arith.constant 0 : index
      %c0_79 = arith.constant 0 : index
      %c0_80 = arith.constant 0 : index
      %266 = vector.load %arg4[%c0_78, %c0_79, %c0_80] : memref<3x16x128xf32, #tpu.memory_space<vmem>>, vector<1x16x128xf32>
      %267 = vector.shape_cast %266 : vector<1x16x128xf32> to vector<16x128xf32>
      %268 = vector.shape_cast %265 : vector<16x128xf32> to vector<1x16x128xf32>
      tpu.vector_store %arg4[%c0_78, %c0_79, %c0_80], %268 {strides = array<i32>} : memref<3x16x128xf32, #tpu.memory_space<vmem>>, vector<1x16x128xf32>,
      %c1_81 = arith.constant 1 : index
      %269 = arith.index_cast %42 : i32 to index
      %270 = memref.load %arg3[%c1_81, %269] : memref<9x8xf32, #tpu.memory_space<smem>>
      %c4_82 = arith.constant 4 : index
      %271 = arith.index_cast %42 : i32 to index
      %272 = memref.load %arg3[%c4_82, %271] : memref<9x8xf32, #tpu.memory_space<smem>>
      %c7_83 = arith.constant 7 : index
      %273 = arith.index_cast %42 : i32 to index
      %274 = memref.load %arg3[%c7_83, %273] : memref<9x8xf32, #tpu.memory_space<smem>>
      %275 = vector.broadcast %270 : f32 to vector<16x128xf32>
      %276 = arith.mulf %186, %275 : vector<16x128xf32>
      %277 = vector.broadcast %274 : f32 to vector<16x128xf32>
      %278 = arith.addf %277, %276 : vector<16x128xf32>
      %279 = vector.broadcast %272 : f32 to vector<16x128xf32>
      %280 = arith.mulf %199, %279 : vector<16x128xf32>
      %281 = arith.addf %278, %280 : vector<16x128xf32>
      %282 = arith.mulf %239, %281 : vector<16x128xf32>
      %c1_84 = arith.constant 1 : index
      %c0_85 = arith.constant 0 : index
      %c0_86 = arith.constant 0 : index
      %283 = vector.load %arg4[%c1_84, %c0_85, %c0_86] : memref<3x16x128xf32, #tpu.memory_space<vmem>>, vector<1x16x128xf32>
      %284 = vector.shape_cast %283 : vector<1x16x128xf32> to vector<16x128xf32>
      %285 = arith.select %246, %282, %284 : vector<16x128xi1>, vector<16x128xf32>
      %c1_87 = arith.constant 1 : index
      %c0_88 = arith.constant 0 : index
      %c0_89 = arith.constant 0 : index
      %286 = vector.load %arg4[%c1_87, %c0_88, %c0_89] : memref<3x16x128xf32, #tpu.memory_space<vmem>>, vector<1x16x128xf32>
      %287 = vector.shape_cast %286 : vector<1x16x128xf32> to vector<16x128xf32>
      %288 = vector.shape_cast %285 : vector<16x128xf32> to vector<1x16x128xf32>
      tpu.vector_store %arg4[%c1_87, %c0_88, %c0_89], %288 {strides = array<i32>} : memref<3x16x128xf32, #tpu.memory_space<vmem>>, vector<1x16x128xf32>,
      %c2_90 = arith.constant 2 : index
      %289 = arith.index_cast %42 : i32 to index
      %290 = memref.load %arg3[%c2_90, %289] : memref<9x8xf32, #tpu.memory_space<smem>>
      %c5_91 = arith.constant 5 : index
      %291 = arith.index_cast %42 : i32 to index
      %292 = memref.load %arg3[%c5_91, %291] : memref<9x8xf32, #tpu.memory_space<smem>>
      %c8_92 = arith.constant 8 : index
      %293 = arith.index_cast %42 : i32 to index
      %294 = memref.load %arg3[%c8_92, %293] : memref<9x8xf32, #tpu.memory_space<smem>>
      %295 = vector.broadcast %290 : f32 to vector<16x128xf32>
      %296 = arith.mulf %186, %295 : vector<16x128xf32>
      %297 = vector.broadcast %294 : f32 to vector<16x128xf32>
      %298 = arith.addf %297, %296 : vector<16x128xf32>
      %299 = vector.broadcast %292 : f32 to vector<16x128xf32>
      %300 = arith.mulf %199, %299 : vector<16x128xf32>
      %301 = arith.addf %298, %300 : vector<16x128xf32>
      %302 = arith.mulf %239, %301 : vector<16x128xf32>
      %c2_93 = arith.constant 2 : index
      %c0_94 = arith.constant 0 : index
      %c0_95 = arith.constant 0 : index
      %303 = vector.load %arg4[%c2_93, %c0_94, %c0_95] : memref<3x16x128xf32, #tpu.memory_space<vmem>>, vector<1x16x128xf32>
      %304 = vector.shape_cast %303 : vector<1x16x128xf32> to vector<16x128xf32>
      %305 = arith.select %246, %302, %304 : vector<16x128xi1>, vector<16x128xf32>
      %c2_96 = arith.constant 2 : index
      %c0_97 = arith.constant 0 : index
      %c0_98 = arith.constant 0 : index
      %306 = vector.load %arg4[%c2_96, %c0_97, %c0_98] : memref<3x16x128xf32, #tpu.memory_space<vmem>>, vector<1x16x128xf32>
      %307 = vector.shape_cast %306 : vector<1x16x128xf32> to vector<16x128xf32>
      %308 = vector.shape_cast %305 : vector<16x128xf32> to vector<1x16x128xf32>
      tpu.vector_store %arg4[%c2_96, %c0_97, %c0_98], %308 {strides = array<i32>} : memref<3x16x128xf32, #tpu.memory_space<vmem>>, vector<1x16x128xf32>,
    } else {
    }
    %c2_i32 = arith.constant 2 : i32
    %c1_i32_19 = arith.constant 1 : i32
    %60 = arith.muli %c2_i32, %c1_i32_19 : i32
    %c0_i32_20 = arith.constant 0 : i32
    %61 = arith.addi %c0_i32_20, %60 : i32
    %c12_21 = arith.constant 12 : index
    %62 = arith.index_cast %61 : i32 to index
    %63 = memref.load %arg2[%c12_21, %62] : memref<16x8xf32, #tpu.memory_space<smem>>
    %64 = arith.cmpf olt, %63, %20 : f32
    %c13_22 = arith.constant 13 : index
    %65 = arith.index_cast %61 : i32 to index
    %66 = memref.load %arg2[%c13_22, %65] : memref<16x8xf32, #tpu.memory_space<smem>>
    %67 = arith.cmpf ogt, %66, %3 : f32
    %68 = arith.andi %64, %67 : i1
    %c14_23 = arith.constant 14 : index
    %69 = arith.index_cast %61 : i32 to index
    %70 = memref.load %arg2[%c14_23, %69] : memref<16x8xf32, #tpu.memory_space<smem>>
    %71 = arith.cmpf olt, %70, %21 : f32
    %72 = arith.andi %68, %71 : i1
    %c15_24 = arith.constant 15 : index
    %73 = arith.index_cast %61 : i32 to index
    %74 = memref.load %arg2[%c15_24, %73] : memref<16x8xf32, #tpu.memory_space<smem>>
    %75 = arith.cmpf ogt, %74, %1 : f32
    %76 = arith.andi %72, %75 : i1
    %77 = arith.extui %76 : i1 to i32
    %c0_i32_25 = arith.constant 0 : i32
    %78 = arith.cmpi ne, %77, %c0_i32_25 : i32
    scf.if %78 {
      %c0_61 = arith.constant 0 : index
      %174 = arith.index_cast %61 : i32 to index
      %175 = memref.load %arg2[%c0_61, %174] : memref<16x8xf32, #tpu.memory_space<smem>>
      %176 = vector.broadcast %175 : f32 to vector<16x128xf32>
      %177 = arith.mulf %176, %9 : vector<16x128xf32>
      %c1 = arith.constant 1 : index
      %178 = arith.index_cast %61 : i32 to index
      %179 = memref.load %arg2[%c1, %178] : memref<16x8xf32, #tpu.memory_space<smem>>
      %180 = vector.broadcast %179 : f32 to vector<16x128xf32>
      %181 = arith.mulf %180, %15 : vector<16x128xf32>
      %182 = arith.addf %177, %181 : vector<16x128xf32>
      %c2 = arith.constant 2 : index
      %183 = arith.index_cast %61 : i32 to index
      %184 = memref.load %arg2[%c2, %183] : memref<16x8xf32, #tpu.memory_space<smem>>
      %185 = vector.broadcast %184 : f32 to vector<16x128xf32>
      %186 = arith.addf %182, %185 : vector<16x128xf32>
      %c3 = arith.constant 3 : index
      %187 = arith.index_cast %61 : i32 to index
      %188 = memref.load %arg2[%c3, %187] : memref<16x8xf32, #tpu.memory_space<smem>>
      %189 = vector.broadcast %188 : f32 to vector<16x128xf32>
      %190 = arith.mulf %189, %9 : vector<16x128xf32>
      %c4 = arith.constant 4 : index
      %191 = arith.index_cast %61 : i32 to index
      %192 = memref.load %arg2[%c4, %191] : memref<16x8xf32, #tpu.memory_space<smem>>
      %193 = vector.broadcast %192 : f32 to vector<16x128xf32>
      %194 = arith.mulf %193, %15 : vector<16x128xf32>
      %195 = arith.addf %190, %194 : vector<16x128xf32>
      %c5 = arith.constant 5 : index
      %196 = arith.index_cast %61 : i32 to index
      %197 = memref.load %arg2[%c5, %196] : memref<16x8xf32, #tpu.memory_space<smem>>
      %198 = vector.broadcast %197 : f32 to vector<16x128xf32>
      %199 = arith.addf %195, %198 : vector<16x128xf32>
      %cst_62 = arith.constant 0.000000e+00 : f32
      %200 = vector.broadcast %cst_62 : f32 to vector<16x128xf32>
      %201 = arith.cmpf oge, %186, %200 : vector<16x128xf32>
      %cst_63 = arith.constant 0.000000e+00 : f32
      %202 = vector.broadcast %cst_63 : f32 to vector<16x128xf32>
      %203 = arith.cmpf oge, %199, %202 : vector<16x128xf32>
      %204 = arith.andi %201, %203 : vector<16x128xi1>
      %205 = arith.addf %186, %199 : vector<16x128xf32>
      %cst_64 = arith.constant 1.000000e+00 : f32
      %206 = vector.broadcast %cst_64 : f32 to vector<16x128xf32>
      %207 = arith.cmpf ole, %205, %206 : vector<16x128xf32>
      %208 = arith.andi %204, %207 : vector<16x128xi1>
      %c8 = arith.constant 8 : index
      %209 = arith.index_cast %61 : i32 to index
      %210 = memref.load %arg2[%c8, %209] : memref<16x8xf32, #tpu.memory_space<smem>>
      %c6 = arith.constant 6 : index
      %211 = arith.index_cast %61 : i32 to index
      %212 = memref.load %arg2[%c6, %211] : memref<16x8xf32, #tpu.memory_space<smem>>
      %213 = vector.broadcast %212 : f32 to vector<16x128xf32>
      %214 = arith.mulf %186, %213 : vector<16x128xf32>
      %215 = vector.broadcast %210 : f32 to vector<16x128xf32>
      %216 = arith.addf %215, %214 : vector<16x128xf32>
      %c7 = arith.constant 7 : index
      %217 = arith.index_cast %61 : i32 to index
      %218 = memref.load %arg2[%c7, %217] : memref<16x8xf32, #tpu.memory_space<smem>>
      %219 = vector.broadcast %218 : f32 to vector<16x128xf32>
      %220 = arith.mulf %199, %219 : vector<16x128xf32>
      %221 = arith.addf %216, %220 : vector<16x128xf32>
      %c11 = arith.constant 11 : index
      %222 = arith.index_cast %61 : i32 to index
      %223 = memref.load %arg2[%c11, %222] : memref<16x8xf32, #tpu.memory_space<smem>>
      %c9 = arith.constant 9 : index
      %224 = arith.index_cast %61 : i32 to index
      %225 = memref.load %arg2[%c9, %224] : memref<16x8xf32, #tpu.memory_space<smem>>
      %226 = vector.broadcast %225 : f32 to vector<16x128xf32>
      %227 = arith.mulf %186, %226 : vector<16x128xf32>
      %228 = vector.broadcast %223 : f32 to vector<16x128xf32>
      %229 = arith.addf %228, %227 : vector<16x128xf32>
      %c10 = arith.constant 10 : index
      %230 = arith.index_cast %61 : i32 to index
      %231 = memref.load %arg2[%c10, %230] : memref<16x8xf32, #tpu.memory_space<smem>>
      %232 = vector.broadcast %231 : f32 to vector<16x128xf32>
      %233 = arith.mulf %199, %232 : vector<16x128xf32>
      %234 = arith.addf %229, %233 : vector<16x128xf32>
      %cst_65 = arith.constant 9.99999996E-13 : f32
      %235 = vector.broadcast %cst_65 : f32 to vector<16x128xf32>
      %236 = arith.cmpf ogt, %234, %235 : vector<16x128xf32>
      %cst_66 = arith.constant 1.000000e+00 : f32
      %237 = vector.broadcast %cst_66 : f32 to vector<16x128xf32>
      %238 = arith.select %236, %234, %237 : vector<16x128xi1>, vector<16x128xf32>
      %239 = tpu.reciprocal %238 {approx = true} : vector<16x128xf32> -> vector<16x128xf32>
      %c0_67 = arith.constant 0 : index
      %c0_68 = arith.constant 0 : index
      %240 = vector.load %arg5[%c0_67, %c0_68] : memref<16x128xf32, #tpu.memory_space<vmem>>, vector<16x128xf32>
      %241 = arith.andi %208, %236 : vector<16x128xi1>
      %cst_69 = arith.constant -1.000000e+00 : f32
      %242 = vector.broadcast %cst_69 : f32 to vector<16x128xf32>
      %243 = arith.cmpf oge, %221, %242 : vector<16x128xf32>
      %244 = arith.andi %241, %243 : vector<16x128xi1>
      %245 = arith.cmpf olt, %221, %240 : vector<16x128xf32>
      %246 = arith.andi %244, %245 : vector<16x128xi1>
      %247 = arith.select %246, %221, %240 : vector<16x128xi1>, vector<16x128xf32>
      %c0_70 = arith.constant 0 : index
      %c0_71 = arith.constant 0 : index
      %248 = vector.load %arg5[%c0_70, %c0_71] : memref<16x128xf32, #tpu.memory_space<vmem>>, vector<16x128xf32>
      tpu.vector_store %arg5[%c0_70, %c0_71], %247 {strides = array<i32>} : memref<16x128xf32, #tpu.memory_space<vmem>>, vector<16x128xf32>,
      %c0_72 = arith.constant 0 : index
      %249 = arith.index_cast %61 : i32 to index
      %250 = memref.load %arg3[%c0_72, %249] : memref<9x8xf32, #tpu.memory_space<smem>>
      %c3_73 = arith.constant 3 : index
      %251 = arith.index_cast %61 : i32 to index
      %252 = memref.load %arg3[%c3_73, %251] : memref<9x8xf32, #tpu.memory_space<smem>>
      %c6_74 = arith.constant 6 : index
      %253 = arith.index_cast %61 : i32 to index
      %254 = memref.load %arg3[%c6_74, %253] : memref<9x8xf32, #tpu.memory_space<smem>>
      %255 = vector.broadcast %250 : f32 to vector<16x128xf32>
      %256 = arith.mulf %186, %255 : vector<16x128xf32>
      %257 = vector.broadcast %254 : f32 to vector<16x128xf32>
      %258 = arith.addf %257, %256 : vector<16x128xf32>
      %259 = vector.broadcast %252 : f32 to vector<16x128xf32>
      %260 = arith.mulf %199, %259 : vector<16x128xf32>
      %261 = arith.addf %258, %260 : vector<16x128xf32>
      %262 = arith.mulf %239, %261 : vector<16x128xf32>
      %c0_75 = arith.constant 0 : index
      %c0_76 = arith.constant 0 : index
      %c0_77 = arith.constant 0 : index
      %263 = vector.load %arg4[%c0_75, %c0_76, %c0_77] : memref<3x16x128xf32, #tpu.memory_space<vmem>>, vector<1x16x128xf32>
      %264 = vector.shape_cast %263 : vector<1x16x128xf32> to vector<16x128xf32>
      %265 = arith.select %246, %262, %264 : vector<16x128xi1>, vector<16x128xf32>
      %c0_78 = arith.constant 0 : index
      %c0_79 = arith.constant 0 : index
      %c0_80 = arith.constant 0 : index
      %266 = vector.load %arg4[%c0_78, %c0_79, %c0_80] : memref<3x16x128xf32, #tpu.memory_space<vmem>>, vector<1x16x128xf32>
      %267 = vector.shape_cast %266 : vector<1x16x128xf32> to vector<16x128xf32>
      %268 = vector.shape_cast %265 : vector<16x128xf32> to vector<1x16x128xf32>
      tpu.vector_store %arg4[%c0_78, %c0_79, %c0_80], %268 {strides = array<i32>} : memref<3x16x128xf32, #tpu.memory_space<vmem>>, vector<1x16x128xf32>,
      %c1_81 = arith.constant 1 : index
      %269 = arith.index_cast %61 : i32 to index
      %270 = memref.load %arg3[%c1_81, %269] : memref<9x8xf32, #tpu.memory_space<smem>>
      %c4_82 = arith.constant 4 : index
      %271 = arith.index_cast %61 : i32 to index
      %272 = memref.load %arg3[%c4_82, %271] : memref<9x8xf32, #tpu.memory_space<smem>>
      %c7_83 = arith.constant 7 : index
      %273 = arith.index_cast %61 : i32 to index
      %274 = memref.load %arg3[%c7_83, %273] : memref<9x8xf32, #tpu.memory_space<smem>>
      %275 = vector.broadcast %270 : f32 to vector<16x128xf32>
      %276 = arith.mulf %186, %275 : vector<16x128xf32>
      %277 = vector.broadcast %274 : f32 to vector<16x128xf32>
      %278 = arith.addf %277, %276 : vector<16x128xf32>
      %279 = vector.broadcast %272 : f32 to vector<16x128xf32>
      %280 = arith.mulf %199, %279 : vector<16x128xf32>
      %281 = arith.addf %278, %280 : vector<16x128xf32>
      %282 = arith.mulf %239, %281 : vector<16x128xf32>
      %c1_84 = arith.constant 1 : index
      %c0_85 = arith.constant 0 : index
      %c0_86 = arith.constant 0 : index
      %283 = vector.load %arg4[%c1_84, %c0_85, %c0_86] : memref<3x16x128xf32, #tpu.memory_space<vmem>>, vector<1x16x128xf32>
      %284 = vector.shape_cast %283 : vector<1x16x128xf32> to vector<16x128xf32>
      %285 = arith.select %246, %282, %284 : vector<16x128xi1>, vector<16x128xf32>
      %c1_87 = arith.constant 1 : index
      %c0_88 = arith.constant 0 : index
      %c0_89 = arith.constant 0 : index
      %286 = vector.load %arg4[%c1_87, %c0_88, %c0_89] : memref<3x16x128xf32, #tpu.memory_space<vmem>>, vector<1x16x128xf32>
      %287 = vector.shape_cast %286 : vector<1x16x128xf32> to vector<16x128xf32>
      %288 = vector.shape_cast %285 : vector<16x128xf32> to vector<1x16x128xf32>
      tpu.vector_store %arg4[%c1_87, %c0_88, %c0_89], %288 {strides = array<i32>} : memref<3x16x128xf32, #tpu.memory_space<vmem>>, vector<1x16x128xf32>,
      %c2_90 = arith.constant 2 : index
      %289 = arith.index_cast %61 : i32 to index
      %290 = memref.load %arg3[%c2_90, %289] : memref<9x8xf32, #tpu.memory_space<smem>>
      %c5_91 = arith.constant 5 : index
      %291 = arith.index_cast %61 : i32 to index
      %292 = memref.load %arg3[%c5_91, %291] : memref<9x8xf32, #tpu.memory_space<smem>>
      %c8_92 = arith.constant 8 : index
      %293 = arith.index_cast %61 : i32 to index
      %294 = memref.load %arg3[%c8_92, %293] : memref<9x8xf32, #tpu.memory_space<smem>>
      %295 = vector.broadcast %290 : f32 to vector<16x128xf32>
      %296 = arith.mulf %186, %295 : vector<16x128xf32>
      %297 = vector.broadcast %294 : f32 to vector<16x128xf32>
      %298 = arith.addf %297, %296 : vector<16x128xf32>
      %299 = vector.broadcast %292 : f32 to vector<16x128xf32>
      %300 = arith.mulf %199, %299 : vector<16x128xf32>
      %301 = arith.addf %298, %300 : vector<16x128xf32>
      %302 = arith.mulf %239, %301 : vector<16x128xf32>
      %c2_93 = arith.constant 2 : index
      %c0_94 = arith.constant 0 : index
      %c0_95 = arith.constant 0 : index
      %303 = vector.load %arg4[%c2_93, %c0_94, %c0_95] : memref<3x16x128xf32, #tpu.memory_space<vmem>>, vector<1x16x128xf32>
      %304 = vector.shape_cast %303 : vector<1x16x128xf32> to vector<16x128xf32>
      %305 = arith.select %246, %302, %304 : vector<16x128xi1>, vector<16x128xf32>
      %c2_96 = arith.constant 2 : index
      %c0_97 = arith.constant 0 : index
      %c0_98 = arith.constant 0 : index
      %306 = vector.load %arg4[%c2_96, %c0_97, %c0_98] : memref<3x16x128xf32, #tpu.memory_space<vmem>>, vector<1x16x128xf32>
      %307 = vector.shape_cast %306 : vector<1x16x128xf32> to vector<16x128xf32>
      %308 = vector.shape_cast %305 : vector<16x128xf32> to vector<1x16x128xf32>
      tpu.vector_store %arg4[%c2_96, %c0_97, %c0_98], %308 {strides = array<i32>} : memref<3x16x128xf32, #tpu.memory_space<vmem>>, vector<1x16x128xf32>,
    } else {
    }
    %c3_i32 = arith.constant 3 : i32
    %c1_i32_26 = arith.constant 1 : i32
    %79 = arith.muli %c3_i32, %c1_i32_26 : i32
    %c0_i32_27 = arith.constant 0 : i32
    %80 = arith.addi %c0_i32_27, %79 : i32
    %c12_28 = arith.constant 12 : index
    %81 = arith.index_cast %80 : i32 to index
    %82 = memref.load %arg2[%c12_28, %81] : memref<16x8xf32, #tpu.memory_space<smem>>
    %83 = arith.cmpf olt, %82, %20 : f32
    %c13_29 = arith.constant 13 : index
    %84 = arith.index_cast %80 : i32 to index
    %85 = memref.load %arg2[%c13_29, %84] : memref<16x8xf32, #tpu.memory_space<smem>>
    %86 = arith.cmpf ogt, %85, %3 : f32
    %87 = arith.andi %83, %86 : i1
    %c14_30 = arith.constant 14 : index
    %88 = arith.index_cast %80 : i32 to index
    %89 = memref.load %arg2[%c14_30, %88] : memref<16x8xf32, #tpu.memory_space<smem>>
    %90 = arith.cmpf olt, %89, %21 : f32
    %91 = arith.andi %87, %90 : i1
    %c15_31 = arith.constant 15 : index
    %92 = arith.index_cast %80 : i32 to index
    %93 = memref.load %arg2[%c15_31, %92] : memref<16x8xf32, #tpu.memory_space<smem>>
    %94 = arith.cmpf ogt, %93, %1 : f32
    %95 = arith.andi %91, %94 : i1
    %96 = arith.extui %95 : i1 to i32
    %c0_i32_32 = arith.constant 0 : i32
    %97 = arith.cmpi ne, %96, %c0_i32_32 : i32
    scf.if %97 {
      %c0_61 = arith.constant 0 : index
      %174 = arith.index_cast %80 : i32 to index
      %175 = memref.load %arg2[%c0_61, %174] : memref<16x8xf32, #tpu.memory_space<smem>>
      %176 = vector.broadcast %175 : f32 to vector<16x128xf32>
      %177 = arith.mulf %176, %9 : vector<16x128xf32>
      %c1 = arith.constant 1 : index
      %178 = arith.index_cast %80 : i32 to index
      %179 = memref.load %arg2[%c1, %178] : memref<16x8xf32, #tpu.memory_space<smem>>
      %180 = vector.broadcast %179 : f32 to vector<16x128xf32>
      %181 = arith.mulf %180, %15 : vector<16x128xf32>
      %182 = arith.addf %177, %181 : vector<16x128xf32>
      %c2 = arith.constant 2 : index
      %183 = arith.index_cast %80 : i32 to index
      %184 = memref.load %arg2[%c2, %183] : memref<16x8xf32, #tpu.memory_space<smem>>
      %185 = vector.broadcast %184 : f32 to vector<16x128xf32>
      %186 = arith.addf %182, %185 : vector<16x128xf32>
      %c3 = arith.constant 3 : index
      %187 = arith.index_cast %80 : i32 to index
      %188 = memref.load %arg2[%c3, %187] : memref<16x8xf32, #tpu.memory_space<smem>>
      %189 = vector.broadcast %188 : f32 to vector<16x128xf32>
      %190 = arith.mulf %189, %9 : vector<16x128xf32>
      %c4 = arith.constant 4 : index
      %191 = arith.index_cast %80 : i32 to index
      %192 = memref.load %arg2[%c4, %191] : memref<16x8xf32, #tpu.memory_space<smem>>
      %193 = vector.broadcast %192 : f32 to vector<16x128xf32>
      %194 = arith.mulf %193, %15 : vector<16x128xf32>
      %195 = arith.addf %190, %194 : vector<16x128xf32>
      %c5 = arith.constant 5 : index
      %196 = arith.index_cast %80 : i32 to index
      %197 = memref.load %arg2[%c5, %196] : memref<16x8xf32, #tpu.memory_space<smem>>
      %198 = vector.broadcast %197 : f32 to vector<16x128xf32>
      %199 = arith.addf %195, %198 : vector<16x128xf32>
      %cst_62 = arith.constant 0.000000e+00 : f32
      %200 = vector.broadcast %cst_62 : f32 to vector<16x128xf32>
      %201 = arith.cmpf oge, %186, %200 : vector<16x128xf32>
      %cst_63 = arith.constant 0.000000e+00 : f32
      %202 = vector.broadcast %cst_63 : f32 to vector<16x128xf32>
      %203 = arith.cmpf oge, %199, %202 : vector<16x128xf32>
      %204 = arith.andi %201, %203 : vector<16x128xi1>
      %205 = arith.addf %186, %199 : vector<16x128xf32>
      %cst_64 = arith.constant 1.000000e+00 : f32
      %206 = vector.broadcast %cst_64 : f32 to vector<16x128xf32>
      %207 = arith.cmpf ole, %205, %206 : vector<16x128xf32>
      %208 = arith.andi %204, %207 : vector<16x128xi1>
      %c8 = arith.constant 8 : index
      %209 = arith.index_cast %80 : i32 to index
      %210 = memref.load %arg2[%c8, %209] : memref<16x8xf32, #tpu.memory_space<smem>>
      %c6 = arith.constant 6 : index
      %211 = arith.index_cast %80 : i32 to index
      %212 = memref.load %arg2[%c6, %211] : memref<16x8xf32, #tpu.memory_space<smem>>
      %213 = vector.broadcast %212 : f32 to vector<16x128xf32>
      %214 = arith.mulf %186, %213 : vector<16x128xf32>
      %215 = vector.broadcast %210 : f32 to vector<16x128xf32>
      %216 = arith.addf %215, %214 : vector<16x128xf32>
      %c7 = arith.constant 7 : index
      %217 = arith.index_cast %80 : i32 to index
      %218 = memref.load %arg2[%c7, %217] : memref<16x8xf32, #tpu.memory_space<smem>>
      %219 = vector.broadcast %218 : f32 to vector<16x128xf32>
      %220 = arith.mulf %199, %219 : vector<16x128xf32>
      %221 = arith.addf %216, %220 : vector<16x128xf32>
      %c11 = arith.constant 11 : index
      %222 = arith.index_cast %80 : i32 to index
      %223 = memref.load %arg2[%c11, %222] : memref<16x8xf32, #tpu.memory_space<smem>>
      %c9 = arith.constant 9 : index
      %224 = arith.index_cast %80 : i32 to index
      %225 = memref.load %arg2[%c9, %224] : memref<16x8xf32, #tpu.memory_space<smem>>
      %226 = vector.broadcast %225 : f32 to vector<16x128xf32>
      %227 = arith.mulf %186, %226 : vector<16x128xf32>
      %228 = vector.broadcast %223 : f32 to vector<16x128xf32>
      %229 = arith.addf %228, %227 : vector<16x128xf32>
      %c10 = arith.constant 10 : index
      %230 = arith.index_cast %80 : i32 to index
      %231 = memref.load %arg2[%c10, %230] : memref<16x8xf32, #tpu.memory_space<smem>>
      %232 = vector.broadcast %231 : f32 to vector<16x128xf32>
      %233 = arith.mulf %199, %232 : vector<16x128xf32>
      %234 = arith.addf %229, %233 : vector<16x128xf32>
      %cst_65 = arith.constant 9.99999996E-13 : f32
      %235 = vector.broadcast %cst_65 : f32 to vector<16x128xf32>
      %236 = arith.cmpf ogt, %234, %235 : vector<16x128xf32>
      %cst_66 = arith.constant 1.000000e+00 : f32
      %237 = vector.broadcast %cst_66 : f32 to vector<16x128xf32>
      %238 = arith.select %236, %234, %237 : vector<16x128xi1>, vector<16x128xf32>
      %239 = tpu.reciprocal %238 {approx = true} : vector<16x128xf32> -> vector<16x128xf32>
      %c0_67 = arith.constant 0 : index
      %c0_68 = arith.constant 0 : index
      %240 = vector.load %arg5[%c0_67, %c0_68] : memref<16x128xf32, #tpu.memory_space<vmem>>, vector<16x128xf32>
      %241 = arith.andi %208, %236 : vector<16x128xi1>
      %cst_69 = arith.constant -1.000000e+00 : f32
      %242 = vector.broadcast %cst_69 : f32 to vector<16x128xf32>
      %243 = arith.cmpf oge, %221, %242 : vector<16x128xf32>
      %244 = arith.andi %241, %243 : vector<16x128xi1>
      %245 = arith.cmpf olt, %221, %240 : vector<16x128xf32>
      %246 = arith.andi %244, %245 : vector<16x128xi1>
      %247 = arith.select %246, %221, %240 : vector<16x128xi1>, vector<16x128xf32>
      %c0_70 = arith.constant 0 : index
      %c0_71 = arith.constant 0 : index
      %248 = vector.load %arg5[%c0_70, %c0_71] : memref<16x128xf32, #tpu.memory_space<vmem>>, vector<16x128xf32>
      tpu.vector_store %arg5[%c0_70, %c0_71], %247 {strides = array<i32>} : memref<16x128xf32, #tpu.memory_space<vmem>>, vector<16x128xf32>,
      %c0_72 = arith.constant 0 : index
      %249 = arith.index_cast %80 : i32 to index
      %250 = memref.load %arg3[%c0_72, %249] : memref<9x8xf32, #tpu.memory_space<smem>>
      %c3_73 = arith.constant 3 : index
      %251 = arith.index_cast %80 : i32 to index
      %252 = memref.load %arg3[%c3_73, %251] : memref<9x8xf32, #tpu.memory_space<smem>>
      %c6_74 = arith.constant 6 : index
      %253 = arith.index_cast %80 : i32 to index
      %254 = memref.load %arg3[%c6_74, %253] : memref<9x8xf32, #tpu.memory_space<smem>>
      %255 = vector.broadcast %250 : f32 to vector<16x128xf32>
      %256 = arith.mulf %186, %255 : vector<16x128xf32>
      %257 = vector.broadcast %254 : f32 to vector<16x128xf32>
      %258 = arith.addf %257, %256 : vector<16x128xf32>
      %259 = vector.broadcast %252 : f32 to vector<16x128xf32>
      %260 = arith.mulf %199, %259 : vector<16x128xf32>
      %261 = arith.addf %258, %260 : vector<16x128xf32>
      %262 = arith.mulf %239, %261 : vector<16x128xf32>
      %c0_75 = arith.constant 0 : index
      %c0_76 = arith.constant 0 : index
      %c0_77 = arith.constant 0 : index
      %263 = vector.load %arg4[%c0_75, %c0_76, %c0_77] : memref<3x16x128xf32, #tpu.memory_space<vmem>>, vector<1x16x128xf32>
      %264 = vector.shape_cast %263 : vector<1x16x128xf32> to vector<16x128xf32>
      %265 = arith.select %246, %262, %264 : vector<16x128xi1>, vector<16x128xf32>
      %c0_78 = arith.constant 0 : index
      %c0_79 = arith.constant 0 : index
      %c0_80 = arith.constant 0 : index
      %266 = vector.load %arg4[%c0_78, %c0_79, %c0_80] : memref<3x16x128xf32, #tpu.memory_space<vmem>>, vector<1x16x128xf32>
      %267 = vector.shape_cast %266 : vector<1x16x128xf32> to vector<16x128xf32>
      %268 = vector.shape_cast %265 : vector<16x128xf32> to vector<1x16x128xf32>
      tpu.vector_store %arg4[%c0_78, %c0_79, %c0_80], %268 {strides = array<i32>} : memref<3x16x128xf32, #tpu.memory_space<vmem>>, vector<1x16x128xf32>,
      %c1_81 = arith.constant 1 : index
      %269 = arith.index_cast %80 : i32 to index
      %270 = memref.load %arg3[%c1_81, %269] : memref<9x8xf32, #tpu.memory_space<smem>>
      %c4_82 = arith.constant 4 : index
      %271 = arith.index_cast %80 : i32 to index
      %272 = memref.load %arg3[%c4_82, %271] : memref<9x8xf32, #tpu.memory_space<smem>>
      %c7_83 = arith.constant 7 : index
      %273 = arith.index_cast %80 : i32 to index
      %274 = memref.load %arg3[%c7_83, %273] : memref<9x8xf32, #tpu.memory_space<smem>>
      %275 = vector.broadcast %270 : f32 to vector<16x128xf32>
      %276 = arith.mulf %186, %275 : vector<16x128xf32>
      %277 = vector.broadcast %274 : f32 to vector<16x128xf32>
      %278 = arith.addf %277, %276 : vector<16x128xf32>
      %279 = vector.broadcast %272 : f32 to vector<16x128xf32>
      %280 = arith.mulf %199, %279 : vector<16x128xf32>
      %281 = arith.addf %278, %280 : vector<16x128xf32>
      %282 = arith.mulf %239, %281 : vector<16x128xf32>
      %c1_84 = arith.constant 1 : index
      %c0_85 = arith.constant 0 : index
      %c0_86 = arith.constant 0 : index
      %283 = vector.load %arg4[%c1_84, %c0_85, %c0_86] : memref<3x16x128xf32, #tpu.memory_space<vmem>>, vector<1x16x128xf32>
      %284 = vector.shape_cast %283 : vector<1x16x128xf32> to vector<16x128xf32>
      %285 = arith.select %246, %282, %284 : vector<16x128xi1>, vector<16x128xf32>
      %c1_87 = arith.constant 1 : index
      %c0_88 = arith.constant 0 : index
      %c0_89 = arith.constant 0 : index
      %286 = vector.load %arg4[%c1_87, %c0_88, %c0_89] : memref<3x16x128xf32, #tpu.memory_space<vmem>>, vector<1x16x128xf32>
      %287 = vector.shape_cast %286 : vector<1x16x128xf32> to vector<16x128xf32>
      %288 = vector.shape_cast %285 : vector<16x128xf32> to vector<1x16x128xf32>
      tpu.vector_store %arg4[%c1_87, %c0_88, %c0_89], %288 {strides = array<i32>} : memref<3x16x128xf32, #tpu.memory_space<vmem>>, vector<1x16x128xf32>,
      %c2_90 = arith.constant 2 : index
      %289 = arith.index_cast %80 : i32 to index
      %290 = memref.load %arg3[%c2_90, %289] : memref<9x8xf32, #tpu.memory_space<smem>>
      %c5_91 = arith.constant 5 : index
      %291 = arith.index_cast %80 : i32 to index
      %292 = memref.load %arg3[%c5_91, %291] : memref<9x8xf32, #tpu.memory_space<smem>>
      %c8_92 = arith.constant 8 : index
      %293 = arith.index_cast %80 : i32 to index
      %294 = memref.load %arg3[%c8_92, %293] : memref<9x8xf32, #tpu.memory_space<smem>>
      %295 = vector.broadcast %290 : f32 to vector<16x128xf32>
      %296 = arith.mulf %186, %295 : vector<16x128xf32>
      %297 = vector.broadcast %294 : f32 to vector<16x128xf32>
      %298 = arith.addf %297, %296 : vector<16x128xf32>
      %299 = vector.broadcast %292 : f32 to vector<16x128xf32>
      %300 = arith.mulf %199, %299 : vector<16x128xf32>
      %301 = arith.addf %298, %300 : vector<16x128xf32>
      %302 = arith.mulf %239, %301 : vector<16x128xf32>
      %c2_93 = arith.constant 2 : index
      %c0_94 = arith.constant 0 : index
      %c0_95 = arith.constant 0 : index
      %303 = vector.load %arg4[%c2_93, %c0_94, %c0_95] : memref<3x16x128xf32, #tpu.memory_space<vmem>>, vector<1x16x128xf32>
      %304 = vector.shape_cast %303 : vector<1x16x128xf32> to vector<16x128xf32>
      %305 = arith.select %246, %302, %304 : vector<16x128xi1>, vector<16x128xf32>
      %c2_96 = arith.constant 2 : index
      %c0_97 = arith.constant 0 : index
      %c0_98 = arith.constant 0 : index
      %306 = vector.load %arg4[%c2_96, %c0_97, %c0_98] : memref<3x16x128xf32, #tpu.memory_space<vmem>>, vector<1x16x128xf32>
      %307 = vector.shape_cast %306 : vector<1x16x128xf32> to vector<16x128xf32>
      %308 = vector.shape_cast %305 : vector<16x128xf32> to vector<1x16x128xf32>
      tpu.vector_store %arg4[%c2_96, %c0_97, %c0_98], %308 {strides = array<i32>} : memref<3x16x128xf32, #tpu.memory_space<vmem>>, vector<1x16x128xf32>,
    } else {
    }
    %c4_i32 = arith.constant 4 : i32
    %c1_i32_33 = arith.constant 1 : i32
    %98 = arith.muli %c4_i32, %c1_i32_33 : i32
    %c0_i32_34 = arith.constant 0 : i32
    %99 = arith.addi %c0_i32_34, %98 : i32
    %c12_35 = arith.constant 12 : index
    %100 = arith.index_cast %99 : i32 to index
    %101 = memref.load %arg2[%c12_35, %100] : memref<16x8xf32, #tpu.memory_space<smem>>
    %102 = arith.cmpf olt, %101, %20 : f32
    %c13_36 = arith.constant 13 : index
    %103 = arith.index_cast %99 : i32 to index
    %104 = memref.load %arg2[%c13_36, %103] : memref<16x8xf32, #tpu.memory_space<smem>>
    %105 = arith.cmpf ogt, %104, %3 : f32
    %106 = arith.andi %102, %105 : i1
    %c14_37 = arith.constant 14 : index
    %107 = arith.index_cast %99 : i32 to index
    %108 = memref.load %arg2[%c14_37, %107] : memref<16x8xf32, #tpu.memory_space<smem>>
    %109 = arith.cmpf olt, %108, %21 : f32
    %110 = arith.andi %106, %109 : i1
    %c15_38 = arith.constant 15 : index
    %111 = arith.index_cast %99 : i32 to index
    %112 = memref.load %arg2[%c15_38, %111] : memref<16x8xf32, #tpu.memory_space<smem>>
    %113 = arith.cmpf ogt, %112, %1 : f32
    %114 = arith.andi %110, %113 : i1
    %115 = arith.extui %114 : i1 to i32
    %c0_i32_39 = arith.constant 0 : i32
    %116 = arith.cmpi ne, %115, %c0_i32_39 : i32
    scf.if %116 {
      %c0_61 = arith.constant 0 : index
      %174 = arith.index_cast %99 : i32 to index
      %175 = memref.load %arg2[%c0_61, %174] : memref<16x8xf32, #tpu.memory_space<smem>>
      %176 = vector.broadcast %175 : f32 to vector<16x128xf32>
      %177 = arith.mulf %176, %9 : vector<16x128xf32>
      %c1 = arith.constant 1 : index
      %178 = arith.index_cast %99 : i32 to index
      %179 = memref.load %arg2[%c1, %178] : memref<16x8xf32, #tpu.memory_space<smem>>
      %180 = vector.broadcast %179 : f32 to vector<16x128xf32>
      %181 = arith.mulf %180, %15 : vector<16x128xf32>
      %182 = arith.addf %177, %181 : vector<16x128xf32>
      %c2 = arith.constant 2 : index
      %183 = arith.index_cast %99 : i32 to index
      %184 = memref.load %arg2[%c2, %183] : memref<16x8xf32, #tpu.memory_space<smem>>
      %185 = vector.broadcast %184 : f32 to vector<16x128xf32>
      %186 = arith.addf %182, %185 : vector<16x128xf32>
      %c3 = arith.constant 3 : index
      %187 = arith.index_cast %99 : i32 to index
      %188 = memref.load %arg2[%c3, %187] : memref<16x8xf32, #tpu.memory_space<smem>>
      %189 = vector.broadcast %188 : f32 to vector<16x128xf32>
      %190 = arith.mulf %189, %9 : vector<16x128xf32>
      %c4 = arith.constant 4 : index
      %191 = arith.index_cast %99 : i32 to index
      %192 = memref.load %arg2[%c4, %191] : memref<16x8xf32, #tpu.memory_space<smem>>
      %193 = vector.broadcast %192 : f32 to vector<16x128xf32>
      %194 = arith.mulf %193, %15 : vector<16x128xf32>
      %195 = arith.addf %190, %194 : vector<16x128xf32>
      %c5 = arith.constant 5 : index
      %196 = arith.index_cast %99 : i32 to index
      %197 = memref.load %arg2[%c5, %196] : memref<16x8xf32, #tpu.memory_space<smem>>
      %198 = vector.broadcast %197 : f32 to vector<16x128xf32>
      %199 = arith.addf %195, %198 : vector<16x128xf32>
      %cst_62 = arith.constant 0.000000e+00 : f32
      %200 = vector.broadcast %cst_62 : f32 to vector<16x128xf32>
      %201 = arith.cmpf oge, %186, %200 : vector<16x128xf32>
      %cst_63 = arith.constant 0.000000e+00 : f32
      %202 = vector.broadcast %cst_63 : f32 to vector<16x128xf32>
      %203 = arith.cmpf oge, %199, %202 : vector<16x128xf32>
      %204 = arith.andi %201, %203 : vector<16x128xi1>
      %205 = arith.addf %186, %199 : vector<16x128xf32>
      %cst_64 = arith.constant 1.000000e+00 : f32
      %206 = vector.broadcast %cst_64 : f32 to vector<16x128xf32>
      %207 = arith.cmpf ole, %205, %206 : vector<16x128xf32>
      %208 = arith.andi %204, %207 : vector<16x128xi1>
      %c8 = arith.constant 8 : index
      %209 = arith.index_cast %99 : i32 to index
      %210 = memref.load %arg2[%c8, %209] : memref<16x8xf32, #tpu.memory_space<smem>>
      %c6 = arith.constant 6 : index
      %211 = arith.index_cast %99 : i32 to index
      %212 = memref.load %arg2[%c6, %211] : memref<16x8xf32, #tpu.memory_space<smem>>
      %213 = vector.broadcast %212 : f32 to vector<16x128xf32>
      %214 = arith.mulf %186, %213 : vector<16x128xf32>
      %215 = vector.broadcast %210 : f32 to vector<16x128xf32>
      %216 = arith.addf %215, %214 : vector<16x128xf32>
      %c7 = arith.constant 7 : index
      %217 = arith.index_cast %99 : i32 to index
      %218 = memref.load %arg2[%c7, %217] : memref<16x8xf32, #tpu.memory_space<smem>>
      %219 = vector.broadcast %218 : f32 to vector<16x128xf32>
      %220 = arith.mulf %199, %219 : vector<16x128xf32>
      %221 = arith.addf %216, %220 : vector<16x128xf32>
      %c11 = arith.constant 11 : index
      %222 = arith.index_cast %99 : i32 to index
      %223 = memref.load %arg2[%c11, %222] : memref<16x8xf32, #tpu.memory_space<smem>>
      %c9 = arith.constant 9 : index
      %224 = arith.index_cast %99 : i32 to index
      %225 = memref.load %arg2[%c9, %224] : memref<16x8xf32, #tpu.memory_space<smem>>
      %226 = vector.broadcast %225 : f32 to vector<16x128xf32>
      %227 = arith.mulf %186, %226 : vector<16x128xf32>
      %228 = vector.broadcast %223 : f32 to vector<16x128xf32>
      %229 = arith.addf %228, %227 : vector<16x128xf32>
      %c10 = arith.constant 10 : index
      %230 = arith.index_cast %99 : i32 to index
      %231 = memref.load %arg2[%c10, %230] : memref<16x8xf32, #tpu.memory_space<smem>>
      %232 = vector.broadcast %231 : f32 to vector<16x128xf32>
      %233 = arith.mulf %199, %232 : vector<16x128xf32>
      %234 = arith.addf %229, %233 : vector<16x128xf32>
      %cst_65 = arith.constant 9.99999996E-13 : f32
      %235 = vector.broadcast %cst_65 : f32 to vector<16x128xf32>
      %236 = arith.cmpf ogt, %234, %235 : vector<16x128xf32>
      %cst_66 = arith.constant 1.000000e+00 : f32
      %237 = vector.broadcast %cst_66 : f32 to vector<16x128xf32>
      %238 = arith.select %236, %234, %237 : vector<16x128xi1>, vector<16x128xf32>
      %239 = tpu.reciprocal %238 {approx = true} : vector<16x128xf32> -> vector<16x128xf32>
      %c0_67 = arith.constant 0 : index
      %c0_68 = arith.constant 0 : index
      %240 = vector.load %arg5[%c0_67, %c0_68] : memref<16x128xf32, #tpu.memory_space<vmem>>, vector<16x128xf32>
      %241 = arith.andi %208, %236 : vector<16x128xi1>
      %cst_69 = arith.constant -1.000000e+00 : f32
      %242 = vector.broadcast %cst_69 : f32 to vector<16x128xf32>
      %243 = arith.cmpf oge, %221, %242 : vector<16x128xf32>
      %244 = arith.andi %241, %243 : vector<16x128xi1>
      %245 = arith.cmpf olt, %221, %240 : vector<16x128xf32>
      %246 = arith.andi %244, %245 : vector<16x128xi1>
      %247 = arith.select %246, %221, %240 : vector<16x128xi1>, vector<16x128xf32>
      %c0_70 = arith.constant 0 : index
      %c0_71 = arith.constant 0 : index
      %248 = vector.load %arg5[%c0_70, %c0_71] : memref<16x128xf32, #tpu.memory_space<vmem>>, vector<16x128xf32>
      tpu.vector_store %arg5[%c0_70, %c0_71], %247 {strides = array<i32>} : memref<16x128xf32, #tpu.memory_space<vmem>>, vector<16x128xf32>,
      %c0_72 = arith.constant 0 : index
      %249 = arith.index_cast %99 : i32 to index
      %250 = memref.load %arg3[%c0_72, %249] : memref<9x8xf32, #tpu.memory_space<smem>>
      %c3_73 = arith.constant 3 : index
      %251 = arith.index_cast %99 : i32 to index
      %252 = memref.load %arg3[%c3_73, %251] : memref<9x8xf32, #tpu.memory_space<smem>>
      %c6_74 = arith.constant 6 : index
      %253 = arith.index_cast %99 : i32 to index
      %254 = memref.load %arg3[%c6_74, %253] : memref<9x8xf32, #tpu.memory_space<smem>>
      %255 = vector.broadcast %250 : f32 to vector<16x128xf32>
      %256 = arith.mulf %186, %255 : vector<16x128xf32>
      %257 = vector.broadcast %254 : f32 to vector<16x128xf32>
      %258 = arith.addf %257, %256 : vector<16x128xf32>
      %259 = vector.broadcast %252 : f32 to vector<16x128xf32>
      %260 = arith.mulf %199, %259 : vector<16x128xf32>
      %261 = arith.addf %258, %260 : vector<16x128xf32>
      %262 = arith.mulf %239, %261 : vector<16x128xf32>
      %c0_75 = arith.constant 0 : index
      %c0_76 = arith.constant 0 : index
      %c0_77 = arith.constant 0 : index
      %263 = vector.load %arg4[%c0_75, %c0_76, %c0_77] : memref<3x16x128xf32, #tpu.memory_space<vmem>>, vector<1x16x128xf32>
      %264 = vector.shape_cast %263 : vector<1x16x128xf32> to vector<16x128xf32>
      %265 = arith.select %246, %262, %264 : vector<16x128xi1>, vector<16x128xf32>
      %c0_78 = arith.constant 0 : index
      %c0_79 = arith.constant 0 : index
      %c0_80 = arith.constant 0 : index
      %266 = vector.load %arg4[%c0_78, %c0_79, %c0_80] : memref<3x16x128xf32, #tpu.memory_space<vmem>>, vector<1x16x128xf32>
      %267 = vector.shape_cast %266 : vector<1x16x128xf32> to vector<16x128xf32>
      %268 = vector.shape_cast %265 : vector<16x128xf32> to vector<1x16x128xf32>
      tpu.vector_store %arg4[%c0_78, %c0_79, %c0_80], %268 {strides = array<i32>} : memref<3x16x128xf32, #tpu.memory_space<vmem>>, vector<1x16x128xf32>,
      %c1_81 = arith.constant 1 : index
      %269 = arith.index_cast %99 : i32 to index
      %270 = memref.load %arg3[%c1_81, %269] : memref<9x8xf32, #tpu.memory_space<smem>>
      %c4_82 = arith.constant 4 : index
      %271 = arith.index_cast %99 : i32 to index
      %272 = memref.load %arg3[%c4_82, %271] : memref<9x8xf32, #tpu.memory_space<smem>>
      %c7_83 = arith.constant 7 : index
      %273 = arith.index_cast %99 : i32 to index
      %274 = memref.load %arg3[%c7_83, %273] : memref<9x8xf32, #tpu.memory_space<smem>>
      %275 = vector.broadcast %270 : f32 to vector<16x128xf32>
      %276 = arith.mulf %186, %275 : vector<16x128xf32>
      %277 = vector.broadcast %274 : f32 to vector<16x128xf32>
      %278 = arith.addf %277, %276 : vector<16x128xf32>
      %279 = vector.broadcast %272 : f32 to vector<16x128xf32>
      %280 = arith.mulf %199, %279 : vector<16x128xf32>
      %281 = arith.addf %278, %280 : vector<16x128xf32>
      %282 = arith.mulf %239, %281 : vector<16x128xf32>
      %c1_84 = arith.constant 1 : index
      %c0_85 = arith.constant 0 : index
      %c0_86 = arith.constant 0 : index
      %283 = vector.load %arg4[%c1_84, %c0_85, %c0_86] : memref<3x16x128xf32, #tpu.memory_space<vmem>>, vector<1x16x128xf32>
      %284 = vector.shape_cast %283 : vector<1x16x128xf32> to vector<16x128xf32>
      %285 = arith.select %246, %282, %284 : vector<16x128xi1>, vector<16x128xf32>
      %c1_87 = arith.constant 1 : index
      %c0_88 = arith.constant 0 : index
      %c0_89 = arith.constant 0 : index
      %286 = vector.load %arg4[%c1_87, %c0_88, %c0_89] : memref<3x16x128xf32, #tpu.memory_space<vmem>>, vector<1x16x128xf32>
      %287 = vector.shape_cast %286 : vector<1x16x128xf32> to vector<16x128xf32>
      %288 = vector.shape_cast %285 : vector<16x128xf32> to vector<1x16x128xf32>
      tpu.vector_store %arg4[%c1_87, %c0_88, %c0_89], %288 {strides = array<i32>} : memref<3x16x128xf32, #tpu.memory_space<vmem>>, vector<1x16x128xf32>,
      %c2_90 = arith.constant 2 : index
      %289 = arith.index_cast %99 : i32 to index
      %290 = memref.load %arg3[%c2_90, %289] : memref<9x8xf32, #tpu.memory_space<smem>>
      %c5_91 = arith.constant 5 : index
      %291 = arith.index_cast %99 : i32 to index
      %292 = memref.load %arg3[%c5_91, %291] : memref<9x8xf32, #tpu.memory_space<smem>>
      %c8_92 = arith.constant 8 : index
      %293 = arith.index_cast %99 : i32 to index
      %294 = memref.load %arg3[%c8_92, %293] : memref<9x8xf32, #tpu.memory_space<smem>>
      %295 = vector.broadcast %290 : f32 to vector<16x128xf32>
      %296 = arith.mulf %186, %295 : vector<16x128xf32>
      %297 = vector.broadcast %294 : f32 to vector<16x128xf32>
      %298 = arith.addf %297, %296 : vector<16x128xf32>
      %299 = vector.broadcast %292 : f32 to vector<16x128xf32>
      %300 = arith.mulf %199, %299 : vector<16x128xf32>
      %301 = arith.addf %298, %300 : vector<16x128xf32>
      %302 = arith.mulf %239, %301 : vector<16x128xf32>
      %c2_93 = arith.constant 2 : index
      %c0_94 = arith.constant 0 : index
      %c0_95 = arith.constant 0 : index
      %303 = vector.load %arg4[%c2_93, %c0_94, %c0_95] : memref<3x16x128xf32, #tpu.memory_space<vmem>>, vector<1x16x128xf32>
      %304 = vector.shape_cast %303 : vector<1x16x128xf32> to vector<16x128xf32>
      %305 = arith.select %246, %302, %304 : vector<16x128xi1>, vector<16x128xf32>
      %c2_96 = arith.constant 2 : index
      %c0_97 = arith.constant 0 : index
      %c0_98 = arith.constant 0 : index
      %306 = vector.load %arg4[%c2_96, %c0_97, %c0_98] : memref<3x16x128xf32, #tpu.memory_space<vmem>>, vector<1x16x128xf32>
      %307 = vector.shape_cast %306 : vector<1x16x128xf32> to vector<16x128xf32>
      %308 = vector.shape_cast %305 : vector<16x128xf32> to vector<1x16x128xf32>
      tpu.vector_store %arg4[%c2_96, %c0_97, %c0_98], %308 {strides = array<i32>} : memref<3x16x128xf32, #tpu.memory_space<vmem>>, vector<1x16x128xf32>,
    } else {
    }
    %c5_i32 = arith.constant 5 : i32
    %c1_i32_40 = arith.constant 1 : i32
    %117 = arith.muli %c5_i32, %c1_i32_40 : i32
    %c0_i32_41 = arith.constant 0 : i32
    %118 = arith.addi %c0_i32_41, %117 : i32
    %c12_42 = arith.constant 12 : index
    %119 = arith.index_cast %118 : i32 to index
    %120 = memref.load %arg2[%c12_42, %119] : memref<16x8xf32, #tpu.memory_space<smem>>
    %121 = arith.cmpf olt, %120, %20 : f32
    %c13_43 = arith.constant 13 : index
    %122 = arith.index_cast %118 : i32 to index
    %123 = memref.load %arg2[%c13_43, %122] : memref<16x8xf32, #tpu.memory_space<smem>>
    %124 = arith.cmpf ogt, %123, %3 : f32
    %125 = arith.andi %121, %124 : i1
    %c14_44 = arith.constant 14 : index
    %126 = arith.index_cast %118 : i32 to index
    %127 = memref.load %arg2[%c14_44, %126] : memref<16x8xf32, #tpu.memory_space<smem>>
    %128 = arith.cmpf olt, %127, %21 : f32
    %129 = arith.andi %125, %128 : i1
    %c15_45 = arith.constant 15 : index
    %130 = arith.index_cast %118 : i32 to index
    %131 = memref.load %arg2[%c15_45, %130] : memref<16x8xf32, #tpu.memory_space<smem>>
    %132 = arith.cmpf ogt, %131, %1 : f32
    %133 = arith.andi %129, %132 : i1
    %134 = arith.extui %133 : i1 to i32
    %c0_i32_46 = arith.constant 0 : i32
    %135 = arith.cmpi ne, %134, %c0_i32_46 : i32
    scf.if %135 {
      %c0_61 = arith.constant 0 : index
      %174 = arith.index_cast %118 : i32 to index
      %175 = memref.load %arg2[%c0_61, %174] : memref<16x8xf32, #tpu.memory_space<smem>>
      %176 = vector.broadcast %175 : f32 to vector<16x128xf32>
      %177 = arith.mulf %176, %9 : vector<16x128xf32>
      %c1 = arith.constant 1 : index
      %178 = arith.index_cast %118 : i32 to index
      %179 = memref.load %arg2[%c1, %178] : memref<16x8xf32, #tpu.memory_space<smem>>
      %180 = vector.broadcast %179 : f32 to vector<16x128xf32>
      %181 = arith.mulf %180, %15 : vector<16x128xf32>
      %182 = arith.addf %177, %181 : vector<16x128xf32>
      %c2 = arith.constant 2 : index
      %183 = arith.index_cast %118 : i32 to index
      %184 = memref.load %arg2[%c2, %183] : memref<16x8xf32, #tpu.memory_space<smem>>
      %185 = vector.broadcast %184 : f32 to vector<16x128xf32>
      %186 = arith.addf %182, %185 : vector<16x128xf32>
      %c3 = arith.constant 3 : index
      %187 = arith.index_cast %118 : i32 to index
      %188 = memref.load %arg2[%c3, %187] : memref<16x8xf32, #tpu.memory_space<smem>>
      %189 = vector.broadcast %188 : f32 to vector<16x128xf32>
      %190 = arith.mulf %189, %9 : vector<16x128xf32>
      %c4 = arith.constant 4 : index
      %191 = arith.index_cast %118 : i32 to index
      %192 = memref.load %arg2[%c4, %191] : memref<16x8xf32, #tpu.memory_space<smem>>
      %193 = vector.broadcast %192 : f32 to vector<16x128xf32>
      %194 = arith.mulf %193, %15 : vector<16x128xf32>
      %195 = arith.addf %190, %194 : vector<16x128xf32>
      %c5 = arith.constant 5 : index
      %196 = arith.index_cast %118 : i32 to index
      %197 = memref.load %arg2[%c5, %196] : memref<16x8xf32, #tpu.memory_space<smem>>
      %198 = vector.broadcast %197 : f32 to vector<16x128xf32>
      %199 = arith.addf %195, %198 : vector<16x128xf32>
      %cst_62 = arith.constant 0.000000e+00 : f32
      %200 = vector.broadcast %cst_62 : f32 to vector<16x128xf32>
      %201 = arith.cmpf oge, %186, %200 : vector<16x128xf32>
      %cst_63 = arith.constant 0.000000e+00 : f32
      %202 = vector.broadcast %cst_63 : f32 to vector<16x128xf32>
      %203 = arith.cmpf oge, %199, %202 : vector<16x128xf32>
      %204 = arith.andi %201, %203 : vector<16x128xi1>
      %205 = arith.addf %186, %199 : vector<16x128xf32>
      %cst_64 = arith.constant 1.000000e+00 : f32
      %206 = vector.broadcast %cst_64 : f32 to vector<16x128xf32>
      %207 = arith.cmpf ole, %205, %206 : vector<16x128xf32>
      %208 = arith.andi %204, %207 : vector<16x128xi1>
      %c8 = arith.constant 8 : index
      %209 = arith.index_cast %118 : i32 to index
      %210 = memref.load %arg2[%c8, %209] : memref<16x8xf32, #tpu.memory_space<smem>>
      %c6 = arith.constant 6 : index
      %211 = arith.index_cast %118 : i32 to index
      %212 = memref.load %arg2[%c6, %211] : memref<16x8xf32, #tpu.memory_space<smem>>
      %213 = vector.broadcast %212 : f32 to vector<16x128xf32>
      %214 = arith.mulf %186, %213 : vector<16x128xf32>
      %215 = vector.broadcast %210 : f32 to vector<16x128xf32>
      %216 = arith.addf %215, %214 : vector<16x128xf32>
      %c7 = arith.constant 7 : index
      %217 = arith.index_cast %118 : i32 to index
      %218 = memref.load %arg2[%c7, %217] : memref<16x8xf32, #tpu.memory_space<smem>>
      %219 = vector.broadcast %218 : f32 to vector<16x128xf32>
      %220 = arith.mulf %199, %219 : vector<16x128xf32>
      %221 = arith.addf %216, %220 : vector<16x128xf32>
      %c11 = arith.constant 11 : index
      %222 = arith.index_cast %118 : i32 to index
      %223 = memref.load %arg2[%c11, %222] : memref<16x8xf32, #tpu.memory_space<smem>>
      %c9 = arith.constant 9 : index
      %224 = arith.index_cast %118 : i32 to index
      %225 = memref.load %arg2[%c9, %224] : memref<16x8xf32, #tpu.memory_space<smem>>
      %226 = vector.broadcast %225 : f32 to vector<16x128xf32>
      %227 = arith.mulf %186, %226 : vector<16x128xf32>
      %228 = vector.broadcast %223 : f32 to vector<16x128xf32>
      %229 = arith.addf %228, %227 : vector<16x128xf32>
      %c10 = arith.constant 10 : index
      %230 = arith.index_cast %118 : i32 to index
      %231 = memref.load %arg2[%c10, %230] : memref<16x8xf32, #tpu.memory_space<smem>>
      %232 = vector.broadcast %231 : f32 to vector<16x128xf32>
      %233 = arith.mulf %199, %232 : vector<16x128xf32>
      %234 = arith.addf %229, %233 : vector<16x128xf32>
      %cst_65 = arith.constant 9.99999996E-13 : f32
      %235 = vector.broadcast %cst_65 : f32 to vector<16x128xf32>
      %236 = arith.cmpf ogt, %234, %235 : vector<16x128xf32>
      %cst_66 = arith.constant 1.000000e+00 : f32
      %237 = vector.broadcast %cst_66 : f32 to vector<16x128xf32>
      %238 = arith.select %236, %234, %237 : vector<16x128xi1>, vector<16x128xf32>
      %239 = tpu.reciprocal %238 {approx = true} : vector<16x128xf32> -> vector<16x128xf32>
      %c0_67 = arith.constant 0 : index
      %c0_68 = arith.constant 0 : index
      %240 = vector.load %arg5[%c0_67, %c0_68] : memref<16x128xf32, #tpu.memory_space<vmem>>, vector<16x128xf32>
      %241 = arith.andi %208, %236 : vector<16x128xi1>
      %cst_69 = arith.constant -1.000000e+00 : f32
      %242 = vector.broadcast %cst_69 : f32 to vector<16x128xf32>
      %243 = arith.cmpf oge, %221, %242 : vector<16x128xf32>
      %244 = arith.andi %241, %243 : vector<16x128xi1>
      %245 = arith.cmpf olt, %221, %240 : vector<16x128xf32>
      %246 = arith.andi %244, %245 : vector<16x128xi1>
      %247 = arith.select %246, %221, %240 : vector<16x128xi1>, vector<16x128xf32>
      %c0_70 = arith.constant 0 : index
      %c0_71 = arith.constant 0 : index
      %248 = vector.load %arg5[%c0_70, %c0_71] : memref<16x128xf32, #tpu.memory_space<vmem>>, vector<16x128xf32>
      tpu.vector_store %arg5[%c0_70, %c0_71], %247 {strides = array<i32>} : memref<16x128xf32, #tpu.memory_space<vmem>>, vector<16x128xf32>,
      %c0_72 = arith.constant 0 : index
      %249 = arith.index_cast %118 : i32 to index
      %250 = memref.load %arg3[%c0_72, %249] : memref<9x8xf32, #tpu.memory_space<smem>>
      %c3_73 = arith.constant 3 : index
      %251 = arith.index_cast %118 : i32 to index
      %252 = memref.load %arg3[%c3_73, %251] : memref<9x8xf32, #tpu.memory_space<smem>>
      %c6_74 = arith.constant 6 : index
      %253 = arith.index_cast %118 : i32 to index
      %254 = memref.load %arg3[%c6_74, %253] : memref<9x8xf32, #tpu.memory_space<smem>>
      %255 = vector.broadcast %250 : f32 to vector<16x128xf32>
      %256 = arith.mulf %186, %255 : vector<16x128xf32>
      %257 = vector.broadcast %254 : f32 to vector<16x128xf32>
      %258 = arith.addf %257, %256 : vector<16x128xf32>
      %259 = vector.broadcast %252 : f32 to vector<16x128xf32>
      %260 = arith.mulf %199, %259 : vector<16x128xf32>
      %261 = arith.addf %258, %260 : vector<16x128xf32>
      %262 = arith.mulf %239, %261 : vector<16x128xf32>
      %c0_75 = arith.constant 0 : index
      %c0_76 = arith.constant 0 : index
      %c0_77 = arith.constant 0 : index
      %263 = vector.load %arg4[%c0_75, %c0_76, %c0_77] : memref<3x16x128xf32, #tpu.memory_space<vmem>>, vector<1x16x128xf32>
      %264 = vector.shape_cast %263 : vector<1x16x128xf32> to vector<16x128xf32>
      %265 = arith.select %246, %262, %264 : vector<16x128xi1>, vector<16x128xf32>
      %c0_78 = arith.constant 0 : index
      %c0_79 = arith.constant 0 : index
      %c0_80 = arith.constant 0 : index
      %266 = vector.load %arg4[%c0_78, %c0_79, %c0_80] : memref<3x16x128xf32, #tpu.memory_space<vmem>>, vector<1x16x128xf32>
      %267 = vector.shape_cast %266 : vector<1x16x128xf32> to vector<16x128xf32>
      %268 = vector.shape_cast %265 : vector<16x128xf32> to vector<1x16x128xf32>
      tpu.vector_store %arg4[%c0_78, %c0_79, %c0_80], %268 {strides = array<i32>} : memref<3x16x128xf32, #tpu.memory_space<vmem>>, vector<1x16x128xf32>,
      %c1_81 = arith.constant 1 : index
      %269 = arith.index_cast %118 : i32 to index
      %270 = memref.load %arg3[%c1_81, %269] : memref<9x8xf32, #tpu.memory_space<smem>>
      %c4_82 = arith.constant 4 : index
      %271 = arith.index_cast %118 : i32 to index
      %272 = memref.load %arg3[%c4_82, %271] : memref<9x8xf32, #tpu.memory_space<smem>>
      %c7_83 = arith.constant 7 : index
      %273 = arith.index_cast %118 : i32 to index
      %274 = memref.load %arg3[%c7_83, %273] : memref<9x8xf32, #tpu.memory_space<smem>>
      %275 = vector.broadcast %270 : f32 to vector<16x128xf32>
      %276 = arith.mulf %186, %275 : vector<16x128xf32>
      %277 = vector.broadcast %274 : f32 to vector<16x128xf32>
      %278 = arith.addf %277, %276 : vector<16x128xf32>
      %279 = vector.broadcast %272 : f32 to vector<16x128xf32>
      %280 = arith.mulf %199, %279 : vector<16x128xf32>
      %281 = arith.addf %278, %280 : vector<16x128xf32>
      %282 = arith.mulf %239, %281 : vector<16x128xf32>
      %c1_84 = arith.constant 1 : index
      %c0_85 = arith.constant 0 : index
      %c0_86 = arith.constant 0 : index
      %283 = vector.load %arg4[%c1_84, %c0_85, %c0_86] : memref<3x16x128xf32, #tpu.memory_space<vmem>>, vector<1x16x128xf32>
      %284 = vector.shape_cast %283 : vector<1x16x128xf32> to vector<16x128xf32>
      %285 = arith.select %246, %282, %284 : vector<16x128xi1>, vector<16x128xf32>
      %c1_87 = arith.constant 1 : index
      %c0_88 = arith.constant 0 : index
      %c0_89 = arith.constant 0 : index
      %286 = vector.load %arg4[%c1_87, %c0_88, %c0_89] : memref<3x16x128xf32, #tpu.memory_space<vmem>>, vector<1x16x128xf32>
      %287 = vector.shape_cast %286 : vector<1x16x128xf32> to vector<16x128xf32>
      %288 = vector.shape_cast %285 : vector<16x128xf32> to vector<1x16x128xf32>
      tpu.vector_store %arg4[%c1_87, %c0_88, %c0_89], %288 {strides = array<i32>} : memref<3x16x128xf32, #tpu.memory_space<vmem>>, vector<1x16x128xf32>,
      %c2_90 = arith.constant 2 : index
      %289 = arith.index_cast %118 : i32 to index
      %290 = memref.load %arg3[%c2_90, %289] : memref<9x8xf32, #tpu.memory_space<smem>>
      %c5_91 = arith.constant 5 : index
      %291 = arith.index_cast %118 : i32 to index
      %292 = memref.load %arg3[%c5_91, %291] : memref<9x8xf32, #tpu.memory_space<smem>>
      %c8_92 = arith.constant 8 : index
      %293 = arith.index_cast %118 : i32 to index
      %294 = memref.load %arg3[%c8_92, %293] : memref<9x8xf32, #tpu.memory_space<smem>>
      %295 = vector.broadcast %290 : f32 to vector<16x128xf32>
      %296 = arith.mulf %186, %295 : vector<16x128xf32>
      %297 = vector.broadcast %294 : f32 to vector<16x128xf32>
      %298 = arith.addf %297, %296 : vector<16x128xf32>
      %299 = vector.broadcast %292 : f32 to vector<16x128xf32>
      %300 = arith.mulf %199, %299 : vector<16x128xf32>
      %301 = arith.addf %298, %300 : vector<16x128xf32>
      %302 = arith.mulf %239, %301 : vector<16x128xf32>
      %c2_93 = arith.constant 2 : index
      %c0_94 = arith.constant 0 : index
      %c0_95 = arith.constant 0 : index
      %303 = vector.load %arg4[%c2_93, %c0_94, %c0_95] : memref<3x16x128xf32, #tpu.memory_space<vmem>>, vector<1x16x128xf32>
      %304 = vector.shape_cast %303 : vector<1x16x128xf32> to vector<16x128xf32>
      %305 = arith.select %246, %302, %304 : vector<16x128xi1>, vector<16x128xf32>
      %c2_96 = arith.constant 2 : index
      %c0_97 = arith.constant 0 : index
      %c0_98 = arith.constant 0 : index
      %306 = vector.load %arg4[%c2_96, %c0_97, %c0_98] : memref<3x16x128xf32, #tpu.memory_space<vmem>>, vector<1x16x128xf32>
      %307 = vector.shape_cast %306 : vector<1x16x128xf32> to vector<16x128xf32>
      %308 = vector.shape_cast %305 : vector<16x128xf32> to vector<1x16x128xf32>
      tpu.vector_store %arg4[%c2_96, %c0_97, %c0_98], %308 {strides = array<i32>} : memref<3x16x128xf32, #tpu.memory_space<vmem>>, vector<1x16x128xf32>,
    } else {
    }
    %c6_i32 = arith.constant 6 : i32
    %c1_i32_47 = arith.constant 1 : i32
    %136 = arith.muli %c6_i32, %c1_i32_47 : i32
    %c0_i32_48 = arith.constant 0 : i32
    %137 = arith.addi %c0_i32_48, %136 : i32
    %c12_49 = arith.constant 12 : index
    %138 = arith.index_cast %137 : i32 to index
    %139 = memref.load %arg2[%c12_49, %138] : memref<16x8xf32, #tpu.memory_space<smem>>
    %140 = arith.cmpf olt, %139, %20 : f32
    %c13_50 = arith.constant 13 : index
    %141 = arith.index_cast %137 : i32 to index
    %142 = memref.load %arg2[%c13_50, %141] : memref<16x8xf32, #tpu.memory_space<smem>>
    %143 = arith.cmpf ogt, %142, %3 : f32
    %144 = arith.andi %140, %143 : i1
    %c14_51 = arith.constant 14 : index
    %145 = arith.index_cast %137 : i32 to index
    %146 = memref.load %arg2[%c14_51, %145] : memref<16x8xf32, #tpu.memory_space<smem>>
    %147 = arith.cmpf olt, %146, %21 : f32
    %148 = arith.andi %144, %147 : i1
    %c15_52 = arith.constant 15 : index
    %149 = arith.index_cast %137 : i32 to index
    %150 = memref.load %arg2[%c15_52, %149] : memref<16x8xf32, #tpu.memory_space<smem>>
    %151 = arith.cmpf ogt, %150, %1 : f32
    %152 = arith.andi %148, %151 : i1
    %153 = arith.extui %152 : i1 to i32
    %c0_i32_53 = arith.constant 0 : i32
    %154 = arith.cmpi ne, %153, %c0_i32_53 : i32
    scf.if %154 {
      %c0_61 = arith.constant 0 : index
      %174 = arith.index_cast %137 : i32 to index
      %175 = memref.load %arg2[%c0_61, %174] : memref<16x8xf32, #tpu.memory_space<smem>>
      %176 = vector.broadcast %175 : f32 to vector<16x128xf32>
      %177 = arith.mulf %176, %9 : vector<16x128xf32>
      %c1 = arith.constant 1 : index
      %178 = arith.index_cast %137 : i32 to index
      %179 = memref.load %arg2[%c1, %178] : memref<16x8xf32, #tpu.memory_space<smem>>
      %180 = vector.broadcast %179 : f32 to vector<16x128xf32>
      %181 = arith.mulf %180, %15 : vector<16x128xf32>
      %182 = arith.addf %177, %181 : vector<16x128xf32>
      %c2 = arith.constant 2 : index
      %183 = arith.index_cast %137 : i32 to index
      %184 = memref.load %arg2[%c2, %183] : memref<16x8xf32, #tpu.memory_space<smem>>
      %185 = vector.broadcast %184 : f32 to vector<16x128xf32>
      %186 = arith.addf %182, %185 : vector<16x128xf32>
      %c3 = arith.constant 3 : index
      %187 = arith.index_cast %137 : i32 to index
      %188 = memref.load %arg2[%c3, %187] : memref<16x8xf32, #tpu.memory_space<smem>>
      %189 = vector.broadcast %188 : f32 to vector<16x128xf32>
      %190 = arith.mulf %189, %9 : vector<16x128xf32>
      %c4 = arith.constant 4 : index
      %191 = arith.index_cast %137 : i32 to index
      %192 = memref.load %arg2[%c4, %191] : memref<16x8xf32, #tpu.memory_space<smem>>
      %193 = vector.broadcast %192 : f32 to vector<16x128xf32>
      %194 = arith.mulf %193, %15 : vector<16x128xf32>
      %195 = arith.addf %190, %194 : vector<16x128xf32>
      %c5 = arith.constant 5 : index
      %196 = arith.index_cast %137 : i32 to index
      %197 = memref.load %arg2[%c5, %196] : memref<16x8xf32, #tpu.memory_space<smem>>
      %198 = vector.broadcast %197 : f32 to vector<16x128xf32>
      %199 = arith.addf %195, %198 : vector<16x128xf32>
      %cst_62 = arith.constant 0.000000e+00 : f32
      %200 = vector.broadcast %cst_62 : f32 to vector<16x128xf32>
      %201 = arith.cmpf oge, %186, %200 : vector<16x128xf32>
      %cst_63 = arith.constant 0.000000e+00 : f32
      %202 = vector.broadcast %cst_63 : f32 to vector<16x128xf32>
      %203 = arith.cmpf oge, %199, %202 : vector<16x128xf32>
      %204 = arith.andi %201, %203 : vector<16x128xi1>
      %205 = arith.addf %186, %199 : vector<16x128xf32>
      %cst_64 = arith.constant 1.000000e+00 : f32
      %206 = vector.broadcast %cst_64 : f32 to vector<16x128xf32>
      %207 = arith.cmpf ole, %205, %206 : vector<16x128xf32>
      %208 = arith.andi %204, %207 : vector<16x128xi1>
      %c8 = arith.constant 8 : index
      %209 = arith.index_cast %137 : i32 to index
      %210 = memref.load %arg2[%c8, %209] : memref<16x8xf32, #tpu.memory_space<smem>>
      %c6 = arith.constant 6 : index
      %211 = arith.index_cast %137 : i32 to index
      %212 = memref.load %arg2[%c6, %211] : memref<16x8xf32, #tpu.memory_space<smem>>
      %213 = vector.broadcast %212 : f32 to vector<16x128xf32>
      %214 = arith.mulf %186, %213 : vector<16x128xf32>
      %215 = vector.broadcast %210 : f32 to vector<16x128xf32>
      %216 = arith.addf %215, %214 : vector<16x128xf32>
      %c7 = arith.constant 7 : index
      %217 = arith.index_cast %137 : i32 to index
      %218 = memref.load %arg2[%c7, %217] : memref<16x8xf32, #tpu.memory_space<smem>>
      %219 = vector.broadcast %218 : f32 to vector<16x128xf32>
      %220 = arith.mulf %199, %219 : vector<16x128xf32>
      %221 = arith.addf %216, %220 : vector<16x128xf32>
      %c11 = arith.constant 11 : index
      %222 = arith.index_cast %137 : i32 to index
      %223 = memref.load %arg2[%c11, %222] : memref<16x8xf32, #tpu.memory_space<smem>>
      %c9 = arith.constant 9 : index
      %224 = arith.index_cast %137 : i32 to index
      %225 = memref.load %arg2[%c9, %224] : memref<16x8xf32, #tpu.memory_space<smem>>
      %226 = vector.broadcast %225 : f32 to vector<16x128xf32>
      %227 = arith.mulf %186, %226 : vector<16x128xf32>
      %228 = vector.broadcast %223 : f32 to vector<16x128xf32>
      %229 = arith.addf %228, %227 : vector<16x128xf32>
      %c10 = arith.constant 10 : index
      %230 = arith.index_cast %137 : i32 to index
      %231 = memref.load %arg2[%c10, %230] : memref<16x8xf32, #tpu.memory_space<smem>>
      %232 = vector.broadcast %231 : f32 to vector<16x128xf32>
      %233 = arith.mulf %199, %232 : vector<16x128xf32>
      %234 = arith.addf %229, %233 : vector<16x128xf32>
      %cst_65 = arith.constant 9.99999996E-13 : f32
      %235 = vector.broadcast %cst_65 : f32 to vector<16x128xf32>
      %236 = arith.cmpf ogt, %234, %235 : vector<16x128xf32>
      %cst_66 = arith.constant 1.000000e+00 : f32
      %237 = vector.broadcast %cst_66 : f32 to vector<16x128xf32>
      %238 = arith.select %236, %234, %237 : vector<16x128xi1>, vector<16x128xf32>
      %239 = tpu.reciprocal %238 {approx = true} : vector<16x128xf32> -> vector<16x128xf32>
      %c0_67 = arith.constant 0 : index
      %c0_68 = arith.constant 0 : index
      %240 = vector.load %arg5[%c0_67, %c0_68] : memref<16x128xf32, #tpu.memory_space<vmem>>, vector<16x128xf32>
      %241 = arith.andi %208, %236 : vector<16x128xi1>
      %cst_69 = arith.constant -1.000000e+00 : f32
      %242 = vector.broadcast %cst_69 : f32 to vector<16x128xf32>
      %243 = arith.cmpf oge, %221, %242 : vector<16x128xf32>
      %244 = arith.andi %241, %243 : vector<16x128xi1>
      %245 = arith.cmpf olt, %221, %240 : vector<16x128xf32>
      %246 = arith.andi %244, %245 : vector<16x128xi1>
      %247 = arith.select %246, %221, %240 : vector<16x128xi1>, vector<16x128xf32>
      %c0_70 = arith.constant 0 : index
      %c0_71 = arith.constant 0 : index
      %248 = vector.load %arg5[%c0_70, %c0_71] : memref<16x128xf32, #tpu.memory_space<vmem>>, vector<16x128xf32>
      tpu.vector_store %arg5[%c0_70, %c0_71], %247 {strides = array<i32>} : memref<16x128xf32, #tpu.memory_space<vmem>>, vector<16x128xf32>,
      %c0_72 = arith.constant 0 : index
      %249 = arith.index_cast %137 : i32 to index
      %250 = memref.load %arg3[%c0_72, %249] : memref<9x8xf32, #tpu.memory_space<smem>>
      %c3_73 = arith.constant 3 : index
      %251 = arith.index_cast %137 : i32 to index
      %252 = memref.load %arg3[%c3_73, %251] : memref<9x8xf32, #tpu.memory_space<smem>>
      %c6_74 = arith.constant 6 : index
      %253 = arith.index_cast %137 : i32 to index
      %254 = memref.load %arg3[%c6_74, %253] : memref<9x8xf32, #tpu.memory_space<smem>>
      %255 = vector.broadcast %250 : f32 to vector<16x128xf32>
      %256 = arith.mulf %186, %255 : vector<16x128xf32>
      %257 = vector.broadcast %254 : f32 to vector<16x128xf32>
      %258 = arith.addf %257, %256 : vector<16x128xf32>
      %259 = vector.broadcast %252 : f32 to vector<16x128xf32>
      %260 = arith.mulf %199, %259 : vector<16x128xf32>
      %261 = arith.addf %258, %260 : vector<16x128xf32>
      %262 = arith.mulf %239, %261 : vector<16x128xf32>
      %c0_75 = arith.constant 0 : index
      %c0_76 = arith.constant 0 : index
      %c0_77 = arith.constant 0 : index
      %263 = vector.load %arg4[%c0_75, %c0_76, %c0_77] : memref<3x16x128xf32, #tpu.memory_space<vmem>>, vector<1x16x128xf32>
      %264 = vector.shape_cast %263 : vector<1x16x128xf32> to vector<16x128xf32>
      %265 = arith.select %246, %262, %264 : vector<16x128xi1>, vector<16x128xf32>
      %c0_78 = arith.constant 0 : index
      %c0_79 = arith.constant 0 : index
      %c0_80 = arith.constant 0 : index
      %266 = vector.load %arg4[%c0_78, %c0_79, %c0_80] : memref<3x16x128xf32, #tpu.memory_space<vmem>>, vector<1x16x128xf32>
      %267 = vector.shape_cast %266 : vector<1x16x128xf32> to vector<16x128xf32>
      %268 = vector.shape_cast %265 : vector<16x128xf32> to vector<1x16x128xf32>
      tpu.vector_store %arg4[%c0_78, %c0_79, %c0_80], %268 {strides = array<i32>} : memref<3x16x128xf32, #tpu.memory_space<vmem>>, vector<1x16x128xf32>,
      %c1_81 = arith.constant 1 : index
      %269 = arith.index_cast %137 : i32 to index
      %270 = memref.load %arg3[%c1_81, %269] : memref<9x8xf32, #tpu.memory_space<smem>>
      %c4_82 = arith.constant 4 : index
      %271 = arith.index_cast %137 : i32 to index
      %272 = memref.load %arg3[%c4_82, %271] : memref<9x8xf32, #tpu.memory_space<smem>>
      %c7_83 = arith.constant 7 : index
      %273 = arith.index_cast %137 : i32 to index
      %274 = memref.load %arg3[%c7_83, %273] : memref<9x8xf32, #tpu.memory_space<smem>>
      %275 = vector.broadcast %270 : f32 to vector<16x128xf32>
      %276 = arith.mulf %186, %275 : vector<16x128xf32>
      %277 = vector.broadcast %274 : f32 to vector<16x128xf32>
      %278 = arith.addf %277, %276 : vector<16x128xf32>
      %279 = vector.broadcast %272 : f32 to vector<16x128xf32>
      %280 = arith.mulf %199, %279 : vector<16x128xf32>
      %281 = arith.addf %278, %280 : vector<16x128xf32>
      %282 = arith.mulf %239, %281 : vector<16x128xf32>
      %c1_84 = arith.constant 1 : index
      %c0_85 = arith.constant 0 : index
      %c0_86 = arith.constant 0 : index
      %283 = vector.load %arg4[%c1_84, %c0_85, %c0_86] : memref<3x16x128xf32, #tpu.memory_space<vmem>>, vector<1x16x128xf32>
      %284 = vector.shape_cast %283 : vector<1x16x128xf32> to vector<16x128xf32>
      %285 = arith.select %246, %282, %284 : vector<16x128xi1>, vector<16x128xf32>
      %c1_87 = arith.constant 1 : index
      %c0_88 = arith.constant 0 : index
      %c0_89 = arith.constant 0 : index
      %286 = vector.load %arg4[%c1_87, %c0_88, %c0_89] : memref<3x16x128xf32, #tpu.memory_space<vmem>>, vector<1x16x128xf32>
      %287 = vector.shape_cast %286 : vector<1x16x128xf32> to vector<16x128xf32>
      %288 = vector.shape_cast %285 : vector<16x128xf32> to vector<1x16x128xf32>
      tpu.vector_store %arg4[%c1_87, %c0_88, %c0_89], %288 {strides = array<i32>} : memref<3x16x128xf32, #tpu.memory_space<vmem>>, vector<1x16x128xf32>,
      %c2_90 = arith.constant 2 : index
      %289 = arith.index_cast %137 : i32 to index
      %290 = memref.load %arg3[%c2_90, %289] : memref<9x8xf32, #tpu.memory_space<smem>>
      %c5_91 = arith.constant 5 : index
      %291 = arith.index_cast %137 : i32 to index
      %292 = memref.load %arg3[%c5_91, %291] : memref<9x8xf32, #tpu.memory_space<smem>>
      %c8_92 = arith.constant 8 : index
      %293 = arith.index_cast %137 : i32 to index
      %294 = memref.load %arg3[%c8_92, %293] : memref<9x8xf32, #tpu.memory_space<smem>>
      %295 = vector.broadcast %290 : f32 to vector<16x128xf32>
      %296 = arith.mulf %186, %295 : vector<16x128xf32>
      %297 = vector.broadcast %294 : f32 to vector<16x128xf32>
      %298 = arith.addf %297, %296 : vector<16x128xf32>
      %299 = vector.broadcast %292 : f32 to vector<16x128xf32>
      %300 = arith.mulf %199, %299 : vector<16x128xf32>
      %301 = arith.addf %298, %300 : vector<16x128xf32>
      %302 = arith.mulf %239, %301 : vector<16x128xf32>
      %c2_93 = arith.constant 2 : index
      %c0_94 = arith.constant 0 : index
      %c0_95 = arith.constant 0 : index
      %303 = vector.load %arg4[%c2_93, %c0_94, %c0_95] : memref<3x16x128xf32, #tpu.memory_space<vmem>>, vector<1x16x128xf32>
      %304 = vector.shape_cast %303 : vector<1x16x128xf32> to vector<16x128xf32>
      %305 = arith.select %246, %302, %304 : vector<16x128xi1>, vector<16x128xf32>
      %c2_96 = arith.constant 2 : index
      %c0_97 = arith.constant 0 : index
      %c0_98 = arith.constant 0 : index
      %306 = vector.load %arg4[%c2_96, %c0_97, %c0_98] : memref<3x16x128xf32, #tpu.memory_space<vmem>>, vector<1x16x128xf32>
      %307 = vector.shape_cast %306 : vector<1x16x128xf32> to vector<16x128xf32>
      %308 = vector.shape_cast %305 : vector<16x128xf32> to vector<1x16x128xf32>
      tpu.vector_store %arg4[%c2_96, %c0_97, %c0_98], %308 {strides = array<i32>} : memref<3x16x128xf32, #tpu.memory_space<vmem>>, vector<1x16x128xf32>,
    } else {
    }
    %c7_i32 = arith.constant 7 : i32
    %c1_i32_54 = arith.constant 1 : i32
    %155 = arith.muli %c7_i32, %c1_i32_54 : i32
    %c0_i32_55 = arith.constant 0 : i32
    %156 = arith.addi %c0_i32_55, %155 : i32
    %c12_56 = arith.constant 12 : index
    %157 = arith.index_cast %156 : i32 to index
    %158 = memref.load %arg2[%c12_56, %157] : memref<16x8xf32, #tpu.memory_space<smem>>
    %159 = arith.cmpf olt, %158, %20 : f32
    %c13_57 = arith.constant 13 : index
    %160 = arith.index_cast %156 : i32 to index
    %161 = memref.load %arg2[%c13_57, %160] : memref<16x8xf32, #tpu.memory_space<smem>>
    %162 = arith.cmpf ogt, %161, %3 : f32
    %163 = arith.andi %159, %162 : i1
    %c14_58 = arith.constant 14 : index
    %164 = arith.index_cast %156 : i32 to index
    %165 = memref.load %arg2[%c14_58, %164] : memref<16x8xf32, #tpu.memory_space<smem>>
    %166 = arith.cmpf olt, %165, %21 : f32
    %167 = arith.andi %163, %166 : i1
    %c15_59 = arith.constant 15 : index
    %168 = arith.index_cast %156 : i32 to index
    %169 = memref.load %arg2[%c15_59, %168] : memref<16x8xf32, #tpu.memory_space<smem>>
    %170 = arith.cmpf ogt, %169, %1 : f32
    %171 = arith.andi %167, %170 : i1
    %172 = arith.extui %171 : i1 to i32
    %c0_i32_60 = arith.constant 0 : i32
    %173 = arith.cmpi ne, %172, %c0_i32_60 : i32
    scf.if %173 {
      %c0_61 = arith.constant 0 : index
      %174 = arith.index_cast %156 : i32 to index
      %175 = memref.load %arg2[%c0_61, %174] : memref<16x8xf32, #tpu.memory_space<smem>>
      %176 = vector.broadcast %175 : f32 to vector<16x128xf32>
      %177 = arith.mulf %176, %9 : vector<16x128xf32>
      %c1 = arith.constant 1 : index
      %178 = arith.index_cast %156 : i32 to index
      %179 = memref.load %arg2[%c1, %178] : memref<16x8xf32, #tpu.memory_space<smem>>
      %180 = vector.broadcast %179 : f32 to vector<16x128xf32>
      %181 = arith.mulf %180, %15 : vector<16x128xf32>
      %182 = arith.addf %177, %181 : vector<16x128xf32>
      %c2 = arith.constant 2 : index
      %183 = arith.index_cast %156 : i32 to index
      %184 = memref.load %arg2[%c2, %183] : memref<16x8xf32, #tpu.memory_space<smem>>
      %185 = vector.broadcast %184 : f32 to vector<16x128xf32>
      %186 = arith.addf %182, %185 : vector<16x128xf32>
      %c3 = arith.constant 3 : index
      %187 = arith.index_cast %156 : i32 to index
      %188 = memref.load %arg2[%c3, %187] : memref<16x8xf32, #tpu.memory_space<smem>>
      %189 = vector.broadcast %188 : f32 to vector<16x128xf32>
      %190 = arith.mulf %189, %9 : vector<16x128xf32>
      %c4 = arith.constant 4 : index
      %191 = arith.index_cast %156 : i32 to index
      %192 = memref.load %arg2[%c4, %191] : memref<16x8xf32, #tpu.memory_space<smem>>
      %193 = vector.broadcast %192 : f32 to vector<16x128xf32>
      %194 = arith.mulf %193, %15 : vector<16x128xf32>
      %195 = arith.addf %190, %194 : vector<16x128xf32>
      %c5 = arith.constant 5 : index
      %196 = arith.index_cast %156 : i32 to index
      %197 = memref.load %arg2[%c5, %196] : memref<16x8xf32, #tpu.memory_space<smem>>
      %198 = vector.broadcast %197 : f32 to vector<16x128xf32>
      %199 = arith.addf %195, %198 : vector<16x128xf32>
      %cst_62 = arith.constant 0.000000e+00 : f32
      %200 = vector.broadcast %cst_62 : f32 to vector<16x128xf32>
      %201 = arith.cmpf oge, %186, %200 : vector<16x128xf32>
      %cst_63 = arith.constant 0.000000e+00 : f32
      %202 = vector.broadcast %cst_63 : f32 to vector<16x128xf32>
      %203 = arith.cmpf oge, %199, %202 : vector<16x128xf32>
      %204 = arith.andi %201, %203 : vector<16x128xi1>
      %205 = arith.addf %186, %199 : vector<16x128xf32>
      %cst_64 = arith.constant 1.000000e+00 : f32
      %206 = vector.broadcast %cst_64 : f32 to vector<16x128xf32>
      %207 = arith.cmpf ole, %205, %206 : vector<16x128xf32>
      %208 = arith.andi %204, %207 : vector<16x128xi1>
      %c8 = arith.constant 8 : index
      %209 = arith.index_cast %156 : i32 to index
      %210 = memref.load %arg2[%c8, %209] : memref<16x8xf32, #tpu.memory_space<smem>>
      %c6 = arith.constant 6 : index
      %211 = arith.index_cast %156 : i32 to index
      %212 = memref.load %arg2[%c6, %211] : memref<16x8xf32, #tpu.memory_space<smem>>
      %213 = vector.broadcast %212 : f32 to vector<16x128xf32>
      %214 = arith.mulf %186, %213 : vector<16x128xf32>
      %215 = vector.broadcast %210 : f32 to vector<16x128xf32>
      %216 = arith.addf %215, %214 : vector<16x128xf32>
      %c7 = arith.constant 7 : index
      %217 = arith.index_cast %156 : i32 to index
      %218 = memref.load %arg2[%c7, %217] : memref<16x8xf32, #tpu.memory_space<smem>>
      %219 = vector.broadcast %218 : f32 to vector<16x128xf32>
      %220 = arith.mulf %199, %219 : vector<16x128xf32>
      %221 = arith.addf %216, %220 : vector<16x128xf32>
      %c11 = arith.constant 11 : index
      %222 = arith.index_cast %156 : i32 to index
      %223 = memref.load %arg2[%c11, %222] : memref<16x8xf32, #tpu.memory_space<smem>>
      %c9 = arith.constant 9 : index
      %224 = arith.index_cast %156 : i32 to index
      %225 = memref.load %arg2[%c9, %224] : memref<16x8xf32, #tpu.memory_space<smem>>
      %226 = vector.broadcast %225 : f32 to vector<16x128xf32>
      %227 = arith.mulf %186, %226 : vector<16x128xf32>
      %228 = vector.broadcast %223 : f32 to vector<16x128xf32>
      %229 = arith.addf %228, %227 : vector<16x128xf32>
      %c10 = arith.constant 10 : index
      %230 = arith.index_cast %156 : i32 to index
      %231 = memref.load %arg2[%c10, %230] : memref<16x8xf32, #tpu.memory_space<smem>>
      %232 = vector.broadcast %231 : f32 to vector<16x128xf32>
      %233 = arith.mulf %199, %232 : vector<16x128xf32>
      %234 = arith.addf %229, %233 : vector<16x128xf32>
      %cst_65 = arith.constant 9.99999996E-13 : f32
      %235 = vector.broadcast %cst_65 : f32 to vector<16x128xf32>
      %236 = arith.cmpf ogt, %234, %235 : vector<16x128xf32>
      %cst_66 = arith.constant 1.000000e+00 : f32
      %237 = vector.broadcast %cst_66 : f32 to vector<16x128xf32>
      %238 = arith.select %236, %234, %237 : vector<16x128xi1>, vector<16x128xf32>
      %239 = tpu.reciprocal %238 {approx = true} : vector<16x128xf32> -> vector<16x128xf32>
      %c0_67 = arith.constant 0 : index
      %c0_68 = arith.constant 0 : index
      %240 = vector.load %arg5[%c0_67, %c0_68] : memref<16x128xf32, #tpu.memory_space<vmem>>, vector<16x128xf32>
      %241 = arith.andi %208, %236 : vector<16x128xi1>
      %cst_69 = arith.constant -1.000000e+00 : f32
      %242 = vector.broadcast %cst_69 : f32 to vector<16x128xf32>
      %243 = arith.cmpf oge, %221, %242 : vector<16x128xf32>
      %244 = arith.andi %241, %243 : vector<16x128xi1>
      %245 = arith.cmpf olt, %221, %240 : vector<16x128xf32>
      %246 = arith.andi %244, %245 : vector<16x128xi1>
      %247 = arith.select %246, %221, %240 : vector<16x128xi1>, vector<16x128xf32>
      %c0_70 = arith.constant 0 : index
      %c0_71 = arith.constant 0 : index
      %248 = vector.load %arg5[%c0_70, %c0_71] : memref<16x128xf32, #tpu.memory_space<vmem>>, vector<16x128xf32>
      tpu.vector_store %arg5[%c0_70, %c0_71], %247 {strides = array<i32>} : memref<16x128xf32, #tpu.memory_space<vmem>>, vector<16x128xf32>,
      %c0_72 = arith.constant 0 : index
      %249 = arith.index_cast %156 : i32 to index
      %250 = memref.load %arg3[%c0_72, %249] : memref<9x8xf32, #tpu.memory_space<smem>>
      %c3_73 = arith.constant 3 : index
      %251 = arith.index_cast %156 : i32 to index
      %252 = memref.load %arg3[%c3_73, %251] : memref<9x8xf32, #tpu.memory_space<smem>>
      %c6_74 = arith.constant 6 : index
      %253 = arith.index_cast %156 : i32 to index
      %254 = memref.load %arg3[%c6_74, %253] : memref<9x8xf32, #tpu.memory_space<smem>>
      %255 = vector.broadcast %250 : f32 to vector<16x128xf32>
      %256 = arith.mulf %186, %255 : vector<16x128xf32>
      %257 = vector.broadcast %254 : f32 to vector<16x128xf32>
      %258 = arith.addf %257, %256 : vector<16x128xf32>
      %259 = vector.broadcast %252 : f32 to vector<16x128xf32>
      %260 = arith.mulf %199, %259 : vector<16x128xf32>
      %261 = arith.addf %258, %260 : vector<16x128xf32>
      %262 = arith.mulf %239, %261 : vector<16x128xf32>
      %c0_75 = arith.constant 0 : index
      %c0_76 = arith.constant 0 : index
      %c0_77 = arith.constant 0 : index
      %263 = vector.load %arg4[%c0_75, %c0_76, %c0_77] : memref<3x16x128xf32, #tpu.memory_space<vmem>>, vector<1x16x128xf32>
      %264 = vector.shape_cast %263 : vector<1x16x128xf32> to vector<16x128xf32>
      %265 = arith.select %246, %262, %264 : vector<16x128xi1>, vector<16x128xf32>
      %c0_78 = arith.constant 0 : index
      %c0_79 = arith.constant 0 : index
      %c0_80 = arith.constant 0 : index
      %266 = vector.load %arg4[%c0_78, %c0_79, %c0_80] : memref<3x16x128xf32, #tpu.memory_space<vmem>>, vector<1x16x128xf32>
      %267 = vector.shape_cast %266 : vector<1x16x128xf32> to vector<16x128xf32>
      %268 = vector.shape_cast %265 : vector<16x128xf32> to vector<1x16x128xf32>
      tpu.vector_store %arg4[%c0_78, %c0_79, %c0_80], %268 {strides = array<i32>} : memref<3x16x128xf32, #tpu.memory_space<vmem>>, vector<1x16x128xf32>,
      %c1_81 = arith.constant 1 : index
      %269 = arith.index_cast %156 : i32 to index
      %270 = memref.load %arg3[%c1_81, %269] : memref<9x8xf32, #tpu.memory_space<smem>>
      %c4_82 = arith.constant 4 : index
      %271 = arith.index_cast %156 : i32 to index
      %272 = memref.load %arg3[%c4_82, %271] : memref<9x8xf32, #tpu.memory_space<smem>>
      %c7_83 = arith.constant 7 : index
      %273 = arith.index_cast %156 : i32 to index
      %274 = memref.load %arg3[%c7_83, %273] : memref<9x8xf32, #tpu.memory_space<smem>>
      %275 = vector.broadcast %270 : f32 to vector<16x128xf32>
      %276 = arith.mulf %186, %275 : vector<16x128xf32>
      %277 = vector.broadcast %274 : f32 to vector<16x128xf32>
      %278 = arith.addf %277, %276 : vector<16x128xf32>
      %279 = vector.broadcast %272 : f32 to vector<16x128xf32>
      %280 = arith.mulf %199, %279 : vector<16x128xf32>
      %281 = arith.addf %278, %280 : vector<16x128xf32>
      %282 = arith.mulf %239, %281 : vector<16x128xf32>
      %c1_84 = arith.constant 1 : index
      %c0_85 = arith.constant 0 : index
      %c0_86 = arith.constant 0 : index
      %283 = vector.load %arg4[%c1_84, %c0_85, %c0_86] : memref<3x16x128xf32, #tpu.memory_space<vmem>>, vector<1x16x128xf32>
      %284 = vector.shape_cast %283 : vector<1x16x128xf32> to vector<16x128xf32>
      %285 = arith.select %246, %282, %284 : vector<16x128xi1>, vector<16x128xf32>
      %c1_87 = arith.constant 1 : index
      %c0_88 = arith.constant 0 : index
      %c0_89 = arith.constant 0 : index
      %286 = vector.load %arg4[%c1_87, %c0_88, %c0_89] : memref<3x16x128xf32, #tpu.memory_space<vmem>>, vector<1x16x128xf32>
      %287 = vector.shape_cast %286 : vector<1x16x128xf32> to vector<16x128xf32>
      %288 = vector.shape_cast %285 : vector<16x128xf32> to vector<1x16x128xf32>
      tpu.vector_store %arg4[%c1_87, %c0_88, %c0_89], %288 {strides = array<i32>} : memref<3x16x128xf32, #tpu.memory_space<vmem>>, vector<1x16x128xf32>,
      %c2_90 = arith.constant 2 : index
      %289 = arith.index_cast %156 : i32 to index
      %290 = memref.load %arg3[%c2_90, %289] : memref<9x8xf32, #tpu.memory_space<smem>>
      %c5_91 = arith.constant 5 : index
      %291 = arith.index_cast %156 : i32 to index
      %292 = memref.load %arg3[%c5_91, %291] : memref<9x8xf32, #tpu.memory_space<smem>>
      %c8_92 = arith.constant 8 : index
      %293 = arith.index_cast %156 : i32 to index
      %294 = memref.load %arg3[%c8_92, %293] : memref<9x8xf32, #tpu.memory_space<smem>>
      %295 = vector.broadcast %290 : f32 to vector<16x128xf32>
      %296 = arith.mulf %186, %295 : vector<16x128xf32>
      %297 = vector.broadcast %294 : f32 to vector<16x128xf32>
      %298 = arith.addf %297, %296 : vector<16x128xf32>
      %299 = vector.broadcast %292 : f32 to vector<16x128xf32>
      %300 = arith.mulf %199, %299 : vector<16x128xf32>
      %301 = arith.addf %298, %300 : vector<16x128xf32>
      %302 = arith.mulf %239, %301 : vector<16x128xf32>
      %c2_93 = arith.constant 2 : index
      %c0_94 = arith.constant 0 : index
      %c0_95 = arith.constant 0 : index
      %303 = vector.load %arg4[%c2_93, %c0_94, %c0_95] : memref<3x16x128xf32, #tpu.memory_space<vmem>>, vector<1x16x128xf32>
      %304 = vector.shape_cast %303 : vector<1x16x128xf32> to vector<16x128xf32>
      %305 = arith.select %246, %302, %304 : vector<16x128xi1>, vector<16x128xf32>
      %c2_96 = arith.constant 2 : index
      %c0_97 = arith.constant 0 : index
      %c0_98 = arith.constant 0 : index
      %306 = vector.load %arg4[%c2_96, %c0_97, %c0_98] : memref<3x16x128xf32, #tpu.memory_space<vmem>>, vector<1x16x128xf32>
      %307 = vector.shape_cast %306 : vector<1x16x128xf32> to vector<16x128xf32>
      %308 = vector.shape_cast %305 : vector<16x128xf32> to vector<1x16x128xf32>
      tpu.vector_store %arg4[%c2_96, %c0_97, %c0_98], %308 {strides = array<i32>} : memref<3x16x128xf32, #tpu.memory_space<vmem>>, vector<1x16x128xf32>,
    } else {
    }
    %c8_i32 = arith.constant 8 : i32
    return
  }
  func.func @transform_0(%arg0: i32, %arg1: i32) -> (i32, i32) {
    %c0_i32 = arith.constant 0 : i32
    %c0_i32_0 = arith.constant 0 : i32
    %c0_i32_1 = arith.constant 0 : i32
    return %c0_i32, %c0_i32_0 : i32, i32
  }
  func.func @transform_1(%arg0: i32, %arg1: i32) -> (i32, i32) {
    %c0_i32 = arith.constant 0 : i32
    %c0_i32_0 = arith.constant 0 : i32
    %c0_i32_1 = arith.constant 0 : i32
    return %c0_i32, %c0_i32_0 : i32, i32
  }
  func.func @transform_2(%arg0: i32, %arg1: i32) -> (i32, i32, i32) {
    %c0_i32 = arith.constant 0 : i32
    %c0_i32_0 = arith.constant 0 : i32
    return %c0_i32, %arg0, %arg1 : i32, i32, i32
  }
}

</mosaic_0001>

<bundles_post_ra>
// kernel: tpu_custom_call.1
= control target key start
LH: loop header
LB: loop body
LE: loop exit
PB: predicated region body
PF: predicated region fallthrough
CT: control target
= control target key end

     0   :  { %7 = vsyncpa [#allocation5], 0  ;;  %s2940_s0 = inlined_call_operand.vmem [shape: f32[16,8], index: 0, kind: input, shape index: {}]   ;;  %s2941_s1 = inlined_call_operand.vmem [shape: f32[9,8], index: 1, kind: input, shape index: {}]   ;;  %s2942_s2 = inlined_call_operand.hbm [shape: f32[3,16,128], index: 2, kind: output, shape index: {}]  }
   0x1   :  { %8 = vsyncpa [#allocation7], 0 }
   0x2   :  { %9 = vsyncpa [#allocation4], 0  ;;  %s14_s11 = sshll.u32 %s2940_s0, 4  ;;  %s25_s14 = sshll.u32 %s2941_s1, 4  ;;  %s15_s11 = int_to_ptr.vmem [resolvable:$true] %s14_s11  ;;  %s26_s14 = int_to_ptr.vmem [resolvable:$true] %s25_s14 }
   0x3   :  { %s1758_s15 = smov [#allocation3]   ;;  %s1759_s16 = smov 128  }
   0x4   :  { %s1760_s17 = smov 8   ;;  %s1761_s18 = smov [#allocation6]  }
   0x5   :  { %20 = dma.vmem_to_smem %s15_s11, 256, %s1758_s15, [#allocation5], %s1759_s16, %s1759_s16, %s1760_s17  }
   0x6   :  { %31 = dma.vmem_to_smem %s26_s14, 256, %s1761_s18, [#allocation7], %s1759_s16, %s1759_s16, %s1760_s17  }
   0x7   :  { %1752 = dma.done.wait [#allocation5], 256  }
   0x8   :  { %1753 = vsyncadd [#allocation5], 4294967040 }
   0x9   :  { %1754 = dma.done.wait [#allocation7], 256  }
   0xa   :  { %1755 = vsyncadd [#allocation7], 4294967040 }
   0xb   :  { %40 = sfence }
   0xc   :  { %v45_v0 = vlaneseq  ;;  %s1467_s0 = sld [smem:[#allocation3 + $0x600]]  ;;  %v1762_v1 = vmov 1.0   ;;  %v1763_v4 = vmov 0.0  }
   0xd   :  { %61 = vst [vmem:[#allocation2] sm:$0xff] %v1762_v1  ;;  %s1468_s1 = sld [smem:[#allocation3 + $0x680]] }
   0xe   :  { %v46_v2 = vand.u32 127, %v45_v0  ;;  %v52_v3 = vshrl.u32 %v45_v0, 7  ;;  %62 = vst [vmem:[#allocation2 + $0x8] sm:$0xff] %v1762_v1  ;;  %s1469_s19 = sld [smem:[#allocation3 + $0x700]] }
   0xf   :  { %63 = vst [vmem:[#allocation8] sm:$0xff] %v1763_v4  ;;  %s1470_s20 = sld [smem:[#allocation3 + $0x780]] }
  0x10   :  { %v47_v5 = vcvt.s32.f32 %v46_v2  ;;  %v53_v6 = vadd.s32 8, %v52_v3  ;;  %v54_v7 = vcvt.s32.f32 %v52_v3  ;;  %64 = vst [vmem:[#allocation8 + $0x8] sm:$0xff] %v1763_v4 }
  0x11   :  { %65 = vst [vmem:[#allocation8 + $0x10] sm:$0xff] %v1763_v4 }
  0x12   :  { %v1792_v8 = vadd.f32 0.5, %v47_v5  ;;  %v55_v9 = vcvt.s32.f32 %v53_v6  ;;  %v1794_v10 = vadd.f32 0.5, %v54_v7  ;;  %p72_p0 = scmp.lt.f32.partialorder %s1467_s0, 128.0  ;;  %66 = vst [vmem:[#allocation8 + $0x18] sm:$0xff] %v1763_v4 }
  0x13   :  { %p74_p1 = scmp.gt.f32.partialorder %s1468_s1, 0.0  ;;  %67 = vst [vmem:[#allocation8 + $0x20] sm:$0xff] %v1763_v4 }
  0x14   :  { %v1796_v11 = vadd.f32 0.5, %v55_v9  ;;  %68 = vst [vmem:[#allocation8 + $0x28] sm:$0xff] %v1763_v4  ;;  %p78_p3 = scmp.lt.f32.partialorder %s1469_s19, 16.0 }
  0x15   :  { %p75_p2 = pnand %p74_p1, %p72_p0  ;;  %p82_p6 = scmp.gt.f32.partialorder %s1470_s20, 0.0 }
  0x17   :  { %p76_p4 = pneg %p75_p2 }
  0x19   :  { %p79_p5 = pnand %p78_p3, %p76_p4 }
  0x1b   :  { %p80_p7 = pneg %p79_p5 }
  0x1d   :  { %p83_p8 = pnand %p82_p6, %p80_p7 }
  0x1e   :  { %s87_s21 = sld [smem:[#allocation3]] (!%p83_p8) }
  0x1f   :  { %86 = sbr.rel (%p83_p8) target bundleno = 72 (0x48), region = 21  ;;  %s1471_s22 = sld [smem:[#allocation3 + $0x80]] (!%p83_p8) }
  0x20   :  { %s1472_s23 = sld [smem:[#allocation3 + $0x100]] (!%p83_p8) }
  0x21   :  { %s1473_s24 = sld [smem:[#allocation3 + $0x180]] (!%p83_p8) }
  0x22   :  { %s1474_s25 = sld [smem:[#allocation3 + $0x200]] (!%p83_p8) }
  0x23   :  { %s1798_s26 = sld [smem:[#allocation3 + $0x280]] (!%p83_p8) }
  0x24   :  { %v88_v12 = vstv %s87_s21  ;;  %s1800_s27 = sld [smem:[#allocation3 + $0x400]]  ;;  %v159_v45 = vld [vmem:[#allocation2] sm:$0xff]  ;;  %v160_v57 = vld [vmem:[#allocation2 + $0x8] sm:$0xff] }
  0x25   :  { %v89_v13 = vmul.f32 %v88_v12, %v1792_v8  ;;  %v91_v14 = vstv %s1471_s22  ;;  %s1477_s28 = sld [smem:[#allocation3 + $0x300]] }
  0x26   :  { %v92_v15 = vmul.f32 %v91_v14, %v1794_v10  ;;  %s1804_s29 = sld [smem:[#allocation3 + $0x380]]  ;;  %v93_v16 = vmul.f32 %v91_v14, %v1796_v11  ;;  %v97_v17 = vstv %s1472_s23 }
  0x27   :  { %v101_v18 = vstv %s1473_s24  ;;  %s1807_s30 = sld [smem:[#allocation3 + $0x580]] }
  0x28   :  { %v94_v19 = vadd.f32 %v92_v15, %v89_v13  ;;  %v102_v20 = vmul.f32 %v101_v18, %v1792_v8  ;;  %v104_v21 = vstv %s1474_s25  ;;  %s1810_s3 = sld [smem:[#allocation3 + $0x480]]  ;;  %v95_v22 = vadd.f32 %v93_v16, %v89_v13 }
  0x29   :  { %v105_v23 = vmul.f32 %v104_v21, %v1794_v10  ;;  %s1813_s4 = sld [smem:[#allocation3 + $0x500]]  ;;  %v106_v24 = vmul.f32 %v104_v21, %v1796_v11  ;;  %v110_v26 = vstv %s1798_s26 }
  0x2a   :  { %v1816_v25 = vadd.f32 %v97_v17, %v94_v19  ;;  %v130_v27 = vstv %s1800_s27  ;;  %s1820_s5 = sld [smem:[#allocation6]]  ;;  %v1822_v30 = vadd.f32 %v97_v17, %v95_v22 }
  0x2b   :  { %v107_v28 = vadd.f32 %v105_v23, %v102_v20  ;;  %v127_v29 = vstv %s1477_s28  ;;  %v108_v31 = vadd.f32 %v106_v24, %v102_v20  ;;  %s1824_s6 = sld [smem:[#allocation6 + $0x180]] }
  0x2c   :  { %v128_v32 = vmul.f32 %v127_v29, %v1816_v25  ;;  %v134_v33 = vstv %s1804_s29  ;;  %s1828_s7 = sld [smem:[#allocation6 + $0x300]]  ;;  %vm113_vm0 = vcmp.ge.f32.partialorder %v1816_v25, 0.0  ;;  %vm114_vm1 = vcmp.ge.f32.partialorder %v1822_v30, 0.0 }
  0x2d   :  { %v1830_v34 = vadd.f32 %v110_v26, %v107_v28  ;;  %v129_v35 = vmul.f32 %v127_v29, %v1822_v30  ;;  %s1835_s8 = sld [smem:[#allocation6 + $0x80]]  ;;  %v144_v38 = vstv %s1807_s30  ;;  %v1839_v39 = vadd.f32 %v110_v26, %v108_v31 }
  0x2e   :  { %v131_v36 = vadd.f32 %v130_v27, %v128_v32  ;;  %v141_v37 = vstv %s1810_s3  ;;  %s1854_s9 = sld [smem:[#allocation6 + $0x380]] }
  0x2f   :  { %vm115_vm2 = vcmp.ge.f32.partialorder %v1830_v34, 0.0  ;;  %v119_v40 = vadd.f32 %v1830_v34, %v1816_v25  ;;  %v135_v41 = vmul.f32 %v134_v33, %v1830_v34  ;;  %v142_v42 = vmul.f32 %v141_v37, %v1816_v25  ;;  %s1857_s10 = sld [smem:[#allocation6 + $0x200]] }
  0x30   :  { %vm1846_vm3 = vmand %vm113_vm0, %vm115_vm2  ;;  %v148_v44 = vstv %s1813_s4  ;;  %vm116_vm4 = vcmp.ge.f32.partialorder %v1839_v39, 0.0  ;;  %v120_v46 = vadd.f32 %v1839_v39, %v1822_v30  ;;  %v132_v47 = vadd.f32 %v130_v27, %v129_v35  ;;  %s1868_s11 = sld [smem:[#allocation6 + $0x100]]  ;;  %v191_v35 = vld [vmem:[#allocation8] sm:$0xff] }
  0x31   :  { %vm121_vm5 = vcmp.le.f32.partialorder %v119_v40, 1.0  ;;  %v137_v48 = vadd.f32 %v135_v41, %v131_v36  ;;  %v145_v49 = vadd.f32 %v144_v38, %v142_v42  ;;  %v149_v50 = vmul.f32 %v148_v44, %v1830_v34  ;;  %vm1861_vm6 = vmand %vm114_vm1, %vm116_vm4  ;;  %s1877_s12 = sld [smem:[#allocation6 + $0x400]]  ;;  %v214_v36 = vld [vmem:[#allocation8 + $0x10] sm:$0xff] }
  0x32   :  { %vm122_vm7 = vcmp.le.f32.partialorder %v120_v46, 1.0  ;;  %v136_v52 = vmul.f32 %v134_v33, %v1839_v39  ;;  %v143_v53 = vmul.f32 %v141_v37, %v1822_v30  ;;  %v150_v54 = vmul.f32 %v148_v44, %v1839_v39  ;;  %vm1872_vm8 = vmand %vm1846_vm3, %vm121_vm5  ;;  %s1881_s13 = sld [smem:[#allocation6 + $0x280]] }
  0x33   :  { %v151_v56 = vadd.f32 %v149_v50, %v145_v49  ;;  %vm163_vm9 = vcmp.ge.f32.partialorder %v137_v48, -1.0  ;;  %vm167_vm10 = vcmp.lt.f32.partialorder %v137_v48, %v159_v45  ;;  %v178_v58 = vstv %s1820_s5  ;;  %vm1886_vm12 = vmand %vm1861_vm6, %vm122_vm7  ;;  %v215_v50 = vld [vmem:[#allocation8 + $0x18] sm:$0xff] }
  0x34   :  { %v138_v59 = vadd.f32 %v136_v52, %v132_v47  ;;  %v146_v60 = vadd.f32 %v144_v38, %v143_v53  ;;  %v179_v61 = vmul.f32 %v178_v58, %v1816_v25  ;;  %v181_v62 = vstv %s1828_s7  ;;  %v237_v52 = vld [vmem:[#allocation8 + $0x20] sm:$0xff] }
  0x35   :  { %vm153_vm11 = vcmp.gt.f32.partialorder %v151_v56, 1e-12  ;;  %v184_v0 = vstv %s1824_s6  ;;  %v180_v1 = vmul.f32 %v178_v58, %v1822_v30  ;;  %v200_v2 = vstv %s1835_s8 }
  0x36   :  { %v155_v3 = vsel %vm153_vm11, %v151_v56, 1.0  ;;  %vm161_vm13 = vmand %vm1872_vm8, %vm153_vm11  ;;  %v152_v4 = vadd.f32 %v150_v54, %v146_v60  ;;  %vm164_vm14 = vcmp.ge.f32.partialorder %v138_v59, -1.0  ;;  %vm168_vm15 = vcmp.lt.f32.partialorder %v138_v59, %v160_v57  ;;  %v238_v54 = vld [vmem:[#allocation8 + $0x28] sm:$0xff] }
  0x37   :  { %1672 = vrcp.f32 %v155_v3  ;;  %vm165_vm0 = vmand %vm161_vm13, %vm163_vm9  ;;  %v182_v5 = vadd.f32 %v181_v62, %v179_v61  ;;  %v185_v6 = vmul.f32 %v184_v0, %v1830_v34  ;;  %v183_v7 = vadd.f32 %v181_v62, %v180_v1 }
  0x38   :  { %vm1898_vm1 = vmand %vm165_vm0, %vm167_vm10  ;;  %vm154_vm2 = vcmp.gt.f32.partialorder %v152_v4, 1e-12  ;;  %v186_v12 = vmul.f32 %v184_v0, %v1839_v39  ;;  %v201_v13 = vmul.f32 %v200_v2, %v1816_v25  ;;  %v203_v14 = vstv %s1854_s9 }
  0x39   :  { %v171_v15 = vsel %vm1898_vm1, %v137_v48, %v159_v45  ;;  %v156_v16 = vsel %vm154_vm2, %v152_v4, 1.0  ;;  %vm162_vm3 = vmand %vm1886_vm12, %vm154_vm2  ;;  %v187_v17 = vadd.f32 %v185_v6, %v182_v5  ;;  %v206_v18 = vstv %s1857_s10  ;;  %v192_v48 = vld [vmem:[#allocation8 + $0x8] sm:$0xff] }
  0x3a   :  { %173 = vst [vmem:[#allocation2] sm:$0xff] %v171_v15  ;;  %1674 = vrcp.f32 %v156_v16  ;;  %vm166_vm4 = vmand %vm162_vm3, %vm164_vm14  ;;  %v188_v19 = vadd.f32 %v186_v12, %v183_v7  ;;  %v204_v20 = vadd.f32 %v203_v14, %v201_v13  ;;  %v207_v21 = vmul.f32 %v206_v18, %v1830_v34 }
  0x3b   :  { %vm1913_vm5 = vmand %vm166_vm4, %vm168_vm15  ;;  %v202_v23 = vmul.f32 %v200_v2, %v1822_v30  ;;  %v208_v24 = vmul.f32 %v206_v18, %v1839_v39  ;;  %v223_v26 = vstv %s1868_s11  ;;  %v226_v27 = vstv %s1877_s12 }
  0x3c   :  { %v172_v28 = vsel %vm1913_vm5, %v138_v59, %v160_v57  ;;  %v209_v29 = vadd.f32 %v207_v21, %v204_v20  ;;  %v224_v31 = vmul.f32 %v223_v26, %v1816_v25  ;;  %v229_v32 = vstv %s1881_s13 }
  0x3d   :  { %v1673_v33 = vpop.eup %1672  ;;  %174 = vst [vmem:[#allocation2 + $0x8] sm:$0xff] %v172_v28  ;;  %v205_v37 = vadd.f32 %v203_v14, %v202_v23  ;;  %v230_v38 = vmul.f32 %v229_v32, %v1830_v34  ;;  %v225_v40 = vmul.f32 %v223_v26, %v1822_v30  ;;  %v231_v41 = vmul.f32 %v229_v32, %v1839_v39 }
  0x3e   :  { %v189_v42 = vmul.f32 %v1673_v33, %v187_v17  ;;  %v211_v43 = vmul.f32 %v1673_v33, %v209_v29  ;;  %v227_v44 = vadd.f32 %v226_v27, %v224_v31 }
  0x3f   :  { %v210_v45 = vadd.f32 %v208_v24, %v205_v37  ;;  %v228_v46 = vadd.f32 %v226_v27, %v225_v40 }
  0x40   :  { %v1675_v47 = vpop.eup %1674  ;;  %v193_v25 = vsel %vm1898_vm1, %v189_v42, %v191_v35  ;;  %v216_v49 = vsel %vm1898_vm1, %v211_v43, %v214_v36  ;;  %v232_v51 = vadd.f32 %v230_v38, %v227_v44 }
  0x41   :  { %195 = vst [vmem:[#allocation8] sm:$0xff] %v193_v25  ;;  %v190_v34 = vmul.f32 %v1675_v47, %v188_v19  ;;  %v212_v30 = vmul.f32 %v1675_v47, %v210_v45  ;;  %v233_v39 = vadd.f32 %v231_v41, %v228_v46 }
  0x42   :  { %218 = vst [vmem:[#allocation8 + $0x10] sm:$0xff] %v216_v49  ;;  %v234_v53 = vmul.f32 %v1673_v33, %v232_v51 }
  0x43   :  { %v194_v55 = vsel %vm1913_vm5, %v190_v34, %v192_v48  ;;  %v217_v56 = vsel %vm1913_vm5, %v212_v30, %v215_v50  ;;  %v235_v57 = vmul.f32 %v1675_v47, %v233_v39 }
  0x44   :  { %196 = vst [vmem:[#allocation8 + $0x8] sm:$0xff] %v194_v55  ;;  %v239_v58 = vsel %vm1898_vm1, %v234_v53, %v237_v52 }
  0x45   :  { %219 = vst [vmem:[#allocation8 + $0x18] sm:$0xff] %v217_v56  ;;  %v240_v59 = vsel %vm1913_vm5, %v235_v57, %v238_v54 }
  0x46   :  { %241 = vst [vmem:[#allocation8 + $0x20] sm:$0xff] %v239_v58 }
  0x47   :  { %242 = vst [vmem:[#allocation8 + $0x28] sm:$0xff] %v240_v59 }
  0x48 PF:  { %s1490_s14 = sld [smem:[#allocation3 + $0x601]] }
  0x49   :  { %s1491_s15 = sld [smem:[#allocation3 + $0x681]] }
  0x4a   :  { %s1492_s18 = sld [smem:[#allocation3 + $0x701]] }
  0x4b   :  { %s1493_s0 = sld [smem:[#allocation3 + $0x781]] }
  0x4e   :  { %p244_p9 = scmp.lt.f32.partialorder %s1490_s14, 128.0 }
  0x4f   :  { %p246_p10 = scmp.gt.f32.partialorder %s1491_s15, 0.0 }
  0x50   :  { %p250_p12 = scmp.lt.f32.partialorder %s1492_s18, 16.0 }
  0x51   :  { %p247_p11 = pnand %p246_p10, %p244_p9  ;;  %p254_p1 = scmp.gt.f32.partialorder %s1493_s0, 0.0 }
  0x53   :  { %p248_p13 = pneg %p247_p11 }
  0x55   :  { %p251_p0 = pnand %p250_p12, %p248_p13 }
  0x57   :  { %p252_p2 = pneg %p251_p0 }
  0x59   :  { %p255_p3 = pnand %p254_p1, %p252_p2 }
  0x5a   :  { %s1494_s1 = sld [smem:[#allocation3 + $0x1]] (!%p255_p3) }
  0x5b   :  { %258 = sbr.rel (%p255_p3) target bundleno = 132 (0x84), region = 25  ;;  %s1495_s19 = sld [smem:[#allocation3 + $0x81]] (!%p255_p3) }
  0x5c   :  { %s1496_s20 = sld [smem:[#allocation3 + $0x101]] (!%p255_p3) }
  0x5d   :  { %s1497_s21 = sld [smem:[#allocation3 + $0x181]] (!%p255_p3) }
  0x5e   :  { %s1498_s22 = sld [smem:[#allocation3 + $0x201]] (!%p255_p3) }
  0x5f   :  { %s1940_s23 = sld [smem:[#allocation3 + $0x281]] (!%p255_p3) }
  0x60   :  { %v260_v60 = vstv %s1494_s1  ;;  %s1942_s24 = sld [smem:[#allocation3 + $0x401]]  ;;  %v331_v35 = vld [vmem:[#allocation2] sm:$0xff]  ;;  %v332_v25 = vld [vmem:[#allocation2 + $0x8] sm:$0xff] }
  0x61   :  { %v261_v61 = vmul.f32 %v260_v60, %v1792_v8  ;;  %v263_v62 = vstv %s1495_s19  ;;  %s1501_s25 = sld [smem:[#allocation3 + $0x301]] }
  0x62   :  { %v264_v63 = vmul.f32 %v263_v62, %v1794_v10  ;;  %s1946_s26 = sld [smem:[#allocation3 + $0x381]]  ;;  %v265_v0 = vmul.f32 %v263_v62, %v1796_v11  ;;  %v269_v1 = vstv %s1496_s20 }
  0x63   :  { %v273_v2 = vstv %s1497_s21  ;;  %s1949_s27 = sld [smem:[#allocation3 + $0x581]] }
  0x64   :  { %v266_v3 = vadd.f32 %v264_v63, %v261_v61  ;;  %v274_v4 = vmul.f32 %v273_v2, %v1792_v8  ;;  %v276_v5 = vstv %s1498_s22  ;;  %s1952_s28 = sld [smem:[#allocation3 + $0x481]]  ;;  %v267_v6 = vadd.f32 %v265_v0, %v261_v61 }
  0x65   :  { %v277_v7 = vmul.f32 %v276_v5, %v1794_v10  ;;  %s1955_s29 = sld [smem:[#allocation3 + $0x501]]  ;;  %v278_v9 = vmul.f32 %v276_v5, %v1796_v11  ;;  %v282_v13 = vstv %s1940_s23 }
  0x66   :  { %v1958_v12 = vadd.f32 %v269_v1, %v266_v3  ;;  %v302_v14 = vstv %s1942_s24  ;;  %s1962_s30 = sld [smem:[#allocation6 + $0x1]]  ;;  %v1964_v17 = vadd.f32 %v269_v1, %v267_v6 }
  0x67   :  { %v279_v15 = vadd.f32 %v277_v7, %v274_v4  ;;  %v299_v16 = vstv %s1501_s25  ;;  %v280_v18 = vadd.f32 %v278_v9, %v274_v4  ;;  %s1966_s3 = sld [smem:[#allocation6 + $0x181]] }
  0x68   :  { %v300_v19 = vmul.f32 %v299_v16, %v1958_v12  ;;  %v306_v20 = vstv %s1946_s26  ;;  %s1970_s4 = sld [smem:[#allocation6 + $0x301]]  ;;  %vm285_vm6 = vcmp.ge.f32.partialorder %v1958_v12, 0.0  ;;  %vm286_vm7 = vcmp.ge.f32.partialorder %v1964_v17, 0.0 }
  0x69   :  { %v1972_v21 = vadd.f32 %v282_v13, %v279_v15  ;;  %v301_v22 = vmul.f32 %v299_v16, %v1964_v17  ;;  %s1977_s5 = sld [smem:[#allocation6 + $0x81]]  ;;  %v316_v26 = vstv %s1949_s27  ;;  %v1981_v27 = vadd.f32 %v282_v13, %v280_v18 }
  0x6a   :  { %v303_v23 = vadd.f32 %v302_v14, %v300_v19  ;;  %v313_v24 = vstv %s1952_s28  ;;  %s1996_s6 = sld [smem:[#allocation6 + $0x381]] }
  0x6b   :  { %vm287_vm8 = vcmp.ge.f32.partialorder %v1972_v21, 0.0  ;;  %v291_v28 = vadd.f32 %v1972_v21, %v1958_v12  ;;  %v307_v29 = vmul.f32 %v306_v20, %v1972_v21  ;;  %v314_v31 = vmul.f32 %v313_v24, %v1958_v12  ;;  %s1999_s7 = sld [smem:[#allocation6 + $0x201]] }
  0x6c   :  { %vm1988_vm9 = vmand %vm285_vm6, %vm287_vm8  ;;  %v320_v33 = vstv %s1955_s29  ;;  %vm288_vm10 = vcmp.ge.f32.partialorder %v1981_v27, 0.0  ;;  %v292_v36 = vadd.f32 %v1981_v27, %v1964_v17  ;;  %v304_v37 = vadd.f32 %v302_v14, %v301_v22  ;;  %s2010_s8 = sld [smem:[#allocation6 + $0x101]]  ;;  %v363_v22 = vld [vmem:[#allocation8] sm:$0xff] }
  0x6d   :  { %vm293_vm11 = vcmp.le.f32.partialorder %v291_v28, 1.0  ;;  %v309_v38 = vadd.f32 %v307_v29, %v303_v23  ;;  %v317_v40 = vadd.f32 %v316_v26, %v314_v31  ;;  %v321_v41 = vmul.f32 %v320_v33, %v1972_v21  ;;  %vm2003_vm12 = vmand %vm286_vm7, %vm288_vm10  ;;  %s2019_s9 = sld [smem:[#allocation6 + $0x401]]  ;;  %v386_v23 = vld [vmem:[#allocation8 + $0x10] sm:$0xff] }
  0x6e   :  { %vm294_vm13 = vcmp.le.f32.partialorder %v292_v36, 1.0  ;;  %v308_v43 = vmul.f32 %v306_v20, %v1981_v27  ;;  %v315_v44 = vmul.f32 %v313_v24, %v1964_v17  ;;  %v322_v45 = vmul.f32 %v320_v33, %v1981_v27  ;;  %vm2014_vm14 = vmand %vm1988_vm9, %vm293_vm11  ;;  %s2023_s10 = sld [smem:[#allocation6 + $0x281]] }
  0x6f   :  { %v323_v47 = vadd.f32 %v321_v41, %v317_v40  ;;  %vm335_vm15 = vcmp.ge.f32.partialorder %v309_v38, -1.0  ;;  %vm339_vm0 = vcmp.lt.f32.partialorder %v309_v38, %v331_v35  ;;  %v350_v48 = vstv %s1962_s30  ;;  %vm2028_vm2 = vmand %vm2003_vm12, %vm294_vm13  ;;  %v387_v41 = vld [vmem:[#allocation8 + $0x18] sm:$0xff] }
  0x70   :  { %v310_v49 = vadd.f32 %v308_v43, %v304_v37  ;;  %v318_v50 = vadd.f32 %v316_v26, %v315_v44  ;;  %v351_v51 = vmul.f32 %v350_v48, %v1958_v12  ;;  %v353_v34 = vstv %s1970_s4  ;;  %v409_v43 = vld [vmem:[#allocation8 + $0x20] sm:$0xff] }
  0x71   :  { %vm325_vm1 = vcmp.gt.f32.partialorder %v323_v47, 1e-12  ;;  %v356_v52 = vstv %s1966_s3  ;;  %v352_v39 = vmul.f32 %v350_v48, %v1964_v17  ;;  %v372_v53 = vstv %s1977_s5 }
  0x72   :  { %v327_v54 = vsel %vm325_vm1, %v323_v47, 1.0  ;;  %vm333_vm3 = vmand %vm2014_vm14, %vm325_vm1  ;;  %v324_v55 = vadd.f32 %v322_v45, %v318_v50  ;;  %vm336_vm4 = vcmp.ge.f32.partialorder %v310_v49, -1.0  ;;  %vm340_vm5 = vcmp.lt.f32.partialorder %v310_v49, %v332_v25  ;;  %v410_v45 = vld [vmem:[#allocation8 + $0x28] sm:$0xff] }
  0x73   :  { %1676 = vrcp.f32 %v327_v54  ;;  %vm337_vm6 = vmand %vm333_vm3, %vm335_vm15  ;;  %v354_v56 = vadd.f32 %v353_v34, %v351_v51  ;;  %v357_v57 = vmul.f32 %v356_v52, %v1972_v21  ;;  %v355_v58 = vadd.f32 %v353_v34, %v352_v39 }
  0x74   :  { %vm2040_vm7 = vmand %vm337_vm6, %vm339_vm0  ;;  %vm326_vm8 = vcmp.gt.f32.partialorder %v324_v55, 1e-12  ;;  %v358_v60 = vmul.f32 %v356_v52, %v1981_v27  ;;  %v373_v61 = vmul.f32 %v372_v53, %v1958_v12  ;;  %v375_v62 = vstv %s1996_s6 }
  0x75   :  { %v343_v63 = vsel %vm2040_vm7, %v309_v38, %v331_v35  ;;  %v328_v0 = vsel %vm326_vm8, %v324_v55, 1.0  ;;  %vm334_vm9 = vmand %vm2028_vm2, %vm326_vm8  ;;  %v359_v1 = vadd.f32 %v357_v57, %v354_v56  ;;  %v378_v2 = vstv %s1999_s7  ;;  %v364_v38 = vld [vmem:[#allocation8 + $0x8] sm:$0xff] }
  0x76   :  { %345 = vst [vmem:[#allocation2] sm:$0xff] %v343_v63  ;;  %1678 = vrcp.f32 %v328_v0  ;;  %vm338_vm10 = vmand %vm334_vm9, %vm336_vm4  ;;  %v360_v3 = vadd.f32 %v358_v60, %v355_v58  ;;  %v376_v4 = vadd.f32 %v375_v62, %v373_v61  ;;  %v379_v5 = vmul.f32 %v378_v2, %v1972_v21 }
  0x77   :  { %vm2055_vm11 = vmand %vm338_vm10, %vm340_vm5  ;;  %v374_v7 = vmul.f32 %v372_v53, %v1964_v17  ;;  %v380_v9 = vmul.f32 %v378_v2, %v1981_v27  ;;  %v395_v13 = vstv %s2010_s8  ;;  %v398_v14 = vstv %s2019_s9 }
  0x78   :  { %v344_v15 = vsel %vm2055_vm11, %v310_v49, %v332_v25  ;;  %v381_v16 = vadd.f32 %v379_v5, %v376_v4  ;;  %v396_v18 = vmul.f32 %v395_v13, %v1958_v12  ;;  %v401_v19 = vstv %s2023_s10 }
  0x79   :  { %v1677_v20 = vpop.eup %1676  ;;  %346 = vst [vmem:[#allocation2 + $0x8] sm:$0xff] %v344_v15  ;;  %v377_v24 = vadd.f32 %v375_v62, %v374_v7  ;;  %v402_v26 = vmul.f32 %v401_v19, %v1972_v21  ;;  %v397_v28 = vmul.f32 %v395_v13, %v1964_v17  ;;  %v403_v29 = vmul.f32 %v401_v19, %v1981_v27 }
  0x7a   :  { %v361_v31 = vmul.f32 %v1677_v20, %v359_v1  ;;  %v383_v32 = vmul.f32 %v1677_v20, %v381_v16  ;;  %v399_v33 = vadd.f32 %v398_v14, %v396_v18 }
  0x7b   :  { %v382_v35 = vadd.f32 %v380_v9, %v377_v24  ;;  %v400_v36 = vadd.f32 %v398_v14, %v397_v28 }
  0x7c   :  { %v1679_v37 = vpop.eup %1678  ;;  %v365_v12 = vsel %vm2040_vm7, %v361_v31, %v363_v22  ;;  %v388_v40 = vsel %vm2040_vm7, %v383_v32, %v386_v23  ;;  %v404_v42 = vadd.f32 %v402_v26, %v399_v33 }
  0x7d   :  { %367 = vst [vmem:[#allocation8] sm:$0xff] %v365_v12  ;;  %v362_v21 = vmul.f32 %v1679_v37, %v360_v3  ;;  %v384_v17 = vmul.f32 %v1679_v37, %v382_v35  ;;  %v405_v27 = vadd.f32 %v403_v29, %v400_v36 }
  0x7e   :  { %390 = vst [vmem:[#allocation8 + $0x10] sm:$0xff] %v388_v40  ;;  %v406_v44 = vmul.f32 %v1677_v20, %v404_v42 }
  0x7f   :  { %v366_v46 = vsel %vm2055_vm11, %v362_v21, %v364_v38  ;;  %v389_v47 = vsel %vm2055_vm11, %v384_v17, %v387_v41  ;;  %v407_v25 = vmul.f32 %v1679_v37, %v405_v27 }
  0x80   :  { %368 = vst [vmem:[#allocation8 + $0x8] sm:$0xff] %v366_v46  ;;  %v411_v48 = vsel %vm2040_vm7, %v406_v44, %v409_v43 }
  0x81   :  { %391 = vst [vmem:[#allocation8 + $0x18] sm:$0xff] %v389_v47  ;;  %v412_v49 = vsel %vm2055_vm11, %v407_v25, %v410_v45 }
  0x82   :  { %413 = vst [vmem:[#allocation8 + $0x20] sm:$0xff] %v411_v48 }
  0x83   :  { %414 = vst [vmem:[#allocation8 + $0x28] sm:$0xff] %v412_v49 }
  0x84 PF:  { %s1515_s11 = sld [smem:[#allocation3 + $0x602]] }
  0x85   :  { %s1516_s12 = sld [smem:[#allocation3 + $0x682]] }
  0x86   :  { %s1517_s13 = sld [smem:[#allocation3 + $0x702]] }
  0x87   :  { %s1518_s14 = sld [smem:[#allocation3 + $0x782]] }
  0x8a   :  { %p416_p4 = scmp.lt.f32.partialorder %s1515_s11, 128.0 }
  0x8b   :  { %p418_p5 = scmp.gt.f32.partialorder %s1516_s12, 0.0 }
  0x8c   :  { %p422_p7 = scmp.lt.f32.partialorder %s1517_s13, 16.0 }
  0x8d   :  { %p419_p6 = pnand %p418_p5, %p416_p4  ;;  %p426_p10 = scmp.gt.f32.partialorder %s1518_s14, 0.0 }
  0x8f   :  { %p420_p8 = pneg %p419_p6 }
  0x91   :  { %p423_p9 = pnand %p422_p7, %p420_p8 }
  0x93   :  { %p424_p11 = pneg %p423_p9 }
  0x95   :  { %p427_p12 = pnand %p426_p10, %p424_p11 }
  0x96   :  { %s1519_s15 = sld [smem:[#allocation3 + $0x2]] (!%p427_p12) }
  0x97   :  { %430 = sbr.rel (%p427_p12) target bundleno = 192 (0xc0), region = 29  ;;  %s1520_s18 = sld [smem:[#allocation3 + $0x82]] (!%p427_p12) }
  0x98   :  { %s1521_s0 = sld [smem:[#allocation3 + $0x102]] (!%p427_p12) }
  0x99   :  { %s1522_s1 = sld [smem:[#allocation3 + $0x182]] (!%p427_p12) }
  0x9a   :  { %s1523_s19 = sld [smem:[#allocation3 + $0x202]] (!%p427_p12) }
  0x9b   :  { %s2082_s20 = sld [smem:[#allocation3 + $0x282]] (!%p427_p12) }
  0x9c   :  { %v432_v50 = vstv %s1519_s15  ;;  %s2084_s21 = sld [smem:[#allocation3 + $0x402]]  ;;  %v503_v22 = vld [vmem:[#allocation2] sm:$0xff]  ;;  %v504_v12 = vld [vmem:[#allocation2 + $0x8] sm:$0xff] }
  0x9d   :  { %v433_v51 = vmul.f32 %v432_v50, %v1792_v8  ;;  %v435_v34 = vstv %s1520_s18  ;;  %s1526_s22 = sld [smem:[#allocation3 + $0x302]] }
  0x9e   :  { %v436_v30 = vmul.f32 %v435_v34, %v1794_v10  ;;  %s2088_s23 = sld [smem:[#allocation3 + $0x382]]  ;;  %v437_v52 = vmul.f32 %v435_v34, %v1796_v11  ;;  %v441_v39 = vstv %s1521_s0 }
  0x9f   :  { %v445_v53 = vstv %s1522_s1  ;;  %s2091_s24 = sld [smem:[#allocation3 + $0x582]] }
  0xa0   :  { %v438_v54 = vadd.f32 %v436_v30, %v433_v51  ;;  %v446_v55 = vmul.f32 %v445_v53, %v1792_v8  ;;  %v448_v56 = vstv %s1523_s19  ;;  %s2094_s25 = sld [smem:[#allocation3 + $0x482]]  ;;  %v439_v57 = vadd.f32 %v437_v52, %v433_v51 }
  0xa1   :  { %v449_v58 = vmul.f32 %v448_v56, %v1794_v10  ;;  %s2097_s26 = sld [smem:[#allocation3 + $0x502]]  ;;  %v450_v59 = vmul.f32 %v448_v56, %v1796_v11  ;;  %v454_v61 = vstv %s2082_s20 }
  0xa2   :  { %v2100_v60 = vadd.f32 %v441_v39, %v438_v54  ;;  %v474_v62 = vstv %s2084_s21  ;;  %s2104_s27 = sld [smem:[#allocation6 + $0x2]]  ;;  %v2106_v1 = vadd.f32 %v441_v39, %v439_v57 }
  0xa3   :  { %v451_v63 = vadd.f32 %v449_v58, %v446_v55  ;;  %v471_v0 = vstv %s1526_s22  ;;  %v452_v2 = vadd.f32 %v450_v59, %v446_v55  ;;  %s2108_s28 = sld [smem:[#allocation6 + $0x182]] }
  0xa4   :  { %v472_v3 = vmul.f32 %v471_v0, %v2100_v60  ;;  %v478_v4 = vstv %s2088_s23  ;;  %s2112_s29 = sld [smem:[#allocation6 + $0x302]]  ;;  %vm457_vm12 = vcmp.ge.f32.partialorder %v2100_v60, 0.0  ;;  %vm458_vm13 = vcmp.ge.f32.partialorder %v2106_v1, 0.0 }
  0xa5   :  { %v2114_v5 = vadd.f32 %v454_v61, %v451_v63  ;;  %v473_v6 = vmul.f32 %v471_v0, %v2106_v1  ;;  %s2119_s30 = sld [smem:[#allocation6 + $0x82]]  ;;  %v488_v13 = vstv %s2091_s24  ;;  %v2123_v14 = vadd.f32 %v454_v61, %v452_v2 }
  0xa6   :  { %v475_v7 = vadd.f32 %v474_v62, %v472_v3  ;;  %v485_v9 = vstv %s2094_s25  ;;  %s2138_s3 = sld [smem:[#allocation6 + $0x382]] }
  0xa7   :  { %vm459_vm14 = vcmp.ge.f32.partialorder %v2114_v5, 0.0  ;;  %v463_v15 = vadd.f32 %v2114_v5, %v2100_v60  ;;  %v479_v16 = vmul.f32 %v478_v4, %v2114_v5  ;;  %v486_v18 = vmul.f32 %v485_v9, %v2100_v60  ;;  %s2141_s4 = sld [smem:[#allocation6 + $0x202]] }
  0xa8   :  { %vm2130_vm15 = vmand %vm457_vm12, %vm459_vm14  ;;  %v492_v20 = vstv %s2097_s26  ;;  %vm460_vm0 = vcmp.ge.f32.partialorder %v2123_v14, 0.0  ;;  %v464_v23 = vadd.f32 %v2123_v14, %v2106_v1  ;;  %v476_v24 = vadd.f32 %v474_v62, %v473_v6  ;;  %s2152_s5 = sld [smem:[#allocation6 + $0x102]]  ;;  %v535_v6 = vld [vmem:[#allocation8] sm:$0xff] }
  0xa9   :  { %vm465_vm1 = vcmp.le.f32.partialorder %v463_v15, 1.0  ;;  %v481_v26 = vadd.f32 %v479_v16, %v475_v7  ;;  %v489_v28 = vadd.f32 %v488_v13, %v486_v18  ;;  %v493_v29 = vmul.f32 %v492_v20, %v2114_v5  ;;  %vm2145_vm2 = vmand %vm458_vm13, %vm460_vm0  ;;  %s2161_s6 = sld [smem:[#allocation6 + $0x402]]  ;;  %v558_v7 = vld [vmem:[#allocation8 + $0x10] sm:$0xff] }
  0xaa   :  { %vm466_vm3 = vcmp.le.f32.partialorder %v464_v23, 1.0  ;;  %v480_v32 = vmul.f32 %v478_v4, %v2123_v14  ;;  %v487_v33 = vmul.f32 %v485_v9, %v2106_v1  ;;  %v494_v35 = vmul.f32 %v492_v20, %v2123_v14  ;;  %vm2156_vm4 = vmand %vm2130_vm15, %vm465_vm1  ;;  %s2165_s7 = sld [smem:[#allocation6 + $0x282]] }
  0xab   :  { %v495_v37 = vadd.f32 %v493_v29, %v489_v28  ;;  %vm507_vm5 = vcmp.ge.f32.partialorder %v481_v26, -1.0  ;;  %vm511_vm6 = vcmp.lt.f32.partialorder %v481_v26, %v503_v22  ;;  %v522_v38 = vstv %s2104_s27  ;;  %vm2170_vm8 = vmand %vm2145_vm2, %vm466_vm3  ;;  %v559_v29 = vld [vmem:[#allocation8 + $0x18] sm:$0xff] }
  0xac   :  { %v482_v40 = vadd.f32 %v480_v32, %v476_v24  ;;  %v490_v41 = vadd.f32 %v488_v13, %v487_v33  ;;  %v523_v42 = vmul.f32 %v522_v38, %v2100_v60  ;;  %v525_v21 = vstv %s2112_s29  ;;  %v581_v32 = vld [vmem:[#allocation8 + $0x20] sm:$0xff] }
  0xad   :  { %vm497_vm7 = vcmp.gt.f32.partialorder %v495_v37, 1e-12  ;;  %v528_v43 = vstv %s2108_s28  ;;  %v524_v27 = vmul.f32 %v522_v38, %v2106_v1  ;;  %v544_v44 = vstv %s2119_s30 }
  0xae   :  { %v499_v45 = vsel %vm497_vm7, %v495_v37, 1.0  ;;  %vm505_vm9 = vmand %vm2156_vm4, %vm497_vm7  ;;  %v496_v46 = vadd.f32 %v494_v35, %v490_v41  ;;  %vm508_vm10 = vcmp.ge.f32.partialorder %v482_v40, -1.0  ;;  %vm512_vm11 = vcmp.lt.f32.partialorder %v482_v40, %v504_v12  ;;  %v582_v35 = vld [vmem:[#allocation8 + $0x28] sm:$0xff] }
  0xaf   :  { %1680 = vrcp.f32 %v499_v45  ;;  %vm509_vm12 = vmand %vm505_vm9, %vm507_vm5  ;;  %v526_v47 = vadd.f32 %v525_v21, %v523_v42  ;;  %v529_v25 = vmul.f32 %v528_v43, %v2114_v5  ;;  %v527_v48 = vadd.f32 %v525_v21, %v524_v27 }
  0xb0   :  { %vm2182_vm13 = vmand %vm509_vm12, %vm511_vm6  ;;  %vm498_vm14 = vcmp.gt.f32.partialorder %v496_v46, 1e-12  ;;  %v530_v50 = vmul.f32 %v528_v43, %v2123_v14  ;;  %v545_v51 = vmul.f32 %v544_v44, %v2100_v60  ;;  %v547_v34 = vstv %s2138_s3 }
  0xb1   :  { %v515_v30 = vsel %vm2182_vm13, %v481_v26, %v503_v22  ;;  %v500_v52 = vsel %vm498_vm14, %v496_v46, 1.0  ;;  %vm506_vm15 = vmand %vm2170_vm8, %vm498_vm14  ;;  %v531_v39 = vadd.f32 %v529_v25, %v526_v47  ;;  %v550_v53 = vstv %s2141_s4  ;;  %v536_v26 = vld [vmem:[#allocation8 + $0x8] sm:$0xff] }
  0xb2   :  { %517 = vst [vmem:[#allocation2] sm:$0xff] %v515_v30  ;;  %1682 = vrcp.f32 %v500_v52  ;;  %vm510_vm0 = vmand %vm506_vm15, %vm508_vm10  ;;  %v532_v54 = vadd.f32 %v530_v50, %v527_v48  ;;  %v548_v55 = vadd.f32 %v547_v34, %v545_v51  ;;  %v551_v56 = vmul.f32 %v550_v53, %v2114_v5 }
  0xb3   :  { %vm2197_vm1 = vmand %vm510_vm0, %vm512_vm11  ;;  %v546_v58 = vmul.f32 %v544_v44, %v2106_v1  ;;  %v552_v59 = vmul.f32 %v550_v53, %v2123_v14  ;;  %v567_v61 = vstv %s2152_s5  ;;  %v570_v62 = vstv %s2161_s6 }
  0xb4   :  { %v516_v63 = vsel %vm2197_vm1, %v482_v40, %v504_v12  ;;  %v553_v0 = vadd.f32 %v551_v56, %v548_v55  ;;  %v568_v2 = vmul.f32 %v567_v61, %v2100_v60  ;;  %v573_v3 = vstv %s2165_s7 }
  0xb5   :  { %v1681_v4 = vpop.eup %1680  ;;  %518 = vst [vmem:[#allocation2 + $0x8] sm:$0xff] %v516_v63  ;;  %v549_v9 = vadd.f32 %v547_v34, %v546_v58  ;;  %v574_v13 = vmul.f32 %v573_v3, %v2114_v5  ;;  %v569_v15 = vmul.f32 %v567_v61, %v2106_v1  ;;  %v575_v16 = vmul.f32 %v573_v3, %v2123_v14 }
  0xb6   :  { %v533_v18 = vmul.f32 %v1681_v4, %v531_v39  ;;  %v555_v19 = vmul.f32 %v1681_v4, %v553_v0  ;;  %v571_v20 = vadd.f32 %v570_v62, %v568_v2 }
  0xb7   :  { %v554_v22 = vadd.f32 %v552_v59, %v549_v9  ;;  %v572_v23 = vadd.f32 %v570_v62, %v569_v15 }
  0xb8   :  { %v1683_v24 = vpop.eup %1682  ;;  %v537_v60 = vsel %vm2182_vm13, %v533_v18, %v535_v6  ;;  %v560_v28 = vsel %vm2182_vm13, %v555_v19, %v558_v7  ;;  %v576_v31 = vadd.f32 %v574_v13, %v571_v20 }
  0xb9   :  { %539 = vst [vmem:[#allocation8] sm:$0xff] %v537_v60  ;;  %v534_v5 = vmul.f32 %v1683_v24, %v532_v54  ;;  %v556_v1 = vmul.f32 %v1683_v24, %v554_v22  ;;  %v577_v14 = vadd.f32 %v575_v16, %v572_v23 }
  0xba   :  { %562 = vst [vmem:[#allocation8 + $0x10] sm:$0xff] %v560_v28  ;;  %v578_v33 = vmul.f32 %v1681_v4, %v576_v31 }
  0xbb   :  { %v538_v36 = vsel %vm2197_vm1, %v534_v5, %v536_v26  ;;  %v561_v37 = vsel %vm2197_vm1, %v556_v1, %v559_v29  ;;  %v579_v12 = vmul.f32 %v1683_v24, %v577_v14 }
  0xbc   :  { %540 = vst [vmem:[#allocation8 + $0x8] sm:$0xff] %v538_v36  ;;  %v583_v38 = vsel %vm2182_vm13, %v578_v33, %v581_v32 }
  0xbd   :  { %563 = vst [vmem:[#allocation8 + $0x18] sm:$0xff] %v561_v37  ;;  %v584_v40 = vsel %vm2197_vm1, %v579_v12, %v582_v35 }
  0xbe   :  { %585 = vst [vmem:[#allocation8 + $0x20] sm:$0xff] %v583_v38 }
  0xbf   :  { %586 = vst [vmem:[#allocation8 + $0x28] sm:$0xff] %v584_v40 }
  0xc0 PF:  { %s1540_s8 = sld [smem:[#allocation3 + $0x603]] }
  0xc1   :  { %s1541_s9 = sld [smem:[#allocation3 + $0x683]] }
  0xc2   :  { %s1542_s10 = sld [smem:[#allocation3 + $0x703]] }
  0xc3   :  { %s1543_s11 = sld [smem:[#allocation3 + $0x783]] }
  0xc6   :  { %p588_p13 = scmp.lt.f32.partialorder %s1540_s8, 128.0 }
  0xc7   :  { %p590_p0 = scmp.gt.f32.partialorder %s1541_s9, 0.0 }
  0xc8   :  { %p594_p2 = scmp.lt.f32.partialorder %s1542_s10, 16.0 }
  0xc9   :  { %p591_p1 = pnand %p590_p0, %p588_p13  ;;  %p598_p5 = scmp.gt.f32.partialorder %s1543_s11, 0.0 }
  0xcb   :  { %p592_p3 = pneg %p591_p1 }
  0xcd   :  { %p595_p4 = pnand %p594_p2, %p592_p3 }
  0xcf   :  { %p596_p6 = pneg %p595_p4 }
  0xd1   :  { %p599_p7 = pnand %p598_p5, %p596_p6 }
  0xd2   :  { %s1544_s12 = sld [smem:[#allocation3 + $0x3]] (!%p599_p7) }
  0xd3   :  { %602 = sbr.rel (%p599_p7) target bundleno = 252 (0xfc), region = 33  ;;  %s1545_s13 = sld [smem:[#allocation3 + $0x83]] (!%p599_p7) }
  0xd4   :  { %s1546_s14 = sld [smem:[#allocation3 + $0x103]] (!%p599_p7) }
  0xd5   :  { %s1547_s15 = sld [smem:[#allocation3 + $0x183]] (!%p599_p7) }
  0xd6   :  { %s1548_s18 = sld [smem:[#allocation3 + $0x203]] (!%p599_p7) }
  0xd7   :  { %s2224_s0 = sld [smem:[#allocation3 + $0x283]] (!%p599_p7) }
  0xd8   :  { %v604_v41 = vstv %s1544_s12  ;;  %s2226_s1 = sld [smem:[#allocation3 + $0x403]]  ;;  %v675_v6 = vld [vmem:[#allocation2] sm:$0xff]  ;;  %v676_v60 = vld [vmem:[#allocation2 + $0x8] sm:$0xff] }
  0xd9   :  { %v605_v42 = vmul.f32 %v604_v41, %v1792_v8  ;;  %v607_v21 = vstv %s1545_s13  ;;  %s1551_s19 = sld [smem:[#allocation3 + $0x303]] }
  0xda   :  { %v608_v17 = vmul.f32 %v607_v21, %v1794_v10  ;;  %s2230_s20 = sld [smem:[#allocation3 + $0x383]]  ;;  %v609_v43 = vmul.f32 %v607_v21, %v1796_v11  ;;  %v613_v27 = vstv %s1546_s14 }
  0xdb   :  { %v617_v44 = vstv %s1547_s15  ;;  %s2233_s21 = sld [smem:[#allocation3 + $0x583]] }
  0xdc   :  { %v610_v45 = vadd.f32 %v608_v17, %v605_v42  ;;  %v618_v46 = vmul.f32 %v617_v44, %v1792_v8  ;;  %v620_v47 = vstv %s1548_s18  ;;  %s2236_s22 = sld [smem:[#allocation3 + $0x483]]  ;;  %v611_v25 = vadd.f32 %v609_v43, %v605_v42 }
  0xdd   :  { %v621_v48 = vmul.f32 %v620_v47, %v1794_v10  ;;  %s2239_s23 = sld [smem:[#allocation3 + $0x503]]  ;;  %v622_v49 = vmul.f32 %v620_v47, %v1796_v11  ;;  %v626_v51 = vstv %s2224_s0 }
  0xde   :  { %v2242_v50 = vadd.f32 %v613_v27, %v610_v45  ;;  %v646_v34 = vstv %s2226_s1  ;;  %s2246_s24 = sld [smem:[#allocation6 + $0x3]]  ;;  %v2248_v39 = vadd.f32 %v613_v27, %v611_v25 }
  0xdf   :  { %v623_v30 = vadd.f32 %v621_v48, %v618_v46  ;;  %v643_v52 = vstv %s1551_s19  ;;  %v624_v53 = vadd.f32 %v622_v49, %v618_v46  ;;  %s2250_s25 = sld [smem:[#allocation6 + $0x183]] }
  0xe0   :  { %v644_v54 = vmul.f32 %v643_v52, %v2242_v50  ;;  %v650_v55 = vstv %s2230_s20  ;;  %s2254_s26 = sld [smem:[#allocation6 + $0x303]]  ;;  %vm629_vm2 = vcmp.ge.f32.partialorder %v2242_v50, 0.0  ;;  %vm630_vm3 = vcmp.ge.f32.partialorder %v2248_v39, 0.0 }
  0xe1   :  { %v2256_v56 = vadd.f32 %v626_v51, %v623_v30  ;;  %v645_v57 = vmul.f32 %v643_v52, %v2248_v39  ;;  %s2261_s27 = sld [smem:[#allocation6 + $0x83]]  ;;  %v660_v61 = vstv %s2233_s21  ;;  %v2265_v62 = vadd.f32 %v626_v51, %v624_v53 }
  0xe2   :  { %v647_v58 = vadd.f32 %v646_v34, %v644_v54  ;;  %v657_v59 = vstv %s2236_s22  ;;  %s2280_s28 = sld [smem:[#allocation6 + $0x383]] }
  0xe3   :  { %vm631_vm4 = vcmp.ge.f32.partialorder %v2256_v56, 0.0  ;;  %v635_v63 = vadd.f32 %v2256_v56, %v2242_v50  ;;  %v651_v0 = vmul.f32 %v650_v55, %v2256_v56  ;;  %v658_v2 = vmul.f32 %v657_v59, %v2242_v50  ;;  %s2283_s29 = sld [smem:[#allocation6 + $0x203]] }
  0xe4   :  { %vm2272_vm5 = vmand %vm629_vm2, %vm631_vm4  ;;  %v664_v4 = vstv %s2239_s23  ;;  %vm632_vm6 = vcmp.ge.f32.partialorder %v2265_v62, 0.0  ;;  %v636_v7 = vadd.f32 %v2265_v62, %v2248_v39  ;;  %v648_v9 = vadd.f32 %v646_v34, %v645_v57  ;;  %s2294_s30 = sld [smem:[#allocation6 + $0x103]]  ;;  %v707_v57 = vld [vmem:[#allocation8] sm:$0xff] }
  0xe5   :  { %vm637_vm7 = vcmp.le.f32.partialorder %v635_v63, 1.0  ;;  %v653_v13 = vadd.f32 %v651_v0, %v647_v58  ;;  %v661_v15 = vadd.f32 %v660_v61, %v658_v2  ;;  %v665_v16 = vmul.f32 %v664_v4, %v2256_v56  ;;  %vm2287_vm8 = vmand %vm630_vm3, %vm632_vm6  ;;  %s2303_s3 = sld [smem:[#allocation6 + $0x403]]  ;;  %v730_v58 = vld [vmem:[#allocation8 + $0x10] sm:$0xff] }
  0xe6   :  { %vm638_vm9 = vcmp.le.f32.partialorder %v636_v7, 1.0  ;;  %v652_v19 = vmul.f32 %v650_v55, %v2265_v62  ;;  %v659_v20 = vmul.f32 %v657_v59, %v2248_v39  ;;  %v666_v22 = vmul.f32 %v664_v4, %v2265_v62  ;;  %vm2298_vm10 = vmand %vm2272_vm5, %vm637_vm7  ;;  %s2307_s4 = sld [smem:[#allocation6 + $0x283]] }
  0xe7   :  { %v667_v24 = vadd.f32 %v665_v16, %v661_v15  ;;  %vm679_vm11 = vcmp.ge.f32.partialorder %v653_v13, -1.0  ;;  %vm683_vm12 = vcmp.lt.f32.partialorder %v653_v13, %v675_v6  ;;  %v694_v26 = vstv %s2246_s24  ;;  %vm2312_vm14 = vmand %vm2287_vm8, %vm638_vm9  ;;  %v731_v16 = vld [vmem:[#allocation8 + $0x18] sm:$0xff] }
  0xe8   :  { %v654_v28 = vadd.f32 %v652_v19, %v648_v9  ;;  %v662_v29 = vadd.f32 %v660_v61, %v659_v20  ;;  %v695_v31 = vmul.f32 %v694_v26, %v2242_v50  ;;  %v697_v5 = vstv %s2254_s26  ;;  %v753_v19 = vld [vmem:[#allocation8 + $0x20] sm:$0xff] }
  0xe9   :  { %vm669_vm13 = vcmp.gt.f32.partialorder %v667_v24, 1e-12  ;;  %v700_v32 = vstv %s2250_s25  ;;  %v696_v14 = vmul.f32 %v694_v26, %v2248_v39  ;;  %v716_v33 = vstv %s2261_s27 }
  0xea   :  { %v671_v35 = vsel %vm669_vm13, %v667_v24, 1.0  ;;  %vm677_vm15 = vmand %vm2298_vm10, %vm669_vm13  ;;  %v668_v36 = vadd.f32 %v666_v22, %v662_v29  ;;  %vm680_vm0 = vcmp.ge.f32.partialorder %v654_v28, -1.0  ;;  %vm684_vm1 = vcmp.lt.f32.partialorder %v654_v28, %v676_v60  ;;  %v754_v22 = vld [vmem:[#allocation8 + $0x28] sm:$0xff] }
  0xeb   :  { %1684 = vrcp.f32 %v671_v35  ;;  %vm681_vm2 = vmand %vm677_vm15, %vm679_vm11  ;;  %v698_v37 = vadd.f32 %v697_v5, %v695_v31  ;;  %v701_v12 = vmul.f32 %v700_v32, %v2256_v56  ;;  %v699_v38 = vadd.f32 %v697_v5, %v696_v14 }
  0xec   :  { %vm2324_vm3 = vmand %vm681_vm2, %vm683_vm12  ;;  %vm670_vm4 = vcmp.gt.f32.partialorder %v668_v36, 1e-12  ;;  %v702_v41 = vmul.f32 %v700_v32, %v2265_v62  ;;  %v717_v42 = vmul.f32 %v716_v33, %v2242_v50  ;;  %v719_v21 = vstv %s2280_s28 }
  0xed   :  { %v687_v17 = vsel %vm2324_vm3, %v653_v13, %v675_v6  ;;  %v672_v43 = vsel %vm670_vm4, %v668_v36, 1.0  ;;  %vm678_vm5 = vmand %vm2312_vm14, %vm670_vm4  ;;  %v703_v27 = vadd.f32 %v701_v12, %v698_v37  ;;  %v722_v44 = vstv %s2283_s29  ;;  %v708_v13 = vld [vmem:[#allocation8 + $0x8] sm:$0xff] }
  0xee   :  { %689 = vst [vmem:[#allocation2] sm:$0xff] %v687_v17  ;;  %1686 = vrcp.f32 %v672_v43  ;;  %vm682_vm6 = vmand %vm678_vm5, %vm680_vm0  ;;  %v704_v45 = vadd.f32 %v702_v41, %v699_v38  ;;  %v720_v46 = vadd.f32 %v719_v21, %v717_v42  ;;  %v723_v47 = vmul.f32 %v722_v44, %v2256_v56 }
  0xef   :  { %vm2339_vm7 = vmand %vm682_vm6, %vm684_vm1  ;;  %v718_v48 = vmul.f32 %v716_v33, %v2248_v39  ;;  %v724_v49 = vmul.f32 %v722_v44, %v2265_v62  ;;  %v739_v51 = vstv %s2294_s30  ;;  %v742_v34 = vstv %s2303_s3 }
  0xf0   :  { %v688_v30 = vsel %vm2339_vm7, %v654_v28, %v676_v60  ;;  %v725_v52 = vadd.f32 %v723_v47, %v720_v46  ;;  %v740_v53 = vmul.f32 %v739_v51, %v2242_v50  ;;  %v745_v54 = vstv %s2307_s4 }
  0xf1   :  { %v1685_v55 = vpop.eup %1684  ;;  %690 = vst [vmem:[#allocation2 + $0x8] sm:$0xff] %v688_v30  ;;  %v721_v59 = vadd.f32 %v719_v21, %v718_v48  ;;  %v746_v61 = vmul.f32 %v745_v54, %v2256_v56  ;;  %v741_v63 = vmul.f32 %v739_v51, %v2248_v39  ;;  %v747_v0 = vmul.f32 %v745_v54, %v2265_v62 }
  0xf2   :  { %v705_v2 = vmul.f32 %v1685_v55, %v703_v27  ;;  %v727_v3 = vmul.f32 %v1685_v55, %v725_v52  ;;  %v743_v4 = vadd.f32 %v742_v34, %v740_v53 }
  0xf3   :  { %v726_v6 = vadd.f32 %v724_v49, %v721_v59  ;;  %v744_v7 = vadd.f32 %v742_v34, %v741_v63 }
  0xf4   :  { %v1687_v9 = vpop.eup %1686  ;;  %v709_v50 = vsel %vm2324_vm3, %v705_v2, %v707_v57  ;;  %v732_v15 = vsel %vm2324_vm3, %v727_v3, %v730_v58  ;;  %v748_v18 = vadd.f32 %v746_v61, %v743_v4 }
  0xf5   :  { %711 = vst [vmem:[#allocation8] sm:$0xff] %v709_v50  ;;  %v706_v56 = vmul.f32 %v1687_v9, %v704_v45  ;;  %v728_v39 = vmul.f32 %v1687_v9, %v726_v6  ;;  %v749_v62 = vadd.f32 %v747_v0, %v744_v7 }
  0xf6   :  { %734 = vst [vmem:[#allocation8 + $0x10] sm:$0xff] %v732_v15  ;;  %v750_v20 = vmul.f32 %v1685_v55, %v748_v18 }
  0xf7   :  { %v710_v23 = vsel %vm2339_vm7, %v706_v56, %v708_v13  ;;  %v733_v24 = vsel %vm2339_vm7, %v728_v39, %v731_v16  ;;  %v751_v60 = vmul.f32 %v1687_v9, %v749_v62 }
  0xf8   :  { %712 = vst [vmem:[#allocation8 + $0x8] sm:$0xff] %v710_v23  ;;  %v755_v26 = vsel %vm2324_vm3, %v750_v20, %v753_v19 }
  0xf9   :  { %735 = vst [vmem:[#allocation8 + $0x18] sm:$0xff] %v733_v24  ;;  %v756_v28 = vsel %vm2339_vm7, %v751_v60, %v754_v22 }
  0xfa   :  { %757 = vst [vmem:[#allocation8 + $0x20] sm:$0xff] %v755_v26 }
  0xfb   :  { %758 = vst [vmem:[#allocation8 + $0x28] sm:$0xff] %v756_v28 }
  0xfc PF:  { %s1565_s5 = sld [smem:[#allocation3 + $0x604]] }
  0xfd   :  { %s1566_s6 = sld [smem:[#allocation3 + $0x684]] }
  0xfe   :  { %s1567_s7 = sld [smem:[#allocation3 + $0x704]] }
  0xff   :  { %s1568_s8 = sld [smem:[#allocation3 + $0x784]] }
 0x102   :  { %p760_p8 = scmp.lt.f32.partialorder %s1565_s5, 128.0 }
 0x103   :  { %p762_p9 = scmp.gt.f32.partialorder %s1566_s6, 0.0 }
 0x104   :  { %p766_p11 = scmp.lt.f32.partialorder %s1567_s7, 16.0 }
 0x105   :  { %p763_p10 = pnand %p762_p9, %p760_p8  ;;  %p770_p0 = scmp.gt.f32.partialorder %s1568_s8, 0.0 }
 0x107   :  { %p764_p12 = pneg %p763_p10 }
 0x109   :  { %p767_p13 = pnand %p766_p11, %p764_p12 }
 0x10b   :  { %p768_p1 = pneg %p767_p13 }
 0x10d   :  { %p771_p2 = pnand %p770_p0, %p768_p1 }
 0x10e   :  { %s1569_s9 = sld [smem:[#allocation3 + $0x4]] (!%p771_p2) }
 0x10f   :  { %774 = sbr.rel (%p771_p2) target bundleno = 312 (0x138), region = 37  ;;  %s1570_s10 = sld [smem:[#allocation3 + $0x84]] (!%p771_p2) }
 0x110   :  { %s1571_s11 = sld [smem:[#allocation3 + $0x104]] (!%p771_p2) }
 0x111   :  { %s1572_s12 = sld [smem:[#allocation3 + $0x184]] (!%p771_p2) }
 0x112   :  { %s1573_s13 = sld [smem:[#allocation3 + $0x204]] (!%p771_p2) }
 0x113   :  { %s2366_s14 = sld [smem:[#allocation3 + $0x284]] (!%p771_p2) }
 0x114   :  { %v776_v29 = vstv %s1569_s9  ;;  %s2368_s15 = sld [smem:[#allocation3 + $0x404]]  ;;  %v847_v57 = vld [vmem:[#allocation2] sm:$0xff]  ;;  %v848_v50 = vld [vmem:[#allocation2 + $0x8] sm:$0xff] }
 0x115   :  { %v777_v31 = vmul.f32 %v776_v29, %v1792_v8  ;;  %v779_v5 = vstv %s1570_s10  ;;  %s1576_s18 = sld [smem:[#allocation3 + $0x304]] }
 0x116   :  { %v780_v1 = vmul.f32 %v779_v5, %v1794_v10  ;;  %s2372_s0 = sld [smem:[#allocation3 + $0x384]]  ;;  %v781_v32 = vmul.f32 %v779_v5, %v1796_v11  ;;  %v785_v14 = vstv %s1571_s11 }
 0x117   :  { %v789_v33 = vstv %s1572_s12  ;;  %s2375_s1 = sld [smem:[#allocation3 + $0x584]] }
 0x118   :  { %v782_v35 = vadd.f32 %v780_v1, %v777_v31  ;;  %v790_v36 = vmul.f32 %v789_v33, %v1792_v8  ;;  %v792_v37 = vstv %s1573_s13  ;;  %s2378_s19 = sld [smem:[#allocation3 + $0x484]]  ;;  %v783_v12 = vadd.f32 %v781_v32, %v777_v31 }
 0x119   :  { %v793_v38 = vmul.f32 %v792_v37, %v1794_v10  ;;  %s2381_s20 = sld [smem:[#allocation3 + $0x504]]  ;;  %v794_v40 = vmul.f32 %v792_v37, %v1796_v11  ;;  %v798_v42 = vstv %s2366_s14 }
 0x11a   :  { %v2384_v41 = vadd.f32 %v785_v14, %v782_v35  ;;  %v818_v21 = vstv %s2368_s15  ;;  %s2388_s21 = sld [smem:[#allocation6 + $0x4]]  ;;  %v2390_v27 = vadd.f32 %v785_v14, %v783_v12 }
 0x11b   :  { %v795_v17 = vadd.f32 %v793_v38, %v790_v36  ;;  %v815_v43 = vstv %s1576_s18  ;;  %v796_v44 = vadd.f32 %v794_v40, %v790_v36  ;;  %s2392_s22 = sld [smem:[#allocation6 + $0x184]] }
 0x11c   :  { %v816_v45 = vmul.f32 %v815_v43, %v2384_v41  ;;  %v822_v46 = vstv %s2372_s0  ;;  %s2396_s23 = sld [smem:[#allocation6 + $0x304]]  ;;  %vm801_vm8 = vcmp.ge.f32.partialorder %v2384_v41, 0.0  ;;  %vm802_vm9 = vcmp.ge.f32.partialorder %v2390_v27, 0.0 }
 0x11d   :  { %v2398_v47 = vadd.f32 %v798_v42, %v795_v17  ;;  %v817_v25 = vmul.f32 %v815_v43, %v2390_v27  ;;  %s2403_s24 = sld [smem:[#allocation6 + $0x84]]  ;;  %v832_v51 = vstv %s2375_s1  ;;  %v2407_v34 = vadd.f32 %v798_v42, %v796_v44 }
 0x11e   :  { %v819_v48 = vadd.f32 %v818_v21, %v816_v45  ;;  %v829_v49 = vstv %s2378_s19  ;;  %s2422_s25 = sld [smem:[#allocation6 + $0x384]] }
 0x11f   :  { %vm803_vm10 = vcmp.ge.f32.partialorder %v2398_v47, 0.0  ;;  %v807_v30 = vadd.f32 %v2398_v47, %v2384_v41  ;;  %v823_v52 = vmul.f32 %v822_v46, %v2398_v47  ;;  %v830_v53 = vmul.f32 %v829_v49, %v2384_v41  ;;  %s2425_s26 = sld [smem:[#allocation6 + $0x204]] }
 0x120   :  { %vm2414_vm11 = vmand %vm801_vm8, %vm803_vm10  ;;  %v836_v55 = vstv %s2381_s20  ;;  %vm804_vm12 = vcmp.ge.f32.partialorder %v2407_v34, 0.0  ;;  %v808_v58 = vadd.f32 %v2407_v34, %v2390_v27  ;;  %v820_v59 = vadd.f32 %v818_v21, %v817_v25  ;;  %s2436_s27 = sld [smem:[#allocation6 + $0x104]]  ;;  %v879_v25 = vld [vmem:[#allocation8] sm:$0xff] }
 0x121   :  { %vm809_vm13 = vcmp.le.f32.partialorder %v807_v30, 1.0  ;;  %v825_v61 = vadd.f32 %v823_v52, %v819_v48  ;;  %v833_v63 = vadd.f32 %v832_v51, %v830_v53  ;;  %v837_v0 = vmul.f32 %v836_v55, %v2398_v47  ;;  %vm2429_vm14 = vmand %vm802_vm9, %vm804_vm12  ;;  %s2445_s28 = sld [smem:[#allocation6 + $0x404]]  ;;  %v902_v48 = vld [vmem:[#allocation8 + $0x10] sm:$0xff] }
 0x122   :  { %vm810_vm15 = vcmp.le.f32.partialorder %v808_v58, 1.0  ;;  %v824_v3 = vmul.f32 %v822_v46, %v2407_v34  ;;  %v831_v4 = vmul.f32 %v829_v49, %v2390_v27  ;;  %v838_v6 = vmul.f32 %v836_v55, %v2407_v34  ;;  %vm2440_vm0 = vmand %vm2414_vm11, %vm809_vm13  ;;  %s2449_s29 = sld [smem:[#allocation6 + $0x284]] }
 0x123   :  { %v839_v9 = vadd.f32 %v837_v0, %v833_v63  ;;  %vm851_vm1 = vcmp.ge.f32.partialorder %v825_v61, -1.0  ;;  %vm855_vm2 = vcmp.lt.f32.partialorder %v825_v61, %v847_v57  ;;  %v866_v13 = vstv %s2388_s21  ;;  %vm2454_vm4 = vmand %vm2429_vm14, %vm810_vm15  ;;  %v903_v0 = vld [vmem:[#allocation8 + $0x18] sm:$0xff] }
 0x124   :  { %v826_v15 = vadd.f32 %v824_v3, %v820_v59  ;;  %v834_v16 = vadd.f32 %v832_v51, %v831_v4  ;;  %v867_v18 = vmul.f32 %v866_v13, %v2384_v41  ;;  %v869_v56 = vstv %s2396_s23  ;;  %v925_v3 = vld [vmem:[#allocation8 + $0x20] sm:$0xff] }
 0x125   :  { %vm841_vm3 = vcmp.gt.f32.partialorder %v839_v9, 1e-12  ;;  %v872_v19 = vstv %s2392_s22  ;;  %v868_v62 = vmul.f32 %v866_v13, %v2390_v27  ;;  %v888_v20 = vstv %s2403_s24 }
 0x126   :  { %v843_v22 = vsel %vm841_vm3, %v839_v9, 1.0  ;;  %vm849_vm5 = vmand %vm2440_vm0, %vm841_vm3  ;;  %v840_v23 = vadd.f32 %v838_v6, %v834_v16  ;;  %vm852_vm6 = vcmp.ge.f32.partialorder %v826_v15, -1.0  ;;  %vm856_vm7 = vcmp.lt.f32.partialorder %v826_v15, %v848_v50  ;;  %v926_v6 = vld [vmem:[#allocation8 + $0x28] sm:$0xff] }
 0x127   :  { %1688 = vrcp.f32 %v843_v22  ;;  %vm853_vm8 = vmand %vm849_vm5, %vm851_vm1  ;;  %v870_v24 = vadd.f32 %v869_v56, %v867_v18  ;;  %v873_v60 = vmul.f32 %v872_v19, %v2398_v47  ;;  %v871_v26 = vadd.f32 %v869_v56, %v868_v62 }
 0x128   :  { %vm2466_vm9 = vmand %vm853_vm8, %vm855_vm2  ;;  %vm842_vm10 = vcmp.gt.f32.partialorder %v840_v23, 1e-12  ;;  %v874_v29 = vmul.f32 %v872_v19, %v2407_v34  ;;  %v889_v31 = vmul.f32 %v888_v20, %v2384_v41  ;;  %v891_v5 = vstv %s2422_s25 }
 0x129   :  { %v859_v1 = vsel %vm2466_vm9, %v825_v61, %v847_v57  ;;  %v844_v32 = vsel %vm842_vm10, %v840_v23, 1.0  ;;  %vm850_vm11 = vmand %vm2454_vm4, %vm842_vm10  ;;  %v875_v14 = vadd.f32 %v873_v60, %v870_v24  ;;  %v894_v33 = vstv %s2425_s26  ;;  %v880_v61 = vld [vmem:[#allocation8 + $0x8] sm:$0xff] }
 0x12a   :  { %861 = vst [vmem:[#allocation2] sm:$0xff] %v859_v1  ;;  %1690 = vrcp.f32 %v844_v32  ;;  %vm854_vm12 = vmand %vm850_vm11, %vm852_vm6  ;;  %v876_v35 = vadd.f32 %v874_v29, %v871_v26  ;;  %v892_v36 = vadd.f32 %v891_v5, %v889_v31  ;;  %v895_v37 = vmul.f32 %v894_v33, %v2398_v47 }
 0x12b   :  { %vm2481_vm13 = vmand %vm854_vm12, %vm856_vm7  ;;  %v890_v38 = vmul.f32 %v888_v20, %v2390_v27  ;;  %v896_v40 = vmul.f32 %v894_v33, %v2407_v34  ;;  %v911_v42 = vstv %s2436_s27  ;;  %v914_v21 = vstv %s2445_s28 }
 0x12c   :  { %v860_v17 = vsel %vm2481_vm13, %v826_v15, %v848_v50  ;;  %v897_v43 = vadd.f32 %v895_v37, %v892_v36  ;;  %v912_v44 = vmul.f32 %v911_v42, %v2384_v41  ;;  %v917_v45 = vstv %s2449_s29 }
 0x12d   :  { %v1689_v46 = vpop.eup %1688  ;;  %862 = vst [vmem:[#allocation2 + $0x8] sm:$0xff] %v860_v17  ;;  %v893_v49 = vadd.f32 %v891_v5, %v890_v38  ;;  %v918_v51 = vmul.f32 %v917_v45, %v2398_v47  ;;  %v913_v30 = vmul.f32 %v911_v42, %v2390_v27  ;;  %v919_v52 = vmul.f32 %v917_v45, %v2407_v34 }
 0x12e   :  { %v877_v53 = vmul.f32 %v1689_v46, %v875_v14  ;;  %v899_v54 = vmul.f32 %v1689_v46, %v897_v43  ;;  %v915_v55 = vadd.f32 %v914_v21, %v912_v44 }
 0x12f   :  { %v898_v57 = vadd.f32 %v896_v40, %v893_v49  ;;  %v916_v58 = vadd.f32 %v914_v21, %v913_v30 }
 0x130   :  { %v1691_v59 = vpop.eup %1690  ;;  %v881_v41 = vsel %vm2466_vm9, %v877_v53, %v879_v25  ;;  %v904_v63 = vsel %vm2466_vm9, %v899_v54, %v902_v48  ;;  %v920_v2 = vadd.f32 %v918_v51, %v915_v55 }
 0x131   :  { %883 = vst [vmem:[#allocation8] sm:$0xff] %v881_v41  ;;  %v878_v47 = vmul.f32 %v1691_v59, %v876_v35  ;;  %v900_v27 = vmul.f32 %v1691_v59, %v898_v57  ;;  %v921_v34 = vadd.f32 %v919_v52, %v916_v58 }
 0x132   :  { %906 = vst [vmem:[#allocation8 + $0x10] sm:$0xff] %v904_v63  ;;  %v922_v4 = vmul.f32 %v1689_v46, %v920_v2 }
 0x133   :  { %v882_v7 = vsel %vm2481_vm13, %v878_v47, %v880_v61  ;;  %v905_v9 = vsel %vm2481_vm13, %v900_v27, %v903_v0  ;;  %v923_v50 = vmul.f32 %v1691_v59, %v921_v34 }
 0x134   :  { %884 = vst [vmem:[#allocation8 + $0x8] sm:$0xff] %v882_v7  ;;  %v927_v13 = vsel %vm2466_vm9, %v922_v4, %v925_v3 }
 0x135   :  { %907 = vst [vmem:[#allocation8 + $0x18] sm:$0xff] %v905_v9  ;;  %v928_v15 = vsel %vm2481_vm13, %v923_v50, %v926_v6 }
 0x136   :  { %929 = vst [vmem:[#allocation8 + $0x20] sm:$0xff] %v927_v13 }
 0x137   :  { %930 = vst [vmem:[#allocation8 + $0x28] sm:$0xff] %v928_v15 }
 0x138 PF:  { %s1590_s30 = sld [smem:[#allocation3 + $0x605]] }
 0x139   :  { %s1591_s3 = sld [smem:[#allocation3 + $0x685]] }
 0x13a   :  { %s1592_s4 = sld [smem:[#allocation3 + $0x705]] }
 0x13b   :  { %s1593_s5 = sld [smem:[#allocation3 + $0x785]] }
 0x13e   :  { %p932_p3 = scmp.lt.f32.partialorder %s1590_s30, 128.0 }
 0x13f   :  { %p934_p4 = scmp.gt.f32.partialorder %s1591_s3, 0.0 }
 0x140   :  { %p938_p6 = scmp.lt.f32.partialorder %s1592_s4, 16.0 }
 0x141   :  { %p935_p5 = pnand %p934_p4, %p932_p3  ;;  %p942_p9 = scmp.gt.f32.partialorder %s1593_s5, 0.0 }
 0x143   :  { %p936_p7 = pneg %p935_p5 }
 0x145   :  { %p939_p8 = pnand %p938_p6, %p936_p7 }
 0x147   :  { %p940_p10 = pneg %p939_p8 }
 0x149   :  { %p943_p11 = pnand %p942_p9, %p940_p10 }
 0x14a   :  { %s1594_s6 = sld [smem:[#allocation3 + $0x5]] (!%p943_p11) }
 0x14b   :  { %946 = sbr.rel (%p943_p11) target bundleno = 372 (0x174), region = 41  ;;  %s1595_s7 = sld [smem:[#allocation3 + $0x85]] (!%p943_p11) }
 0x14c   :  { %s1596_s8 = sld [smem:[#allocation3 + $0x105]] (!%p943_p11) }
 0x14d   :  { %s1597_s9 = sld [smem:[#allocation3 + $0x185]] (!%p943_p11) }
 0x14e   :  { %s1598_s10 = sld [smem:[#allocation3 + $0x205]] (!%p943_p11) }
 0x14f   :  { %s2508_s11 = sld [smem:[#allocation3 + $0x285]] (!%p943_p11) }
 0x150   :  { %v948_v16 = vstv %s1594_s6  ;;  %s2510_s12 = sld [smem:[#allocation3 + $0x405]]  ;;  %v1019_v25 = vld [vmem:[#allocation2] sm:$0xff]  ;;  %v1020_v41 = vld [vmem:[#allocation2 + $0x8] sm:$0xff] }
 0x151   :  { %v949_v18 = vmul.f32 %v948_v16, %v1792_v8  ;;  %v951_v56 = vstv %s1595_s7  ;;  %s1601_s13 = sld [smem:[#allocation3 + $0x305]] }
 0x152   :  { %v952_v39 = vmul.f32 %v951_v56, %v1794_v10  ;;  %s2514_s14 = sld [smem:[#allocation3 + $0x385]]  ;;  %v953_v19 = vmul.f32 %v951_v56, %v1796_v11  ;;  %v957_v62 = vstv %s1596_s8 }
 0x153   :  { %v961_v20 = vstv %s1597_s9  ;;  %s2517_s15 = sld [smem:[#allocation3 + $0x585]] }
 0x154   :  { %v954_v22 = vadd.f32 %v952_v39, %v949_v18  ;;  %v962_v23 = vmul.f32 %v961_v20, %v1792_v8  ;;  %v964_v24 = vstv %s1598_s10  ;;  %s2520_s18 = sld [smem:[#allocation3 + $0x485]]  ;;  %v955_v60 = vadd.f32 %v953_v19, %v949_v18 }
 0x155   :  { %v965_v26 = vmul.f32 %v964_v24, %v1794_v10  ;;  %s2523_s0 = sld [smem:[#allocation3 + $0x505]]  ;;  %v966_v28 = vmul.f32 %v964_v24, %v1796_v11  ;;  %v970_v31 = vstv %s2508_s11 }
 0x156   :  { %v2526_v29 = vadd.f32 %v957_v62, %v954_v22  ;;  %v990_v5 = vstv %s2510_s12  ;;  %s2530_s1 = sld [smem:[#allocation6 + $0x5]]  ;;  %v2532_v14 = vadd.f32 %v957_v62, %v955_v60 }
 0x157   :  { %v967_v1 = vadd.f32 %v965_v26, %v962_v23  ;;  %v987_v32 = vstv %s1601_s13  ;;  %v968_v33 = vadd.f32 %v966_v28, %v962_v23  ;;  %s2534_s19 = sld [smem:[#allocation6 + $0x185]] }
 0x158   :  { %v988_v35 = vmul.f32 %v987_v32, %v2526_v29  ;;  %v994_v36 = vstv %s2514_s14  ;;  %s2538_s20 = sld [smem:[#allocation6 + $0x305]]  ;;  %vm973_vm14 = vcmp.ge.f32.partialorder %v2526_v29, 0.0  ;;  %vm974_vm15 = vcmp.ge.f32.partialorder %v2532_v14, 0.0 }
 0x159   :  { %v2540_v37 = vadd.f32 %v970_v31, %v967_v1  ;;  %v989_v12 = vmul.f32 %v987_v32, %v2532_v14  ;;  %s2545_s21 = sld [smem:[#allocation6 + $0x85]]  ;;  %v1004_v42 = vstv %s2517_s15  ;;  %v2549_v21 = vadd.f32 %v970_v31, %v968_v33 }
 0x15a   :  { %v991_v38 = vadd.f32 %v990_v5, %v988_v35  ;;  %v1001_v40 = vstv %s2520_s18  ;;  %s2564_s22 = sld [smem:[#allocation6 + $0x385]] }
 0x15b   :  { %vm975_vm0 = vcmp.ge.f32.partialorder %v2540_v37, 0.0  ;;  %v979_v17 = vadd.f32 %v2540_v37, %v2526_v29  ;;  %v995_v43 = vmul.f32 %v994_v36, %v2540_v37  ;;  %v1002_v44 = vmul.f32 %v1001_v40, %v2526_v29  ;;  %s2567_s23 = sld [smem:[#allocation6 + $0x205]] }
 0x15c   :  { %vm2556_vm1 = vmand %vm973_vm14, %vm975_vm0  ;;  %v1008_v46 = vstv %s2523_s0  ;;  %vm976_vm2 = vcmp.ge.f32.partialorder %v2549_v21, 0.0  ;;  %v980_v48 = vadd.f32 %v2549_v21, %v2532_v14  ;;  %v992_v49 = vadd.f32 %v990_v5, %v989_v12  ;;  %s2578_s24 = sld [smem:[#allocation6 + $0x105]]  ;;  %v1051_v12 = vld [vmem:[#allocation8] sm:$0xff] }
 0x15d   :  { %vm981_vm3 = vcmp.le.f32.partialorder %v979_v17, 1.0  ;;  %v997_v51 = vadd.f32 %v995_v43, %v991_v38  ;;  %v1005_v30 = vadd.f32 %v1004_v42, %v1002_v44  ;;  %v1009_v52 = vmul.f32 %v1008_v46, %v2540_v37  ;;  %vm2571_vm4 = vmand %vm974_vm15, %vm976_vm2  ;;  %s2587_s25 = sld [smem:[#allocation6 + $0x405]]  ;;  %v1074_v38 = vld [vmem:[#allocation8 + $0x10] sm:$0xff] }
 0x15e   :  { %vm982_vm5 = vcmp.le.f32.partialorder %v980_v48, 1.0  ;;  %v996_v54 = vmul.f32 %v994_v36, %v2549_v21  ;;  %v1003_v55 = vmul.f32 %v1001_v40, %v2532_v14  ;;  %v1010_v57 = vmul.f32 %v1008_v46, %v2549_v21  ;;  %vm2582_vm6 = vmand %vm2556_vm1, %vm981_vm3  ;;  %s2591_s26 = sld [smem:[#allocation6 + $0x285]] }
 0x15f   :  { %v1011_v59 = vadd.f32 %v1009_v52, %v1005_v30  ;;  %vm1023_vm7 = vcmp.ge.f32.partialorder %v997_v51, -1.0  ;;  %vm1027_vm8 = vcmp.lt.f32.partialorder %v997_v51, %v1019_v25  ;;  %v1038_v61 = vstv %s2530_s1  ;;  %vm2596_vm10 = vmand %vm2571_vm4, %vm982_vm5  ;;  %v1075_v52 = vld [vmem:[#allocation8 + $0x18] sm:$0xff] }
 0x160   :  { %v998_v63 = vadd.f32 %v996_v54, %v992_v49  ;;  %v1006_v0 = vadd.f32 %v1004_v42, %v1003_v55  ;;  %v1039_v2 = vmul.f32 %v1038_v61, %v2526_v29  ;;  %v1041_v47 = vstv %s2538_s20  ;;  %v1097_v54 = vld [vmem:[#allocation8 + $0x20] sm:$0xff] }
 0x161   :  { %vm1013_vm9 = vcmp.gt.f32.partialorder %v1011_v59, 1e-12  ;;  %v1044_v3 = vstv %s2534_s19  ;;  %v1040_v34 = vmul.f32 %v1038_v61, %v2532_v14  ;;  %v1060_v4 = vstv %s2545_s21 }
 0x162   :  { %v1015_v6 = vsel %vm1013_vm9, %v1011_v59, 1.0  ;;  %vm1021_vm11 = vmand %vm2582_vm6, %vm1013_vm9  ;;  %v1012_v7 = vadd.f32 %v1010_v57, %v1006_v0  ;;  %vm1024_vm12 = vcmp.ge.f32.partialorder %v998_v63, -1.0  ;;  %vm1028_vm13 = vcmp.lt.f32.partialorder %v998_v63, %v1020_v41  ;;  %v1098_v57 = vld [vmem:[#allocation8 + $0x28] sm:$0xff] }
 0x163   :  { %1692 = vrcp.f32 %v1015_v6  ;;  %vm1025_vm14 = vmand %vm1021_vm11, %vm1023_vm7  ;;  %v1042_v9 = vadd.f32 %v1041_v47, %v1039_v2  ;;  %v1045_v50 = vmul.f32 %v1044_v3, %v2540_v37  ;;  %v1043_v13 = vadd.f32 %v1041_v47, %v1040_v34 }
 0x164   :  { %vm2608_vm15 = vmand %vm1025_vm14, %vm1027_vm8  ;;  %vm1014_vm0 = vcmp.gt.f32.partialorder %v1012_v7, 1e-12  ;;  %v1046_v16 = vmul.f32 %v1044_v3, %v2549_v21  ;;  %v1061_v18 = vmul.f32 %v1060_v4, %v2526_v29  ;;  %v1063_v56 = vstv %s2564_s22 }
 0x165   :  { %v1031_v39 = vsel %vm2608_vm15, %v997_v51, %v1019_v25  ;;  %v1016_v19 = vsel %vm1014_vm0, %v1012_v7, 1.0  ;;  %vm1022_vm1 = vmand %vm2596_vm10, %vm1014_vm0  ;;  %v1047_v62 = vadd.f32 %v1045_v50, %v1042_v9  ;;  %v1066_v20 = vstv %s2567_s23  ;;  %v1052_v51 = vld [vmem:[#allocation8 + $0x8] sm:$0xff] }
 0x166   :  { %1033 = vst [vmem:[#allocation2] sm:$0xff] %v1031_v39  ;;  %1694 = vrcp.f32 %v1016_v19  ;;  %vm1026_vm2 = vmand %vm1022_vm1, %vm1024_vm12  ;;  %v1048_v22 = vadd.f32 %v1046_v16, %v1043_v13  ;;  %v1064_v23 = vadd.f32 %v1063_v56, %v1061_v18  ;;  %v1067_v24 = vmul.f32 %v1066_v20, %v2540_v37 }
 0x167   :  { %vm2623_vm3 = vmand %vm1026_vm2, %vm1028_vm13  ;;  %v1062_v26 = vmul.f32 %v1060_v4, %v2532_v14  ;;  %v1068_v28 = vmul.f32 %v1066_v20, %v2549_v21  ;;  %v1083_v31 = vstv %s2578_s24  ;;  %v1086_v5 = vstv %s2587_s25 }
 0x168   :  { %v1032_v1 = vsel %vm2623_vm3, %v998_v63, %v1020_v41  ;;  %v1069_v32 = vadd.f32 %v1067_v24, %v1064_v23  ;;  %v1084_v33 = vmul.f32 %v1083_v31, %v2526_v29  ;;  %v1089_v35 = vstv %s2591_s26 }
 0x169   :  { %v1693_v36 = vpop.eup %1692  ;;  %1034 = vst [vmem:[#allocation2 + $0x8] sm:$0xff] %v1032_v1  ;;  %v1065_v40 = vadd.f32 %v1063_v56, %v1062_v26  ;;  %v1090_v42 = vmul.f32 %v1089_v35, %v2540_v37  ;;  %v1085_v17 = vmul.f32 %v1083_v31, %v2532_v14  ;;  %v1091_v43 = vmul.f32 %v1089_v35, %v2549_v21 }
 0x16a   :  { %v1049_v44 = vmul.f32 %v1693_v36, %v1047_v62  ;;  %v1071_v45 = vmul.f32 %v1693_v36, %v1069_v32  ;;  %v1087_v46 = vadd.f32 %v1086_v5, %v1084_v33 }
 0x16b   :  { %v1070_v25 = vadd.f32 %v1068_v28, %v1065_v40  ;;  %v1088_v48 = vadd.f32 %v1086_v5, %v1085_v17 }
 0x16c   :  { %v1695_v49 = vpop.eup %1694  ;;  %v1053_v29 = vsel %vm2608_vm15, %v1049_v44, %v1051_v12  ;;  %v1076_v30 = vsel %vm2608_vm15, %v1071_v45, %v1074_v38  ;;  %v1092_v53 = vadd.f32 %v1090_v42, %v1087_v46 }
 0x16d   :  { %1055 = vst [vmem:[#allocation8] sm:$0xff] %v1053_v29  ;;  %v1050_v37 = vmul.f32 %v1695_v49, %v1048_v22  ;;  %v1072_v14 = vmul.f32 %v1695_v49, %v1070_v25  ;;  %v1093_v21 = vadd.f32 %v1091_v43, %v1088_v48 }
 0x16e   :  { %1078 = vst [vmem:[#allocation8 + $0x10] sm:$0xff] %v1076_v30  ;;  %v1094_v55 = vmul.f32 %v1693_v36, %v1092_v53 }
 0x16f   :  { %v1054_v58 = vsel %vm2623_vm3, %v1050_v37, %v1052_v51  ;;  %v1077_v59 = vsel %vm2623_vm3, %v1072_v14, %v1075_v52  ;;  %v1095_v41 = vmul.f32 %v1695_v49, %v1093_v21 }
 0x170   :  { %1056 = vst [vmem:[#allocation8 + $0x8] sm:$0xff] %v1054_v58  ;;  %v1099_v61 = vsel %vm2608_vm15, %v1094_v55, %v1097_v54 }
 0x171   :  { %1079 = vst [vmem:[#allocation8 + $0x18] sm:$0xff] %v1077_v59  ;;  %v1100_v63 = vsel %vm2623_vm3, %v1095_v41, %v1098_v57 }
 0x172   :  { %1101 = vst [vmem:[#allocation8 + $0x20] sm:$0xff] %v1099_v61 }
 0x173   :  { %1102 = vst [vmem:[#allocation8 + $0x28] sm:$0xff] %v1100_v63 }
 0x174 PF:  { %s1615_s27 = sld [smem:[#allocation3 + $0x606]] }
 0x175   :  { %s1616_s28 = sld [smem:[#allocation3 + $0x686]] }
 0x176   :  { %s1617_s29 = sld [smem:[#allocation3 + $0x706]] }
 0x177   :  { %s1618_s30 = sld [smem:[#allocation3 + $0x786]] }
 0x17a   :  { %p1104_p12 = scmp.lt.f32.partialorder %s1615_s27, 128.0 }
 0x17b   :  { %p1106_p13 = scmp.gt.f32.partialorder %s1616_s28, 0.0 }
 0x17c   :  { %p1110_p1 = scmp.lt.f32.partialorder %s1617_s29, 16.0 }
 0x17d   :  { %p1107_p0 = pnand %p1106_p13, %p1104_p12  ;;  %p1114_p4 = scmp.gt.f32.partialorder %s1618_s30, 0.0 }
 0x17f   :  { %p1108_p2 = pneg %p1107_p0 }
 0x181   :  { %p1111_p3 = pnand %p1110_p1, %p1108_p2 }
 0x183   :  { %p1112_p5 = pneg %p1111_p3 }
 0x185   :  { %p1115_p6 = pnand %p1114_p4, %p1112_p5 }
 0x186   :  { %s1619_s3 = sld [smem:[#allocation3 + $0x6]] (!%p1115_p6) }
 0x187   :  { %1118 = sbr.rel (%p1115_p6) target bundleno = 432 (0x1b0), region = 45  ;;  %s1620_s4 = sld [smem:[#allocation3 + $0x86]] (!%p1115_p6) }
 0x188   :  { %s1621_s5 = sld [smem:[#allocation3 + $0x106]] (!%p1115_p6) }
 0x189   :  { %s1622_s6 = sld [smem:[#allocation3 + $0x186]] (!%p1115_p6) }
 0x18a   :  { %s1623_s7 = sld [smem:[#allocation3 + $0x206]] (!%p1115_p6) }
 0x18b   :  { %s2650_s8 = sld [smem:[#allocation3 + $0x286]] (!%p1115_p6) }
 0x18c   :  { %v1120_v0 = vstv %s1619_s3  ;;  %s2652_s9 = sld [smem:[#allocation3 + $0x406]]  ;;  %v1191_v12 = vld [vmem:[#allocation2] sm:$0xff]  ;;  %v1192_v29 = vld [vmem:[#allocation2 + $0x8] sm:$0xff] }
 0x18d   :  { %v1121_v2 = vmul.f32 %v1120_v0, %v1792_v8  ;;  %v1123_v47 = vstv %s1620_s4  ;;  %s1626_s10 = sld [smem:[#allocation3 + $0x306]] }
 0x18e   :  { %v1124_v27 = vmul.f32 %v1123_v47, %v1794_v10  ;;  %s2656_s11 = sld [smem:[#allocation3 + $0x386]]  ;;  %v1125_v3 = vmul.f32 %v1123_v47, %v1796_v11  ;;  %v1129_v34 = vstv %s1621_s5 }
 0x18f   :  { %v1133_v4 = vstv %s1622_s6  ;;  %s2659_s12 = sld [smem:[#allocation3 + $0x586]] }
 0x190   :  { %v1126_v6 = vadd.f32 %v1124_v27, %v1121_v2  ;;  %v1134_v7 = vmul.f32 %v1133_v4, %v1792_v8  ;;  %v1136_v9 = vstv %s1623_s7  ;;  %s2662_s13 = sld [smem:[#allocation3 + $0x486]]  ;;  %v1127_v50 = vadd.f32 %v1125_v3, %v1121_v2 }
 0x191   :  { %v1137_v13 = vmul.f32 %v1136_v9, %v1794_v10  ;;  %s2665_s14 = sld [smem:[#allocation3 + $0x506]]  ;;  %v1138_v15 = vmul.f32 %v1136_v9, %v1796_v11  ;;  %v1142_v18 = vstv %s2650_s8 }
 0x192   :  { %v2668_v16 = vadd.f32 %v1129_v34, %v1126_v6  ;;  %v1162_v56 = vstv %s2652_s9  ;;  %s2672_s15 = sld [smem:[#allocation6 + $0x6]]  ;;  %v2674_v62 = vadd.f32 %v1129_v34, %v1127_v50 }
 0x193   :  { %v1139_v39 = vadd.f32 %v1137_v13, %v1134_v7  ;;  %v1159_v19 = vstv %s1626_s10  ;;  %v1140_v20 = vadd.f32 %v1138_v15, %v1134_v7  ;;  %s2676_s18 = sld [smem:[#allocation6 + $0x186]] }
 0x194   :  { %v1160_v22 = vmul.f32 %v1159_v19, %v2668_v16  ;;  %v1166_v23 = vstv %s2656_s11  ;;  %s2680_s0 = sld [smem:[#allocation6 + $0x306]]  ;;  %vm1145_vm4 = vcmp.ge.f32.partialorder %v2668_v16, 0.0  ;;  %vm1146_vm5 = vcmp.ge.f32.partialorder %v2674_v62, 0.0 }
 0x195   :  { %v2682_v24 = vadd.f32 %v1142_v18, %v1139_v39  ;;  %v1161_v60 = vmul.f32 %v1159_v19, %v2674_v62  ;;  %s2687_s1 = sld [smem:[#allocation6 + $0x86]]  ;;  %v1176_v31 = vstv %s2659_s12  ;;  %v2691_v5 = vadd.f32 %v1142_v18, %v1140_v20 }
 0x196   :  { %v1163_v26 = vadd.f32 %v1162_v56, %v1160_v22  ;;  %v1173_v28 = vstv %s2662_s13  ;;  %s2706_s19 = sld [smem:[#allocation6 + $0x386]] }
 0x197   :  { %vm1147_vm6 = vcmp.ge.f32.partialorder %v2682_v24, 0.0  ;;  %v1151_v1 = vadd.f32 %v2682_v24, %v2668_v16  ;;  %v1167_v32 = vmul.f32 %v1166_v23, %v2682_v24  ;;  %v1174_v33 = vmul.f32 %v1173_v28, %v2668_v16  ;;  %s2709_s20 = sld [smem:[#allocation6 + $0x206]] }
 0x198   :  { %vm2698_vm7 = vmand %vm1145_vm4, %vm1147_vm6  ;;  %v1180_v36 = vstv %s2665_s14  ;;  %vm1148_vm8 = vcmp.ge.f32.partialorder %v2691_v5, 0.0  ;;  %v1152_v38 = vadd.f32 %v2691_v5, %v2674_v62  ;;  %v1164_v40 = vadd.f32 %v1162_v56, %v1161_v60  ;;  %s2720_s21 = sld [smem:[#allocation6 + $0x106]]  ;;  %v1223_v60 = vld [vmem:[#allocation8] sm:$0xff] }
 0x199   :  { %vm1153_vm9 = vcmp.le.f32.partialorder %v1151_v1, 1.0  ;;  %v1169_v42 = vadd.f32 %v1167_v32, %v1163_v26  ;;  %v1177_v17 = vadd.f32 %v1176_v31, %v1174_v33  ;;  %v1181_v43 = vmul.f32 %v1180_v36, %v2682_v24  ;;  %vm2713_vm10 = vmand %vm1146_vm5, %vm1148_vm8  ;;  %s2729_s22 = sld [smem:[#allocation6 + $0x406]]  ;;  %v1246_v26 = vld [vmem:[#allocation8 + $0x10] sm:$0xff] }
 0x19a   :  { %vm1154_vm11 = vcmp.le.f32.partialorder %v1152_v38, 1.0  ;;  %v1168_v45 = vmul.f32 %v1166_v23, %v2691_v5  ;;  %v1175_v46 = vmul.f32 %v1173_v28, %v2674_v62  ;;  %v1182_v25 = vmul.f32 %v1180_v36, %v2691_v5  ;;  %vm2724_vm12 = vmand %vm2698_vm7, %vm1153_vm9  ;;  %s2733_s23 = sld [smem:[#allocation6 + $0x286]] }
 0x19b   :  { %v1183_v49 = vadd.f32 %v1181_v43, %v1177_v17  ;;  %vm1195_vm13 = vcmp.ge.f32.partialorder %v1169_v42, -1.0  ;;  %vm1199_vm14 = vcmp.lt.f32.partialorder %v1169_v42, %v1191_v12  ;;  %v1210_v51 = vstv %s2672_s15  ;;  %vm2738_vm0 = vmand %vm2713_vm10, %vm1154_vm11  ;;  %v1247_v43 = vld [vmem:[#allocation8 + $0x18] sm:$0xff] }
 0x19c   :  { %v1170_v30 = vadd.f32 %v1168_v45, %v1164_v40  ;;  %v1178_v52 = vadd.f32 %v1176_v31, %v1175_v46  ;;  %v1211_v53 = vmul.f32 %v1210_v51, %v2668_v16  ;;  %v1213_v37 = vstv %s2680_s0  ;;  %v1269_v45 = vld [vmem:[#allocation8 + $0x20] sm:$0xff] }
 0x19d   :  { %vm1185_vm15 = vcmp.gt.f32.partialorder %v1183_v49, 1e-12  ;;  %v1216_v54 = vstv %s2676_s18  ;;  %v1212_v21 = vmul.f32 %v1210_v51, %v2674_v62  ;;  %v1232_v55 = vstv %s2687_s1 }
 0x19e   :  { %v1187_v57 = vsel %vm1185_vm15, %v1183_v49, 1.0  ;;  %vm1193_vm1 = vmand %vm2724_vm12, %vm1185_vm15  ;;  %v1184_v58 = vadd.f32 %v1182_v25, %v1178_v52  ;;  %vm1196_vm2 = vcmp.ge.f32.partialorder %v1170_v30, -1.0  ;;  %vm1200_vm3 = vcmp.lt.f32.partialorder %v1170_v30, %v1192_v29  ;;  %v1270_v25 = vld [vmem:[#allocation8 + $0x28] sm:$0xff] }
 0x19f   :  { %1696 = vrcp.f32 %v1187_v57  ;;  %vm1197_vm4 = vmand %vm1193_vm1, %vm1195_vm13  ;;  %v1214_v59 = vadd.f32 %v1213_v37, %v1211_v53  ;;  %v1217_v41 = vmul.f32 %v1216_v54, %v2682_v24  ;;  %v1215_v61 = vadd.f32 %v1213_v37, %v1212_v21 }
 0x1a0   :  { %vm2750_vm5 = vmand %vm1197_vm4, %vm1199_vm14  ;;  %vm1186_vm6 = vcmp.gt.f32.partialorder %v1184_v58, 1e-12  ;;  %v1218_v0 = vmul.f32 %v1216_v54, %v2691_v5  ;;  %v1233_v2 = vmul.f32 %v1232_v55, %v2668_v16  ;;  %v1235_v47 = vstv %s2706_s19 }
 0x1a1   :  { %v1203_v27 = vsel %vm2750_vm5, %v1169_v42, %v1191_v12  ;;  %v1188_v3 = vsel %vm1186_vm6, %v1184_v58, 1.0  ;;  %vm1194_vm7 = vmand %vm2738_vm0, %vm1186_vm6  ;;  %v1219_v34 = vadd.f32 %v1217_v41, %v1214_v59  ;;  %v1238_v4 = vstv %s2709_s20  ;;  %v1224_v42 = vld [vmem:[#allocation8 + $0x8] sm:$0xff] }
 0x1a2   :  { %1205 = vst [vmem:[#allocation2] sm:$0xff] %v1203_v27  ;;  %1698 = vrcp.f32 %v1188_v3  ;;  %vm1198_vm8 = vmand %vm1194_vm7, %vm1196_vm2  ;;  %v1220_v6 = vadd.f32 %v1218_v0, %v1215_v61  ;;  %v1236_v7 = vadd.f32 %v1235_v47, %v1233_v2  ;;  %v1239_v9 = vmul.f32 %v1238_v4, %v2682_v24 }
 0x1a3   :  { %vm2765_vm9 = vmand %vm1198_vm8, %vm1200_vm3  ;;  %v1234_v13 = vmul.f32 %v1232_v55, %v2674_v62  ;;  %v1240_v15 = vmul.f32 %v1238_v4, %v2691_v5  ;;  %v1255_v18 = vstv %s2720_s21  ;;  %v1258_v56 = vstv %s2729_s22 }
 0x1a4   :  { %v1204_v39 = vsel %vm2765_vm9, %v1170_v30, %v1192_v29  ;;  %v1241_v19 = vadd.f32 %v1239_v9, %v1236_v7  ;;  %v1256_v20 = vmul.f32 %v1255_v18, %v2668_v16  ;;  %v1261_v22 = vstv %s2733_s23 }
 0x1a5   :  { %v1697_v23 = vpop.eup %1696  ;;  %1206 = vst [vmem:[#allocation2 + $0x8] sm:$0xff] %v1204_v39  ;;  %v1237_v28 = vadd.f32 %v1235_v47, %v1234_v13  ;;  %v1262_v31 = vmul.f32 %v1261_v22, %v2682_v24  ;;  %v1257_v1 = vmul.f32 %v1255_v18, %v2674_v62  ;;  %v1263_v32 = vmul.f32 %v1261_v22, %v2691_v5 }
 0x1a6   :  { %v1221_v33 = vmul.f32 %v1697_v23, %v1219_v34  ;;  %v1243_v35 = vmul.f32 %v1697_v23, %v1241_v19  ;;  %v1259_v36 = vadd.f32 %v1258_v56, %v1256_v20 }
 0x1a7   :  { %v1242_v12 = vadd.f32 %v1240_v15, %v1237_v28  ;;  %v1260_v38 = vadd.f32 %v1258_v56, %v1257_v1 }
 0x1a8   :  { %v1699_v40 = vpop.eup %1698  ;;  %v1225_v16 = vsel %vm2750_vm5, %v1221_v33, %v1223_v60  ;;  %v1248_v17 = vsel %vm2750_vm5, %v1243_v35, %v1246_v26  ;;  %v1264_v44 = vadd.f32 %v1262_v31, %v1259_v36 }
 0x1a9   :  { %1227 = vst [vmem:[#allocation8] sm:$0xff] %v1225_v16  ;;  %v1222_v24 = vmul.f32 %v1699_v40, %v1220_v6  ;;  %v1244_v62 = vmul.f32 %v1699_v40, %v1242_v12  ;;  %v1265_v5 = vadd.f32 %v1263_v32, %v1260_v38 }
 0x1aa   :  { %1250 = vst [vmem:[#allocation8 + $0x10] sm:$0xff] %v1248_v17  ;;  %v1266_v46 = vmul.f32 %v1697_v23, %v1264_v44 }
 0x1ab   :  { %v1226_v48 = vsel %vm2765_vm9, %v1222_v24, %v1224_v42  ;;  %v1249_v49 = vsel %vm2765_vm9, %v1244_v62, %v1247_v43  ;;  %v1267_v29 = vmul.f32 %v1699_v40, %v1265_v5 }
 0x1ac   :  { %1228 = vst [vmem:[#allocation8 + $0x8] sm:$0xff] %v1226_v48  ;;  %v1271_v51 = vsel %vm2750_vm5, %v1266_v46, %v1269_v45 }
 0x1ad   :  { %1251 = vst [vmem:[#allocation8 + $0x18] sm:$0xff] %v1249_v49  ;;  %v1272_v30 = vsel %vm2765_vm9, %v1267_v29, %v1270_v25 }
 0x1ae   :  { %1273 = vst [vmem:[#allocation8 + $0x20] sm:$0xff] %v1271_v51 }
 0x1af   :  { %1274 = vst [vmem:[#allocation8 + $0x28] sm:$0xff] %v1272_v30 }
 0x1b0 PF:  { %s1640_s24 = sld [smem:[#allocation3 + $0x607]] }
 0x1b1   :  { %s1641_s25 = sld [smem:[#allocation3 + $0x687]] }
 0x1b2   :  { %s1642_s26 = sld [smem:[#allocation3 + $0x707]] }
 0x1b3   :  { %s1643_s27 = sld [smem:[#allocation3 + $0x787]] }
 0x1b6   :  { %p1276_p7 = scmp.lt.f32.partialorder %s1640_s24, 128.0 }
 0x1b7   :  { %p1278_p8 = scmp.gt.f32.partialorder %s1641_s25, 0.0 }
 0x1b8   :  { %p1282_p10 = scmp.lt.f32.partialorder %s1642_s26, 16.0 }
 0x1b9   :  { %p1279_p9 = pnand %p1278_p8, %p1276_p7  ;;  %p1286_p13 = scmp.gt.f32.partialorder %s1643_s27, 0.0 }
 0x1bb   :  { %p1280_p11 = pneg %p1279_p9 }
 0x1bd   :  { %p1283_p12 = pnand %p1282_p10, %p1280_p11 }
 0x1bf   :  { %p1284_p0 = pneg %p1283_p12 }
 0x1c1   :  { %p1287_p1 = pnand %p1286_p13, %p1284_p0 }
 0x1c2   :  { %s1644_s28 = sld [smem:[#allocation3 + $0x7]] (!%p1287_p1) }
 0x1c3   :  { %1290 = sbr.rel (%p1287_p1) target bundleno = 492 (0x1ec), region = 49  ;;  %s1645_s29 = sld [smem:[#allocation3 + $0x87]] (!%p1287_p1) }
 0x1c4   :  { %s1646_s30 = sld [smem:[#allocation3 + $0x107]] (!%p1287_p1) }
 0x1c5   :  { %s1647_s3 = sld [smem:[#allocation3 + $0x187]] (!%p1287_p1) }
 0x1c6   :  { %s1648_s4 = sld [smem:[#allocation3 + $0x207]] (!%p1287_p1) }
 0x1c7   :  { %s2792_s5 = sld [smem:[#allocation3 + $0x287]] (!%p1287_p1) }
 0x1c8   :  { %v1292_v52 = vstv %s1644_s28  ;;  %s2794_s6 = sld [smem:[#allocation3 + $0x407]]  ;;  %v1363_v20 = vld [vmem:[#allocation2] sm:$0xff]  ;;  %v1364_v12 = vld [vmem:[#allocation2 + $0x8] sm:$0xff]  ;;  %v1442_v31 = vld [vmem:[#allocation8 + $0x28] sm:$0xff] }
 0x1c9   :  { %v1293_v53 = vmul.f32 %v1292_v52, %v1792_v8  ;;  %v1295_v37 = vstv %s1645_s29  ;;  %s1651_s7 = sld [smem:[#allocation3 + $0x307]] }
 0x1ca   :  { %v1296_v14 = vmul.f32 %v1295_v37, %v1794_v10  ;;  %s2798_s8 = sld [smem:[#allocation3 + $0x387]]  ;;  %v1297_v54 = vmul.f32 %v1295_v37, %v1796_v11  ;;  %v1301_v21 = vstv %s1646_s30 }
 0x1cb   :  { %v1305_v55 = vstv %s1647_s3  ;;  %s2801_s9 = sld [smem:[#allocation3 + $0x587]] }
 0x1cc   :  { %v1298_v57 = vadd.f32 %v1296_v14, %v1293_v53  ;;  %v1306_v58 = vmul.f32 %v1305_v55, %v1792_v8  ;;  %v1308_v59 = vstv %s1648_s4  ;;  %s2804_s10 = sld [smem:[#allocation3 + $0x487]]  ;;  %v1299_v41 = vadd.f32 %v1297_v54, %v1293_v53 }
 0x1cd   :  { %v1309_v61 = vmul.f32 %v1308_v59, %v1794_v10  ;;  %s2807_s11 = sld [smem:[#allocation3 + $0x507]]  ;;  %v1310_v63 = vmul.f32 %v1308_v59, %v1796_v11  ;;  %v1314_v2 = vstv %s2792_s5 }
 0x1ce   :  { %v2810_v0 = vadd.f32 %v1301_v21, %v1298_v57  ;;  %v1334_v47 = vstv %s2794_s6  ;;  %s2814_s12 = sld [smem:[#allocation6 + $0x7]]  ;;  %v2816_v3 = vadd.f32 %v1301_v21, %v1299_v41 }
 0x1cf   :  { %v1311_v8 = vadd.f32 %v1309_v61, %v1306_v58  ;;  %v1331_v27 = vstv %s1651_s7  ;;  %v1312_v34 = vadd.f32 %v1310_v63, %v1306_v58  ;;  %s2818_s13 = sld [smem:[#allocation6 + $0x187]] }
 0x1d0   :  { %v1332_v10 = vmul.f32 %v1331_v27, %v2810_v0  ;;  %v1338_v4 = vstv %s2798_s8  ;;  %s2822_s14 = sld [smem:[#allocation6 + $0x307]]  ;;  %vm1317_vm10 = vcmp.ge.f32.partialorder %v2810_v0, 0.0  ;;  %vm1318_vm11 = vcmp.ge.f32.partialorder %v2816_v3, 0.0 }
 0x1d1   :  { %v2824_v11 = vadd.f32 %v1314_v2, %v1311_v8  ;;  %v1333_v6 = vmul.f32 %v1331_v27, %v2816_v3  ;;  %s2829_s15 = sld [smem:[#allocation6 + $0x87]]  ;;  %v1348_v50 = vstv %s2801_s9  ;;  %v2833_v13 = vadd.f32 %v1314_v2, %v1312_v34  ;;  %v1395_v34 = vld [vmem:[#allocation8] sm:$0xff] }
 0x1d2   :  { %v1335_v7 = vadd.f32 %v1334_v47, %v1332_v10  ;;  %v1345_v9 = vstv %s2804_s10  ;;  %s2848_s18 = sld [smem:[#allocation6 + $0x387]]  ;;  %v1418_v10 = vld [vmem:[#allocation8 + $0x10] sm:$0xff] }
 0x1d3   :  { %vm1319_vm12 = vcmp.ge.f32.partialorder %v2824_v11, 0.0  ;;  %v1323_v15 = vadd.f32 %v2824_v11, %v2810_v0  ;;  %v1339_v18 = vmul.f32 %v1338_v4, %v2824_v11  ;;  %v1346_v56 = vmul.f32 %v1345_v9, %v2810_v0  ;;  %s2851_s0 = sld [smem:[#allocation6 + $0x207]] }
 0x1d4   :  { %vm2840_vm13 = vmand %vm1317_vm10, %vm1319_vm12  ;;  %v1352_v19 = vstv %s2807_s11  ;;  %vm1320_vm14 = vcmp.ge.f32.partialorder %v2833_v13, 0.0  ;;  %v1324_v22 = vadd.f32 %v2833_v13, %v2816_v3  ;;  %v1336_v23 = vadd.f32 %v1334_v47, %v1333_v6  ;;  %s2862_s1 = sld [smem:[#allocation6 + $0x107]] }
 0x1d5   :  { %vm1325_vm15 = vcmp.le.f32.partialorder %v1323_v15, 1.0  ;;  %v1341_v60 = vadd.f32 %v1339_v18, %v1335_v7  ;;  %v1349_v26 = vadd.f32 %v1348_v50, %v1346_v56  ;;  %v1353_v28 = vmul.f32 %v1352_v19, %v2824_v11  ;;  %vm2855_vm0 = vmand %vm1318_vm11, %vm1320_vm14  ;;  %s2871_s19 = sld [smem:[#allocation6 + $0x407]] }
 0x1d6   :  { %vm1326_vm1 = vcmp.le.f32.partialorder %v1324_v22, 1.0  ;;  %v1340_v1 = vmul.f32 %v1338_v4, %v2833_v13  ;;  %v1347_v32 = vmul.f32 %v1345_v9, %v2816_v3  ;;  %v1354_v33 = vmul.f32 %v1352_v19, %v2833_v13  ;;  %vm2866_vm2 = vmand %vm2840_vm13, %vm1325_vm15  ;;  %s2875_s20 = sld [smem:[#allocation6 + $0x287]] }
 0x1d7   :  { %v1355_v36 = vadd.f32 %v1353_v28, %v1349_v26  ;;  %vm1367_vm3 = vcmp.ge.f32.partialorder %v1341_v60, -1.0  ;;  %vm1371_vm4 = vcmp.lt.f32.partialorder %v1341_v60, %v1363_v20  ;;  %v1382_v38 = vstv %s2814_s12  ;;  %vm2880_vm6 = vmand %vm2855_vm0, %vm1326_vm1  ;;  %v1441_v26 = vld [vmem:[#allocation8 + $0x20] sm:$0xff] }
 0x1d8   :  { %v1342_v40 = vadd.f32 %v1340_v1, %v1336_v23  ;;  %v1350_v16 = vadd.f32 %v1348_v50, %v1347_v32  ;;  %v1383_v42 = vmul.f32 %v1382_v38, %v2810_v0  ;;  %v1385_v17 = vstv %s2822_s14  ;;  %v1419_v23 = vld [vmem:[#allocation8 + $0x18] sm:$0xff] }
 0x1d9   :  { %vm1357_vm5 = vcmp.gt.f32.partialorder %v1355_v36, 1e-12  ;;  %v1388_v44 = vstv %s2818_s13  ;;  %v1384_v24 = vmul.f32 %v1382_v38, %v2816_v3  ;;  %v1404_v62 = vstv %s2829_s15 }
 0x1da   :  { %v1359_v45 = vsel %vm1357_vm5, %v1355_v36, 1.0  ;;  %vm1365_vm7 = vmand %vm2866_vm2, %vm1357_vm5  ;;  %v1356_v5 = vadd.f32 %v1354_v33, %v1350_v16  ;;  %vm1368_vm8 = vcmp.ge.f32.partialorder %v1342_v40, -1.0  ;;  %vm1372_vm9 = vcmp.lt.f32.partialorder %v1342_v40, %v1364_v12 }
 0x1db   :  { %1700 = vrcp.f32 %v1359_v45  ;;  %vm1369_vm10 = vmand %vm1365_vm7, %vm1367_vm3  ;;  %v1386_v46 = vadd.f32 %v1385_v17, %v1383_v42  ;;  %v1389_v25 = vmul.f32 %v1388_v44, %v2824_v11  ;;  %v1387_v48 = vadd.f32 %v1385_v17, %v1384_v24 }
 0x1dc   :  { %vm2892_vm11 = vmand %vm1369_vm10, %vm1371_vm4  ;;  %vm1358_vm12 = vcmp.gt.f32.partialorder %v1356_v5, 1e-12  ;;  %v1390_v29 = vmul.f32 %v1388_v44, %v2833_v13  ;;  %v1405_v51 = vmul.f32 %v1404_v62, %v2810_v0  ;;  %v1407_v30 = vstv %s2848_s18 }
 0x1dd   :  { %v1375_v52 = vsel %vm2892_vm11, %v1341_v60, %v1363_v20  ;;  %v1360_v53 = vsel %vm1358_vm12, %v1356_v5, 1.0  ;;  %vm1366_vm13 = vmand %vm2880_vm6, %vm1358_vm12  ;;  %v1391_v37 = vadd.f32 %v1389_v25, %v1386_v46  ;;  %v1410_v14 = vstv %s2851_s0  ;;  %v1396_v20 = vld [vmem:[#allocation8 + $0x8] sm:$0xff] }
 0x1de   :  { %1377 = vst [vmem:[#allocation2] sm:$0xff] %v1375_v52  ;;  %1702 = vrcp.f32 %v1360_v53  ;;  %vm1370_vm14 = vmand %vm1366_vm13, %vm1368_vm8  ;;  %v1392_v54 = vadd.f32 %v1390_v29, %v1387_v48  ;;  %v1408_v21 = vadd.f32 %v1407_v30, %v1405_v51  ;;  %v1411_v55 = vmul.f32 %v1410_v14, %v2824_v11 }
 0x1df   :  { %vm2907_vm15 = vmand %vm1370_vm14, %vm1372_vm9  ;;  %v1406_v58 = vmul.f32 %v1404_v62, %v2816_v3  ;;  %v1412_v59 = vmul.f32 %v1410_v14, %v2833_v13  ;;  %v1427_v41 = vstv %s2862_s1  ;;  %v1430_v61 = vstv %s2871_s19 }
 0x1e0   :  { %v1376_v63 = vsel %vm2907_vm15, %v1342_v40, %v1364_v12  ;;  %v1413_v2 = vadd.f32 %v1411_v55, %v1408_v21  ;;  %v1428_v47 = vmul.f32 %v1427_v41, %v2810_v0  ;;  %v1433_v8 = vstv %s2875_s20 }
 0x1e1   :  { %v1701_v27 = vpop.eup %1700  ;;  %1378 = vst [vmem:[#allocation2 + $0x8] sm:$0xff] %v1376_v63  ;;  %v1409_v4 = vadd.f32 %v1407_v30, %v1406_v58  ;;  %v1434_v6 = vmul.f32 %v1433_v8, %v2824_v11  ;;  %v1429_v7 = vmul.f32 %v1427_v41, %v2816_v3  ;;  %v1435_v9 = vmul.f32 %v1433_v8, %v2833_v13 }
 0x1e2   :  { %v1393_v50 = vmul.f32 %v1701_v27, %v1391_v37  ;;  %v1415_v15 = vmul.f32 %v1701_v27, %v1413_v2  ;;  %v1431_v18 = vadd.f32 %v1430_v61, %v1428_v47 }
 0x1e3   :  { %v1414_v56 = vadd.f32 %v1412_v59, %v1409_v4  ;;  %v1432_v39 = vadd.f32 %v1430_v61, %v1429_v7 }
 0x1e4   :  { %v1703_v19 = vpop.eup %1702  ;;  %v1397_v0 = vsel %vm2892_vm11, %v1393_v50, %v1395_v34  ;;  %v1420_v22 = vsel %vm2892_vm11, %v1415_v15, %v1418_v10  ;;  %v1436_v60 = vadd.f32 %v1434_v6, %v1431_v18 }
 0x1e5   :  { %1399 = vst [vmem:[#allocation8] sm:$0xff] %v1397_v0  ;;  %v1394_v11 = vmul.f32 %v1703_v19, %v1392_v54  ;;  %v1416_v3 = vmul.f32 %v1703_v19, %v1414_v56  ;;  %v1437_v13 = vadd.f32 %v1435_v9, %v1432_v39 }
 0x1e6   :  { %1422 = vst [vmem:[#allocation8 + $0x10] sm:$0xff] %v1420_v22  ;;  %v1438_v28 = vmul.f32 %v1701_v27, %v1436_v60 }
 0x1e7   :  { %v1398_v1 = vsel %vm2907_vm15, %v1394_v11, %v1396_v20  ;;  %v1421_v32 = vsel %vm2907_vm15, %v1416_v3, %v1419_v23  ;;  %v1439_v33 = vmul.f32 %v1703_v19, %v1437_v13 }
 0x1e8   :  { %1400 = vst [vmem:[#allocation8 + $0x8] sm:$0xff] %v1398_v1  ;;  %v1443_v35 = vsel %vm2892_vm11, %v1438_v28, %v1441_v26 }
 0x1e9   :  { %1423 = vst [vmem:[#allocation8 + $0x18] sm:$0xff] %v1421_v32  ;;  %v1444_v36 = vsel %vm2907_vm15, %v1439_v33, %v1442_v31 }
 0x1ea   :  { %1445 = vst [vmem:[#allocation8 + $0x20] sm:$0xff] %v1443_v35 }
 0x1eb   :  { %1446 = vst [vmem:[#allocation8 + $0x28] sm:$0xff] %v1444_v36 }
 0x1ec PF:  { %s1453_s23 = sshll.u32 %s2942_s2, 4  ;;  %s1764_s24 = smov [#allocation8]   ;;  %s1454_s23 = int_to_ptr.hbm [resolvable:$true] %s1453_s23 }
 0x1ed   :  { %s1451_s25 = sshll.u32 %s1764_s24, 4  ;;  %s1452_s25 = int_to_ptr.vmem [resolvable:$true] %s1451_s25 }
 0x1ee   :  { %1459 = dma.vmem_to_hbm [thread:$0]  %s1452_s25, 768, %s1454_s23, [#allocation4], %s1759_s16, %s1759_s16, %s1760_s17  }
 0x1ef   :  { %1756 = dma.done.wait [#allocation4], 768  }
 0x1f0   :  { %1757 = vsyncadd [#allocation4], 4294966528 }
 0x1f1   :  { %1464 = vsyncpa [#allocation4], 1 }
 0x1f2   :  { %1465 = vsyncpa [#allocation5], 1 }
 0x1f3   :  { %1466 = vsyncpa [#allocation7], 1 }

</bundles_post_ra>
